<compile_context>
chip_gen: v7x
topology: tpu7x:2x2x1
jax: 0.10.0
libtpu: 0.0.40
codegen_flags: <defaults>
</compile_context>

<pallas_src>
import functools

import jax
import jax.numpy as jnp
import numpy as np
from jax import lax
from jax.experimental import pallas as pl
from jax.experimental.pallas import tpu as pltpu


# ----------------------------------------------------------------------------
# Fused kernel: conv1 GEMM + relu + maxpool + concat + conv2 + relu + conv3.
# One grid step == `bb` batch elements.
# ----------------------------------------------------------------------------
def _finenet_kernel(pat_ref, w1_ref, b1_ref, w2_ref, b2_ref, w3_ref, b3_ref,
                    out_ref, pad_ref, lhs_ref, *, bb, hp, wp):
    m = hp * wp
    c = pad_ref.shape[-1]                 # 64 channels after concat
    wpad = pad_ref.shape[2]               # sublane-rounded padded width
    kpad = pat_ref.shape[-1]              # 256 (conv1 contraction, padded)
    f32 = jnp.float32

    # ---- conv1 + ReLU: one bf16 GEMM over all images and pool phases -------
    p = pat_ref[...].reshape(bb * 4 * m, kpad)                      # bf16
    c1 = jnp.dot(p, w1_ref[...], preferred_element_type=f32)
    c1 = jnp.maximum(c1 + b1_ref[...], 0.0)                         # (bb*4m, c)

    # ---- 2x2 max-pool == elementwise max over the 4 pooling-phase slabs ----
    pooled = jnp.max(c1.reshape(bb, 4, m, c), axis=1)               # (bb, m, c)

    # ---- torch.cat((pooled, y), channel): y rides in the last zero-padded
    #      conv1-im2col column of phase-0 rows, already (sublane = pixel) -----
    ycol = pat_ref[:, 0:m, kpad - 1:kpad].astype(f32)               # (bb, m, 1)
    lane = lax.broadcasted_iota(jnp.int32, (bb, m, c), 2)
    cat = jnp.where(lane == c - 1,
                    jnp.broadcast_to(ycol, (bb, m, c)), pooled)     # (bb, m, c)

    # ---- zero only the 2-wide halo borders (interior fully overwritten) ----
    zr = jnp.zeros((bb, 2, wpad, c), f32)
    pad_ref[:, 0:2, :, :] = zr
    pad_ref[:, hp + 2:hp + 4, :, :] = zr
    zc = jnp.zeros((bb, hp, 2, c), f32)
    pad_ref[:, 2:hp + 2, 0:2, :] = zc
    pad_ref[:, 2:hp + 2, wp + 2:wp + 4, :] = zc

    pad_ref[:, 2:hp + 2, 2:wp + 2, :] = cat.reshape(bb, hp, wp, c)

    # ---- conv2 im2col: 13 aligned 128-lane paired-tap stores (taps 25->26) -
    def pair_block(t0):
        kh0, kw0 = divmod(t0, 5)
        a = pad_ref[:, kh0:kh0 + hp, kw0:kw0 + wp, :].reshape(bb * m, c)
        if t0 + 1 < 25:
            kh1, kw1 = divmod(t0 + 1, 5)
            b = pad_ref[:, kh1:kh1 + hp, kw1:kw1 + wp, :].reshape(bb * m, c)
        else:
            b = jnp.zeros((bb * m, c), f32)
        return jnp.concatenate([a, b], axis=-1).astype(lhs_ref.dtype)

    for pp in range(13):
        lhs_ref[:, pp * 2 * c:(pp + 1) * 2 * c] = pair_block(2 * pp)

    # ---- conv2 + ReLU: single (bb*m, 1664) x (1664, 64) MXU GEMM -----------
    h = jnp.dot(lhs_ref[...], w2_ref[...], preferred_element_type=f32)
    h = jnp.maximum(h + b2_ref[...], 0.0)                           # (bb*m, c)

    # pad_ref is reused for conv2's output: cat was fully consumed into
    # lhs_ref above, so overwriting its interior here is safe (same-ref ops
    # keep program order).
    pad_ref[:, 2:hp + 2, 2:wp + 2, :] = h.reshape(bb, hp, wp, c)

    # ---- conv3 (single output channel): 25-tap VPU accumulation ------------
    o = jnp.zeros((bb, hp, wp), f32)
    for kh in range(5):
        for kw in range(5):
            w3t = w3_ref[kh * 5 + kw, :]                            # (c,)
            win = pad_ref[:, kh:kh + hp, kw:kw + wp, :]             # (bb,hp,wp,c)
            o = o + jnp.sum(win * w3t, axis=-1)

    out_ref[0] = o.reshape(bb, m) + b3_ref[...]                     # lane-dense


# ----------------------------------------------------------------------------
# Batch-block picker: fill MXU rows, bound VMEM, keep >= 2 grid steps.
# ----------------------------------------------------------------------------
def _pick_bb(n, m):
    bb = max(1, 256 // max(4 * m, 1))                  # conv1 GEMM rows ~256
    bb = min(bb, 8)
    bb = min(bb, max(1, (8 << 20) // max(m * 26 * 64 * 2, 1)))  # lhs <= ~8 MiB
    if n >= 2:
        bb = min(bb, max(1, n // 2))                   # >=2 steps for 2 TCs
    return max(1, min(bb, n))


# ----------------------------------------------------------------------------
# Public wrapper: PyTorch-style NCHW in / NCHW out.
# ----------------------------------------------------------------------------
def finenet_forward(params, x_nchw, y_nchw):
    x = jnp.transpose(x_nchw, (0, 2, 3, 1)).astype(jnp.float32)   # NHWC
    y = jnp.transpose(y_nchw, (0, 2, 3, 1)).astype(jnp.float32)
    n, h, w, cin = x.shape
    k = 9
    h1, w1 = (h - k) // 2 + 1, (w - k) // 2 + 1        # conv1 output size
    hp, wp = h1 // 2, w1 // 2                          # after maxpool(2)
    m = hp * wp
    kkc = k * k * cin                                  # 243
    kpad = ((kkc + 127) // 128) * 128                  # 256
    cout1 = params["w1"].shape[-1]                     # 63
    c2 = cout1 + y.shape[-1]                           # 64

    assert cout1 == 63 and y.shape[-1] == 1 and c2 == 64, \
        "fineNet expects conv1 Cout=63 and a 1-channel y (63+1=64)"
    assert y.shape[1:3] == (hp, wp), (y.shape, hp, wp)
    assert kpad > kkc                                   # spare zero column for y

    bb = _pick_bb(n, m)
    n_blocks = -(-n // bb)
    n_pad = n_blocks * bb

    # conv1 im2col (XLA glue: one fused strided gather), rows grouped by the
    # 2x2 pooling phase so the pool becomes a max over 4 GEMM slabs.
    taps = []
    for kh in range(k):
        for kw in range(k):
            taps.append(x[:, kh:kh + 4 * hp - 1:2, kw:kw + 4 * wp - 1:2, :])
    pat = jnp.concatenate(taps, axis=-1)                # (n, 2hp, 2wp, kkc)
    pat = pat.reshape(n, hp, 2, wp, 2, kkc).transpose(0, 2, 4, 1, 3, 5)
    pat = pat.reshape(n, 4 * m, kkc)
    pat = jnp.pad(pat, ((0, n_pad - n), (0, 0), (0, kpad - kkc)))
    # Stash y in the last zero-padded K column of pool-phase-0 rows: it rides
    # the existing DMA and arrives with the (sublane = pixel) layout the
    # concat needs; w1's padded row is zero so the conv1 GEMM is unchanged.
    y_flat = jnp.pad(y.reshape(n, m), ((0, n_pad - n), (0, 0)))
    pat = pat.at[:, 0:m, kpad - 1].set(y_flat)
    patches = pat.astype(jnp.bfloat16)

    # Weight prep: aligned bf16 GEMM operands.
    w1g = jnp.pad(params["w1"].reshape(kkc, cout1),
                  ((0, kpad - kkc), (0, c2 - cout1))).astype(jnp.bfloat16)
    b1p = jnp.pad(params["b1"], (0, c2 - cout1)).reshape(1, c2)
    k2 = 25 * c2
    k2p = 26 * c2                                       # 1664 = 13 * 128
    w2p = jnp.pad(params["w2"].reshape(k2, c2),
                  ((0, k2p - k2), (0, 0))).astype(jnp.bfloat16)
    b2r = params["b2"].reshape(1, c2)
    w3r = params["w3"].reshape(25, c2)                  # f32, used on VPU
    b3r = params["b3"].reshape(1, 1)

    wpad_dim = ((wp + 4 + 7) // 8) * 8                  # sublane-rounded minor-2

    est = (2 * bb * 4 * m * kpad * 2                    # patches, double-buffered
           + 2 * (kpad + k2p) * c2 * 2                  # weights
           + 2 * bb * m * 4                             # output blocks
           + bb * (hp + 4) * wpad_dim * c2 * 4          # padded-halo scratch
           + bb * m * k2p * 2                           # conv2 im2col scratch
           + (1 << 20))
    vmem_limit = int(min(64 << 20, max(32 << 20, 2 * est)))

    kern = functools.partial(_finenet_kernel, bb=bb, hp=hp, wp=wp)
    out = pl.pallas_call(
        kern,
        out_shape=jax.ShapeDtypeStruct((n_blocks, bb, m), jnp.float32),
        grid_spec=pltpu.PrefetchScalarGridSpec(
            num_scalar_prefetch=0,
            grid=(n_blocks,),
            in_specs=[
                pl.BlockSpec((bb, 4 * m, kpad), lambda i: (i, 0, 0)),  # patches+y
                pl.BlockSpec((kpad, c2), lambda i: (0, 0)),            # w1
                pl.BlockSpec((1, c2), lambda i: (0, 0)),               # b1
                pl.BlockSpec((k2p, c2), lambda i: (0, 0)),             # w2
                pl.BlockSpec((1, c2), lambda i: (0, 0)),               # b2
                pl.BlockSpec((25, c2), lambda i: (0, 0)),              # w3
                pl.BlockSpec((1, 1), lambda i: (0, 0)),                # b3
            ],
            out_specs=pl.BlockSpec((1, bb, m), lambda i: (i, 0, 0)),
            scratch_shapes=[
                pltpu.VMEM((bb, hp + 4, wpad_dim, c2), jnp.float32),  # padded halo
                pltpu.VMEM((bb * m, k2p), jnp.bfloat16),              # conv2 im2col
            ],
        ),
        compiler_params=pltpu.CompilerParams(
            dimension_semantics=("parallel",),
            vmem_limit_bytes=vmem_limit),
    )(patches, w1g, b1p, w2p, b2r, w3r, b3r)

    out = out.reshape(n_pad, m)[:n].reshape(n, hp, wp)
    return out[:, None, :, :]                            # (N, 1, hp, wp)


# ----------------------------------------------------------------------------
# Parameter init (matches fineNet._initialize_weights: N(0, 0.01), zero bias).
# ----------------------------------------------------------------------------
def init_params(key):
    k1, k2, k3 = jax.random.split(key, 3)
    return dict(
        w1=0.01 * jax.random.normal(k1, (9, 9, 3, 63), jnp.float32),
        b1=jnp.zeros((63,), jnp.float32),
        w2=0.01 * jax.random.normal(k2, (5, 5, 64, 64), jnp.float32),
        b2=jnp.zeros((64,), jnp.float32),
        w3=0.01 * jax.random.normal(k3, (5, 5, 64, 1), jnp.float32),
        b3=jnp.zeros((1,), jnp.float32),
    )


# ----------------------------------------------------------------------------
# Pure-XLA reference.
# ----------------------------------------------------------------------------
def reference_forward(params, x_nchw, y_nchw):
    x = jnp.transpose(x_nchw, (0, 2, 3, 1))
    y = jnp.transpose(y_nchw, (0, 2, 3, 1))
    dn = ("NHWC", "HWIO", "NHWC")
    c1 = lax.conv_general_dilated(x, params["w1"], (2, 2), "VALID",
                                  dimension_numbers=dn)
    c1 = jnp.maximum(c1 + params["b1"], 0.0)
    p = lax.reduce_window(c1, -jnp.inf, lax.max, (1, 2, 2, 1), (1, 2, 2, 1),
                          "VALID")
    cat = jnp.concatenate([p, y], axis=-1)
    c2 = lax.conv_general_dilated(cat, params["w2"], (1, 1), ((2, 2), (2, 2)),
                                  dimension_numbers=dn)
    c2 = jnp.maximum(c2 + params["b2"], 0.0)
    c3 = lax.conv_general_dilated(c2, params["w3"], (1, 1), ((2, 2), (2, 2)),
                                  dimension_numbers=dn)
    c3 = c3 + params["b3"]
    return jnp.transpose(c3, (0, 3, 1, 2))


if __name__ == "__main__":
    key = jax.random.PRNGKey(0)
    kp, kx, ky = jax.random.split(key, 3)
    params = init_params(kp)

    N, H, W = 2, 41, 41                       # conv1: (41-9)//2+1 = 17; pool -> 8
    Hp = ((H - 9) // 2 + 1) // 2              # 8
    x = jax.random.normal(kx, (N, 3, H, W), jnp.float32)
    y = jax.random.normal(ky, (N, 1, Hp, Hp), jnp.float32)

    out = jax.jit(finenet_forward)(params, x, y)
    out = jax.block_until_ready(out)
    assert out.shape == (N, 1, Hp, Hp), out.shape

    ref = jax.jit(reference_forward)(params, x, y)
    ref = jax.block_until_ready(ref)
    np.testing.assert_allclose(np.asarray(out), np.asarray(ref),
                               rtol=2e-2, atol=2e-3)
    print("KERNEL_OK")
</pallas_src>

<mosaic_0001>
module attributes {stable_mosaic.version = 11 : i64} {
  func.func @_finenet_kernel(%arg0: i32, %arg1: memref<1x256x256xbf16, #tpu.memory_space<vmem>>, %arg2: memref<256x64xbf16, #tpu.memory_space<vmem>>, %arg3: memref<1x64xf32, #tpu.memory_space<vmem>>, %arg4: memref<1664x64xbf16, #tpu.memory_space<vmem>>, %arg5: memref<1x64xf32, #tpu.memory_space<vmem>>, %arg6: memref<25x64xf32, #tpu.memory_space<vmem>>, %arg7: memref<1x1xf32, #tpu.memory_space<vmem>>, %arg8: memref<1x1x64xf32, #tpu.memory_space<vmem>>, %arg9: memref<1x12x16x64xf32, #tpu.memory_space<vmem>>, %arg10: memref<64x1664xbf16, #tpu.memory_space<vmem>>) attributes {dimension_semantics = [#tpu.dimension_semantics<parallel>], iteration_bounds = array<i64: 2>, scalar_prefetch = 0 : i64, scratch_operands = 2 : i64, tpu.core_type = #tpu.core_type<tc>, window_params = [{transform_indices = @transform_0, window_bounds = array<i64: 1, 256, 256>}, {pipeline_mode = #tpu.pipeline_mode<synchronous>, transform_indices = @transform_1, window_bounds = array<i64: 256, 64>}, {pipeline_mode = #tpu.pipeline_mode<synchronous>, transform_indices = @transform_2, window_bounds = array<i64: 1, 64>}, {pipeline_mode = #tpu.pipeline_mode<synchronous>, transform_indices = @transform_3, window_bounds = array<i64: 1664, 64>}, {pipeline_mode = #tpu.pipeline_mode<synchronous>, transform_indices = @transform_4, window_bounds = array<i64: 1, 64>}, {pipeline_mode = #tpu.pipeline_mode<synchronous>, transform_indices = @transform_5, window_bounds = array<i64: 25, 64>}, {pipeline_mode = #tpu.pipeline_mode<synchronous>, transform_indices = @transform_6, window_bounds = array<i64: 1, 1>}, {transform_indices = @transform_7, window_bounds = array<i64: 1, 1, 64>}]} {
    %c0 = arith.constant 0 : index
    %c0_0 = arith.constant 0 : index
    %c0_1 = arith.constant 0 : index
    %0 = vector.load %arg1[%c0, %c0_0, %c0_1] : memref<1x256x256xbf16, #tpu.memory_space<vmem>>, vector<1x256x256xbf16>
    %1 = vector.shape_cast %0 : vector<1x256x256xbf16> to vector<256x256xbf16>
    %c0_2 = arith.constant 0 : index
    %c0_3 = arith.constant 0 : index
    %2 = vector.load %arg2[%c0_2, %c0_3] : memref<256x64xbf16, #tpu.memory_space<vmem>>, vector<256x64xbf16>
    %cst = arith.constant dense<0.000000e+00> : vector<256x64xf32>
    %3 = tpu.matmul %1, %2, %cst {dimension_numbers = #tpu.dot_dimension_numbers<[1], [0], [0], [1], [0, 0, 1, 1], [], []>} : vector<256x256xbf16>, vector<256x64xbf16>, vector<256x64xf32> -> vector<256x64xf32>
    %c0_4 = arith.constant 0 : index
    %c0_5 = arith.constant 0 : index
    %4 = vector.load %arg3[%c0_4, %c0_5] : memref<1x64xf32, #tpu.memory_space<vmem>>, vector<1x64xf32>
    %5 = vector.broadcast %4 : vector<1x64xf32> to vector<256x64xf32>
    %6 = arith.addf %3, %5 : vector<256x64xf32>
    %cst_6 = arith.constant 0.000000e+00 : f32
    %7 = vector.broadcast %cst_6 : f32 to vector<256x64xf32>
    %8 = arith.maximumf %6, %7 : vector<256x64xf32>
    %9 = vector.shape_cast %8 : vector<256x64xf32> to vector<1x4x64x64xf32>
    %cst_7 = arith.constant dense<0xFF800000> : vector<1x64x64xf32>
    %10 = vector.multi_reduction <maximumf>, %9, %cst_7 [1] : vector<1x4x64x64xf32> to vector<1x64x64xf32>
    %c0_8 = arith.constant 0 : index
    %c0_9 = arith.constant 0 : index
    %c255 = arith.constant 255 : index
    %11 = vector.load %arg1[%c0_8, %c0_9, %c255] : memref<1x256x256xbf16, #tpu.memory_space<vmem>>, vector<1x64x1xbf16>
    %12 = arith.extf %11 : vector<1x64x1xbf16> to vector<1x64x1xf32>
    %13 = tpu.iota {dimensions = array<i32: 2>} : vector<1x64x64xi32>
    %c63_i32 = arith.constant 63 : i32
    %14 = vector.broadcast %c63_i32 : i32 to vector<1x64x64xi32>
    %15 = arith.cmpi eq, %13, %14 : vector<1x64x64xi32>
    %16 = vector.shape_cast %12 : vector<1x64x1xf32> to vector<1x64x1xf32>
    %17 = vector.broadcast %16 : vector<1x64x1xf32> to vector<1x64x64xf32>
    %18 = arith.select %15, %17, %10 : vector<1x64x64xi1>, vector<1x64x64xf32>
    %cst_10 = arith.constant 0.000000e+00 : f32
    %19 = vector.broadcast %cst_10 : f32 to vector<1x2x16x64xf32>
    %c0_11 = arith.constant 0 : index
    %c0_12 = arith.constant 0 : index
    %c0_13 = arith.constant 0 : index
    %c0_14 = arith.constant 0 : index
    %20 = vector.load %arg9[%c0_11, %c0_12, %c0_13, %c0_14] : memref<1x12x16x64xf32, #tpu.memory_space<vmem>>, vector<1x2x16x64xf32>
    tpu.vector_store %arg9[%c0_11, %c0_12, %c0_13, %c0_14], %19 {strides = array<i32>} : memref<1x12x16x64xf32, #tpu.memory_space<vmem>>, vector<1x2x16x64xf32>,
    %c0_15 = arith.constant 0 : index
    %c10 = arith.constant 10 : index
    %c0_16 = arith.constant 0 : index
    %c0_17 = arith.constant 0 : index
    %21 = vector.load %arg9[%c0_15, %c10, %c0_16, %c0_17] : memref<1x12x16x64xf32, #tpu.memory_space<vmem>>, vector<1x2x16x64xf32>
    tpu.vector_store %arg9[%c0_15, %c10, %c0_16, %c0_17], %19 {strides = array<i32>} : memref<1x12x16x64xf32, #tpu.memory_space<vmem>>, vector<1x2x16x64xf32>,
    %cst_18 = arith.constant 0.000000e+00 : f32
    %22 = vector.broadcast %cst_18 : f32 to vector<1x8x2x64xf32>
    %c0_19 = arith.constant 0 : index
    %c2 = arith.constant 2 : index
    %c0_20 = arith.constant 0 : index
    %c0_21 = arith.constant 0 : index
    %23 = vector.load %arg9[%c0_19, %c2, %c0_20, %c0_21] : memref<1x12x16x64xf32, #tpu.memory_space<vmem>>, vector<1x8x2x64xf32>
    tpu.vector_store %arg9[%c0_19, %c2, %c0_20, %c0_21], %22 {strides = array<i32>} : memref<1x12x16x64xf32, #tpu.memory_space<vmem>>, vector<1x8x2x64xf32>,
    %c0_22 = arith.constant 0 : index
    %c2_23 = arith.constant 2 : index
    %c10_24 = arith.constant 10 : index
    %c0_25 = arith.constant 0 : index
    %24 = vector.load %arg9[%c0_22, %c2_23, %c10_24, %c0_25] : memref<1x12x16x64xf32, #tpu.memory_space<vmem>>, vector<1x8x2x64xf32>
    tpu.vector_store %arg9[%c0_22, %c2_23, %c10_24, %c0_25], %22 {strides = array<i32>} : memref<1x12x16x64xf32, #tpu.memory_space<vmem>>, vector<1x8x2x64xf32>,
    %25 = vector.shape_cast %18 : vector<1x64x64xf32> to vector<1x8x8x64xf32>
    %c0_26 = arith.constant 0 : index
    %c2_27 = arith.constant 2 : index
    %c2_28 = arith.constant 2 : index
    %c0_29 = arith.constant 0 : index
    %26 = vector.load %arg9[%c0_26, %c2_27, %c2_28, %c0_29] : memref<1x12x16x64xf32, #tpu.memory_space<vmem>>, vector<1x8x8x64xf32>
    tpu.vector_store %arg9[%c0_26, %c2_27, %c2_28, %c0_29], %25 {strides = array<i32>} : memref<1x12x16x64xf32, #tpu.memory_space<vmem>>, vector<1x8x8x64xf32>,
    %c0_30 = arith.constant 0 : index
    %c0_31 = arith.constant 0 : index
    %c0_32 = arith.constant 0 : index
    %c0_33 = arith.constant 0 : index
    %27 = vector.load %arg9[%c0_30, %c0_31, %c0_32, %c0_33] : memref<1x12x16x64xf32, #tpu.memory_space<vmem>>, vector<1x8x8x64xf32>
    %28 = vector.shape_cast %27 : vector<1x8x8x64xf32> to vector<64x64xf32>
    %c0_34 = arith.constant 0 : index
    %c0_35 = arith.constant 0 : index
    %c1 = arith.constant 1 : index
    %c0_36 = arith.constant 0 : index
    %29 = vector.load %arg9[%c0_34, %c0_35, %c1, %c0_36] : memref<1x12x16x64xf32, #tpu.memory_space<vmem>>, vector<1x8x8x64xf32>
    %30 = vector.shape_cast %29 : vector<1x8x8x64xf32> to vector<64x64xf32>
    %31 = tpu.concatenate %28, %30 in 1 : vector<64x64xf32>, vector<64x64xf32> -> vector<64x128xf32>
    %32 = arith.truncf %31 : vector<64x128xf32> to vector<64x128xbf16>
    %c0_37 = arith.constant 0 : index
    %c0_38 = arith.constant 0 : index
    %33 = vector.load %arg10[%c0_37, %c0_38] : memref<64x1664xbf16, #tpu.memory_space<vmem>>, vector<64x128xbf16>
    tpu.vector_store %arg10[%c0_37, %c0_38], %32 {strides = array<i32>} : memref<64x1664xbf16, #tpu.memory_space<vmem>>, vector<64x128xbf16>,
    %c0_39 = arith.constant 0 : index
    %c0_40 = arith.constant 0 : index
    %c2_41 = arith.constant 2 : index
    %c0_42 = arith.constant 0 : index
    %34 = vector.load %arg9[%c0_39, %c0_40, %c2_41, %c0_42] : memref<1x12x16x64xf32, #tpu.memory_space<vmem>>, vector<1x8x8x64xf32>
    %35 = vector.shape_cast %34 : vector<1x8x8x64xf32> to vector<64x64xf32>
    %c0_43 = arith.constant 0 : index
    %c0_44 = arith.constant 0 : index
    %c3 = arith.constant 3 : index
    %c0_45 = arith.constant 0 : index
    %36 = vector.load %arg9[%c0_43, %c0_44, %c3, %c0_45] : memref<1x12x16x64xf32, #tpu.memory_space<vmem>>, vector<1x8x8x64xf32>
    %37 = vector.shape_cast %36 : vector<1x8x8x64xf32> to vector<64x64xf32>
    %38 = tpu.concatenate %35, %37 in 1 : vector<64x64xf32>, vector<64x64xf32> -> vector<64x128xf32>
    %39 = arith.truncf %38 : vector<64x128xf32> to vector<64x128xbf16>
    %c0_46 = arith.constant 0 : index
    %c128 = arith.constant 128 : index
    %40 = vector.load %arg10[%c0_46, %c128] : memref<64x1664xbf16, #tpu.memory_space<vmem>>, vector<64x128xbf16>
    tpu.vector_store %arg10[%c0_46, %c128], %39 {strides = array<i32>} : memref<64x1664xbf16, #tpu.memory_space<vmem>>, vector<64x128xbf16>,
    %c0_47 = arith.constant 0 : index
    %c0_48 = arith.constant 0 : index
    %c4 = arith.constant 4 : index
    %c0_49 = arith.constant 0 : index
    %41 = vector.load %arg9[%c0_47, %c0_48, %c4, %c0_49] : memref<1x12x16x64xf32, #tpu.memory_space<vmem>>, vector<1x8x8x64xf32>
    %42 = vector.shape_cast %41 : vector<1x8x8x64xf32> to vector<64x64xf32>
    %c0_50 = arith.constant 0 : index
    %c1_51 = arith.constant 1 : index
    %c0_52 = arith.constant 0 : index
    %c0_53 = arith.constant 0 : index
    %43 = vector.load %arg9[%c0_50, %c1_51, %c0_52, %c0_53] : memref<1x12x16x64xf32, #tpu.memory_space<vmem>>, vector<1x8x8x64xf32>
    %44 = vector.shape_cast %43 : vector<1x8x8x64xf32> to vector<64x64xf32>
    %45 = tpu.concatenate %42, %44 in 1 : vector<64x64xf32>, vector<64x64xf32> -> vector<64x128xf32>
    %46 = arith.truncf %45 : vector<64x128xf32> to vector<64x128xbf16>
    %c0_54 = arith.constant 0 : index
    %c256 = arith.constant 256 : index
    %47 = vector.load %arg10[%c0_54, %c256] : memref<64x1664xbf16, #tpu.memory_space<vmem>>, vector<64x128xbf16>
    tpu.vector_store %arg10[%c0_54, %c256], %46 {strides = array<i32>} : memref<64x1664xbf16, #tpu.memory_space<vmem>>, vector<64x128xbf16>,
    %c0_55 = arith.constant 0 : index
    %c1_56 = arith.constant 1 : index
    %c1_57 = arith.constant 1 : index
    %c0_58 = arith.constant 0 : index
    %48 = vector.load %arg9[%c0_55, %c1_56, %c1_57, %c0_58] : memref<1x12x16x64xf32, #tpu.memory_space<vmem>>, vector<1x8x8x64xf32>
    %49 = vector.shape_cast %48 : vector<1x8x8x64xf32> to vector<64x64xf32>
    %c0_59 = arith.constant 0 : index
    %c1_60 = arith.constant 1 : index
    %c2_61 = arith.constant 2 : index
    %c0_62 = arith.constant 0 : index
    %50 = vector.load %arg9[%c0_59, %c1_60, %c2_61, %c0_62] : memref<1x12x16x64xf32, #tpu.memory_space<vmem>>, vector<1x8x8x64xf32>
    %51 = vector.shape_cast %50 : vector<1x8x8x64xf32> to vector<64x64xf32>
    %52 = tpu.concatenate %49, %51 in 1 : vector<64x64xf32>, vector<64x64xf32> -> vector<64x128xf32>
    %53 = arith.truncf %52 : vector<64x128xf32> to vector<64x128xbf16>
    %c0_63 = arith.constant 0 : index
    %c384 = arith.constant 384 : index
    %54 = vector.load %arg10[%c0_63, %c384] : memref<64x1664xbf16, #tpu.memory_space<vmem>>, vector<64x128xbf16>
    tpu.vector_store %arg10[%c0_63, %c384], %53 {strides = array<i32>} : memref<64x1664xbf16, #tpu.memory_space<vmem>>, vector<64x128xbf16>,
    %c0_64 = arith.constant 0 : index
    %c1_65 = arith.constant 1 : index
    %c3_66 = arith.constant 3 : index
    %c0_67 = arith.constant 0 : index
    %55 = vector.load %arg9[%c0_64, %c1_65, %c3_66, %c0_67] : memref<1x12x16x64xf32, #tpu.memory_space<vmem>>, vector<1x8x8x64xf32>
    %56 = vector.shape_cast %55 : vector<1x8x8x64xf32> to vector<64x64xf32>
    %c0_68 = arith.constant 0 : index
    %c1_69 = arith.constant 1 : index
    %c4_70 = arith.constant 4 : index
    %c0_71 = arith.constant 0 : index
    %57 = vector.load %arg9[%c0_68, %c1_69, %c4_70, %c0_71] : memref<1x12x16x64xf32, #tpu.memory_space<vmem>>, vector<1x8x8x64xf32>
    %58 = vector.shape_cast %57 : vector<1x8x8x64xf32> to vector<64x64xf32>
    %59 = tpu.concatenate %56, %58 in 1 : vector<64x64xf32>, vector<64x64xf32> -> vector<64x128xf32>
    %60 = arith.truncf %59 : vector<64x128xf32> to vector<64x128xbf16>
    %c0_72 = arith.constant 0 : index
    %c512 = arith.constant 512 : index
    %61 = vector.load %arg10[%c0_72, %c512] : memref<64x1664xbf16, #tpu.memory_space<vmem>>, vector<64x128xbf16>
    tpu.vector_store %arg10[%c0_72, %c512], %60 {strides = array<i32>} : memref<64x1664xbf16, #tpu.memory_space<vmem>>, vector<64x128xbf16>,
    %c0_73 = arith.constant 0 : index
    %c2_74 = arith.constant 2 : index
    %c0_75 = arith.constant 0 : index
    %c0_76 = arith.constant 0 : index
    %62 = vector.load %arg9[%c0_73, %c2_74, %c0_75, %c0_76] : memref<1x12x16x64xf32, #tpu.memory_space<vmem>>, vector<1x8x8x64xf32>
    %63 = vector.shape_cast %62 : vector<1x8x8x64xf32> to vector<64x64xf32>
    %c0_77 = arith.constant 0 : index
    %c2_78 = arith.constant 2 : index
    %c1_79 = arith.constant 1 : index
    %c0_80 = arith.constant 0 : index
    %64 = vector.load %arg9[%c0_77, %c2_78, %c1_79, %c0_80] : memref<1x12x16x64xf32, #tpu.memory_space<vmem>>, vector<1x8x8x64xf32>
    %65 = vector.shape_cast %64 : vector<1x8x8x64xf32> to vector<64x64xf32>
    %66 = tpu.concatenate %63, %65 in 1 : vector<64x64xf32>, vector<64x64xf32> -> vector<64x128xf32>
    %67 = arith.truncf %66 : vector<64x128xf32> to vector<64x128xbf16>
    %c0_81 = arith.constant 0 : index
    %c640 = arith.constant 640 : index
    %68 = vector.load %arg10[%c0_81, %c640] : memref<64x1664xbf16, #tpu.memory_space<vmem>>, vector<64x128xbf16>
    tpu.vector_store %arg10[%c0_81, %c640], %67 {strides = array<i32>} : memref<64x1664xbf16, #tpu.memory_space<vmem>>, vector<64x128xbf16>,
    %c0_82 = arith.constant 0 : index
    %c2_83 = arith.constant 2 : index
    %c2_84 = arith.constant 2 : index
    %c0_85 = arith.constant 0 : index
    %69 = vector.load %arg9[%c0_82, %c2_83, %c2_84, %c0_85] : memref<1x12x16x64xf32, #tpu.memory_space<vmem>>, vector<1x8x8x64xf32>
    %70 = vector.shape_cast %69 : vector<1x8x8x64xf32> to vector<64x64xf32>
    %c0_86 = arith.constant 0 : index
    %c2_87 = arith.constant 2 : index
    %c3_88 = arith.constant 3 : index
    %c0_89 = arith.constant 0 : index
    %71 = vector.load %arg9[%c0_86, %c2_87, %c3_88, %c0_89] : memref<1x12x16x64xf32, #tpu.memory_space<vmem>>, vector<1x8x8x64xf32>
    %72 = vector.shape_cast %71 : vector<1x8x8x64xf32> to vector<64x64xf32>
    %73 = tpu.concatenate %70, %72 in 1 : vector<64x64xf32>, vector<64x64xf32> -> vector<64x128xf32>
    %74 = arith.truncf %73 : vector<64x128xf32> to vector<64x128xbf16>
    %c0_90 = arith.constant 0 : index
    %c768 = arith.constant 768 : index
    %75 = vector.load %arg10[%c0_90, %c768] : memref<64x1664xbf16, #tpu.memory_space<vmem>>, vector<64x128xbf16>
    tpu.vector_store %arg10[%c0_90, %c768], %74 {strides = array<i32>} : memref<64x1664xbf16, #tpu.memory_space<vmem>>, vector<64x128xbf16>,
    %c0_91 = arith.constant 0 : index
    %c2_92 = arith.constant 2 : index
    %c4_93 = arith.constant 4 : index
    %c0_94 = arith.constant 0 : index
    %76 = vector.load %arg9[%c0_91, %c2_92, %c4_93, %c0_94] : memref<1x12x16x64xf32, #tpu.memory_space<vmem>>, vector<1x8x8x64xf32>
    %77 = vector.shape_cast %76 : vector<1x8x8x64xf32> to vector<64x64xf32>
    %c0_95 = arith.constant 0 : index
    %c3_96 = arith.constant 3 : index
    %c0_97 = arith.constant 0 : index
    %c0_98 = arith.constant 0 : index
    %78 = vector.load %arg9[%c0_95, %c3_96, %c0_97, %c0_98] : memref<1x12x16x64xf32, #tpu.memory_space<vmem>>, vector<1x8x8x64xf32>
    %79 = vector.shape_cast %78 : vector<1x8x8x64xf32> to vector<64x64xf32>
    %80 = tpu.concatenate %77, %79 in 1 : vector<64x64xf32>, vector<64x64xf32> -> vector<64x128xf32>
    %81 = arith.truncf %80 : vector<64x128xf32> to vector<64x128xbf16>
    %c0_99 = arith.constant 0 : index
    %c896 = arith.constant 896 : index
    %82 = vector.load %arg10[%c0_99, %c896] : memref<64x1664xbf16, #tpu.memory_space<vmem>>, vector<64x128xbf16>
    tpu.vector_store %arg10[%c0_99, %c896], %81 {strides = array<i32>} : memref<64x1664xbf16, #tpu.memory_space<vmem>>, vector<64x128xbf16>,
    %c0_100 = arith.constant 0 : index
    %c3_101 = arith.constant 3 : index
    %c1_102 = arith.constant 1 : index
    %c0_103 = arith.constant 0 : index
    %83 = vector.load %arg9[%c0_100, %c3_101, %c1_102, %c0_103] : memref<1x12x16x64xf32, #tpu.memory_space<vmem>>, vector<1x8x8x64xf32>
    %84 = vector.shape_cast %83 : vector<1x8x8x64xf32> to vector<64x64xf32>
    %c0_104 = arith.constant 0 : index
    %c3_105 = arith.constant 3 : index
    %c2_106 = arith.constant 2 : index
    %c0_107 = arith.constant 0 : index
    %85 = vector.load %arg9[%c0_104, %c3_105, %c2_106, %c0_107] : memref<1x12x16x64xf32, #tpu.memory_space<vmem>>, vector<1x8x8x64xf32>
    %86 = vector.shape_cast %85 : vector<1x8x8x64xf32> to vector<64x64xf32>
    %87 = tpu.concatenate %84, %86 in 1 : vector<64x64xf32>, vector<64x64xf32> -> vector<64x128xf32>
    %88 = arith.truncf %87 : vector<64x128xf32> to vector<64x128xbf16>
    %c0_108 = arith.constant 0 : index
    %c1024 = arith.constant 1024 : index
    %89 = vector.load %arg10[%c0_108, %c1024] : memref<64x1664xbf16, #tpu.memory_space<vmem>>, vector<64x128xbf16>
    tpu.vector_store %arg10[%c0_108, %c1024], %88 {strides = array<i32>} : memref<64x1664xbf16, #tpu.memory_space<vmem>>, vector<64x128xbf16>,
    %c0_109 = arith.constant 0 : index
    %c3_110 = arith.constant 3 : index
    %c3_111 = arith.constant 3 : index
    %c0_112 = arith.constant 0 : index
    %90 = vector.load %arg9[%c0_109, %c3_110, %c3_111, %c0_112] : memref<1x12x16x64xf32, #tpu.memory_space<vmem>>, vector<1x8x8x64xf32>
    %91 = vector.shape_cast %90 : vector<1x8x8x64xf32> to vector<64x64xf32>
    %c0_113 = arith.constant 0 : index
    %c3_114 = arith.constant 3 : index
    %c4_115 = arith.constant 4 : index
    %c0_116 = arith.constant 0 : index
    %92 = vector.load %arg9[%c0_113, %c3_114, %c4_115, %c0_116] : memref<1x12x16x64xf32, #tpu.memory_space<vmem>>, vector<1x8x8x64xf32>
    %93 = vector.shape_cast %92 : vector<1x8x8x64xf32> to vector<64x64xf32>
    %94 = tpu.concatenate %91, %93 in 1 : vector<64x64xf32>, vector<64x64xf32> -> vector<64x128xf32>
    %95 = arith.truncf %94 : vector<64x128xf32> to vector<64x128xbf16>
    %c0_117 = arith.constant 0 : index
    %c1152 = arith.constant 1152 : index
    %96 = vector.load %arg10[%c0_117, %c1152] : memref<64x1664xbf16, #tpu.memory_space<vmem>>, vector<64x128xbf16>
    tpu.vector_store %arg10[%c0_117, %c1152], %95 {strides = array<i32>} : memref<64x1664xbf16, #tpu.memory_space<vmem>>, vector<64x128xbf16>,
    %c0_118 = arith.constant 0 : index
    %c4_119 = arith.constant 4 : index
    %c0_120 = arith.constant 0 : index
    %c0_121 = arith.constant 0 : index
    %97 = vector.load %arg9[%c0_118, %c4_119, %c0_120, %c0_121] : memref<1x12x16x64xf32, #tpu.memory_space<vmem>>, vector<1x8x8x64xf32>
    %98 = vector.shape_cast %97 : vector<1x8x8x64xf32> to vector<64x64xf32>
    %c0_122 = arith.constant 0 : index
    %c4_123 = arith.constant 4 : index
    %c1_124 = arith.constant 1 : index
    %c0_125 = arith.constant 0 : index
    %99 = vector.load %arg9[%c0_122, %c4_123, %c1_124, %c0_125] : memref<1x12x16x64xf32, #tpu.memory_space<vmem>>, vector<1x8x8x64xf32>
    %100 = vector.shape_cast %99 : vector<1x8x8x64xf32> to vector<64x64xf32>
    %101 = tpu.concatenate %98, %100 in 1 : vector<64x64xf32>, vector<64x64xf32> -> vector<64x128xf32>
    %102 = arith.truncf %101 : vector<64x128xf32> to vector<64x128xbf16>
    %c0_126 = arith.constant 0 : index
    %c1280 = arith.constant 1280 : index
    %103 = vector.load %arg10[%c0_126, %c1280] : memref<64x1664xbf16, #tpu.memory_space<vmem>>, vector<64x128xbf16>
    tpu.vector_store %arg10[%c0_126, %c1280], %102 {strides = array<i32>} : memref<64x1664xbf16, #tpu.memory_space<vmem>>, vector<64x128xbf16>,
    %c0_127 = arith.constant 0 : index
    %c4_128 = arith.constant 4 : index
    %c2_129 = arith.constant 2 : index
    %c0_130 = arith.constant 0 : index
    %104 = vector.load %arg9[%c0_127, %c4_128, %c2_129, %c0_130] : memref<1x12x16x64xf32, #tpu.memory_space<vmem>>, vector<1x8x8x64xf32>
    %105 = vector.shape_cast %104 : vector<1x8x8x64xf32> to vector<64x64xf32>
    %c0_131 = arith.constant 0 : index
    %c4_132 = arith.constant 4 : index
    %c3_133 = arith.constant 3 : index
    %c0_134 = arith.constant 0 : index
    %106 = vector.load %arg9[%c0_131, %c4_132, %c3_133, %c0_134] : memref<1x12x16x64xf32, #tpu.memory_space<vmem>>, vector<1x8x8x64xf32>
    %107 = vector.shape_cast %106 : vector<1x8x8x64xf32> to vector<64x64xf32>
    %108 = tpu.concatenate %105, %107 in 1 : vector<64x64xf32>, vector<64x64xf32> -> vector<64x128xf32>
    %109 = arith.truncf %108 : vector<64x128xf32> to vector<64x128xbf16>
    %c0_135 = arith.constant 0 : index
    %c1408 = arith.constant 1408 : index
    %110 = vector.load %arg10[%c0_135, %c1408] : memref<64x1664xbf16, #tpu.memory_space<vmem>>, vector<64x128xbf16>
    tpu.vector_store %arg10[%c0_135, %c1408], %109 {strides = array<i32>} : memref<64x1664xbf16, #tpu.memory_space<vmem>>, vector<64x128xbf16>,
    %c0_136 = arith.constant 0 : index
    %c4_137 = arith.constant 4 : index
    %c4_138 = arith.constant 4 : index
    %c0_139 = arith.constant 0 : index
    %111 = vector.load %arg9[%c0_136, %c4_137, %c4_138, %c0_139] : memref<1x12x16x64xf32, #tpu.memory_space<vmem>>, vector<1x8x8x64xf32>
    %112 = vector.shape_cast %111 : vector<1x8x8x64xf32> to vector<64x64xf32>
    %cst_140 = arith.constant 0.000000e+00 : f32
    %113 = vector.broadcast %cst_140 : f32 to vector<64x64xf32>
    %114 = tpu.concatenate %112, %113 in 1 : vector<64x64xf32>, vector<64x64xf32> -> vector<64x128xf32>
    %115 = arith.truncf %114 : vector<64x128xf32> to vector<64x128xbf16>
    %c0_141 = arith.constant 0 : index
    %c1536 = arith.constant 1536 : index
    %116 = vector.load %arg10[%c0_141, %c1536] : memref<64x1664xbf16, #tpu.memory_space<vmem>>, vector<64x128xbf16>
    tpu.vector_store %arg10[%c0_141, %c1536], %115 {strides = array<i32>} : memref<64x1664xbf16, #tpu.memory_space<vmem>>, vector<64x128xbf16>,
    %c0_142 = arith.constant 0 : index
    %c0_143 = arith.constant 0 : index
    %117 = vector.load %arg10[%c0_142, %c0_143] : memref<64x1664xbf16, #tpu.memory_space<vmem>>, vector<64x1664xbf16>
    %c0_144 = arith.constant 0 : index
    %c0_145 = arith.constant 0 : index
    %118 = vector.load %arg4[%c0_144, %c0_145] : memref<1664x64xbf16, #tpu.memory_space<vmem>>, vector<1664x64xbf16>
    %cst_146 = arith.constant dense<0.000000e+00> : vector<64x64xf32>
    %119 = tpu.matmul %117, %118, %cst_146 {dimension_numbers = #tpu.dot_dimension_numbers<[1], [0], [0], [1], [0, 0, 1, 1], [], []>} : vector<64x1664xbf16>, vector<1664x64xbf16>, vector<64x64xf32> -> vector<64x64xf32>
    %c0_147 = arith.constant 0 : index
    %c0_148 = arith.constant 0 : index
    %120 = vector.load %arg5[%c0_147, %c0_148] : memref<1x64xf32, #tpu.memory_space<vmem>>, vector<1x64xf32>
    %121 = vector.broadcast %120 : vector<1x64xf32> to vector<64x64xf32>
    %122 = arith.addf %119, %121 : vector<64x64xf32>
    %cst_149 = arith.constant 0.000000e+00 : f32
    %123 = vector.broadcast %cst_149 : f32 to vector<64x64xf32>
    %124 = arith.maximumf %122, %123 : vector<64x64xf32>
    %125 = vector.shape_cast %124 : vector<64x64xf32> to vector<1x8x8x64xf32>
    %c0_150 = arith.constant 0 : index
    %c2_151 = arith.constant 2 : index
    %c2_152 = arith.constant 2 : index
    %c0_153 = arith.constant 0 : index
    %126 = vector.load %arg9[%c0_150, %c2_151, %c2_152, %c0_153] : memref<1x12x16x64xf32, #tpu.memory_space<vmem>>, vector<1x8x8x64xf32>
    tpu.vector_store %arg9[%c0_150, %c2_151, %c2_152, %c0_153], %125 {strides = array<i32>} : memref<1x12x16x64xf32, #tpu.memory_space<vmem>>, vector<1x8x8x64xf32>,
    %cst_154 = arith.constant 0.000000e+00 : f32
    %127 = vector.broadcast %cst_154 : f32 to vector<1x8x8xf32>
    %c0_155 = arith.constant 0 : index
    %c0_156 = arith.constant 0 : index
    %128 = vector.load %arg6[%c0_155, %c0_156] : memref<25x64xf32, #tpu.memory_space<vmem>>, vector<1x64xf32>
    %129 = vector.shape_cast %128 : vector<1x64xf32> to vector<64xf32>
    %c0_157 = arith.constant 0 : index
    %c0_158 = arith.constant 0 : index
    %c0_159 = arith.constant 0 : index
    %c0_160 = arith.constant 0 : index
    %130 = vector.load %arg9[%c0_157, %c0_158, %c0_159, %c0_160] : memref<1x12x16x64xf32, #tpu.memory_space<vmem>>, vector<1x8x8x64xf32>
    %131 = vector.shape_cast %129 : vector<64xf32> to vector<1x1x1x64xf32>
    %132 = vector.broadcast %131 : vector<1x1x1x64xf32> to vector<1x8x8x64xf32>
    %133 = arith.mulf %130, %132 : vector<1x8x8x64xf32>
    %cst_161 = arith.constant dense<0.000000e+00> : vector<1x8x8xf32>
    %134 = vector.multi_reduction <add>, %133, %cst_161 [3] : vector<1x8x8x64xf32> to vector<1x8x8xf32>
    %135 = arith.addf %127, %134 : vector<1x8x8xf32>
    %c1_162 = arith.constant 1 : index
    %c0_163 = arith.constant 0 : index
    %136 = vector.load %arg6[%c1_162, %c0_163] : memref<25x64xf32, #tpu.memory_space<vmem>>, vector<1x64xf32>
    %137 = vector.shape_cast %136 : vector<1x64xf32> to vector<64xf32>
    %c0_164 = arith.constant 0 : index
    %c0_165 = arith.constant 0 : index
    %c1_166 = arith.constant 1 : index
    %c0_167 = arith.constant 0 : index
    %138 = vector.load %arg9[%c0_164, %c0_165, %c1_166, %c0_167] : memref<1x12x16x64xf32, #tpu.memory_space<vmem>>, vector<1x8x8x64xf32>
    %139 = vector.shape_cast %137 : vector<64xf32> to vector<1x1x1x64xf32>
    %140 = vector.broadcast %139 : vector<1x1x1x64xf32> to vector<1x8x8x64xf32>
    %141 = arith.mulf %138, %140 : vector<1x8x8x64xf32>
    %cst_168 = arith.constant dense<0.000000e+00> : vector<1x8x8xf32>
    %142 = vector.multi_reduction <add>, %141, %cst_168 [3] : vector<1x8x8x64xf32> to vector<1x8x8xf32>
    %143 = arith.addf %135, %142 : vector<1x8x8xf32>
    %c2_169 = arith.constant 2 : index
    %c0_170 = arith.constant 0 : index
    %144 = vector.load %arg6[%c2_169, %c0_170] : memref<25x64xf32, #tpu.memory_space<vmem>>, vector<1x64xf32>
    %145 = vector.shape_cast %144 : vector<1x64xf32> to vector<64xf32>
    %c0_171 = arith.constant 0 : index
    %c0_172 = arith.constant 0 : index
    %c2_173 = arith.constant 2 : index
    %c0_174 = arith.constant 0 : index
    %146 = vector.load %arg9[%c0_171, %c0_172, %c2_173, %c0_174] : memref<1x12x16x64xf32, #tpu.memory_space<vmem>>, vector<1x8x8x64xf32>
    %147 = vector.shape_cast %145 : vector<64xf32> to vector<1x1x1x64xf32>
    %148 = vector.broadcast %147 : vector<1x1x1x64xf32> to vector<1x8x8x64xf32>
    %149 = arith.mulf %146, %148 : vector<1x8x8x64xf32>
    %cst_175 = arith.constant dense<0.000000e+00> : vector<1x8x8xf32>
    %150 = vector.multi_reduction <add>, %149, %cst_175 [3] : vector<1x8x8x64xf32> to vector<1x8x8xf32>
    %151 = arith.addf %143, %150 : vector<1x8x8xf32>
    %c3_176 = arith.constant 3 : index
    %c0_177 = arith.constant 0 : index
    %152 = vector.load %arg6[%c3_176, %c0_177] : memref<25x64xf32, #tpu.memory_space<vmem>>, vector<1x64xf32>
    %153 = vector.shape_cast %152 : vector<1x64xf32> to vector<64xf32>
    %c0_178 = arith.constant 0 : index
    %c0_179 = arith.constant 0 : index
    %c3_180 = arith.constant 3 : index
    %c0_181 = arith.constant 0 : index
    %154 = vector.load %arg9[%c0_178, %c0_179, %c3_180, %c0_181] : memref<1x12x16x64xf32, #tpu.memory_space<vmem>>, vector<1x8x8x64xf32>
    %155 = vector.shape_cast %153 : vector<64xf32> to vector<1x1x1x64xf32>
    %156 = vector.broadcast %155 : vector<1x1x1x64xf32> to vector<1x8x8x64xf32>
    %157 = arith.mulf %154, %156 : vector<1x8x8x64xf32>
    %cst_182 = arith.constant dense<0.000000e+00> : vector<1x8x8xf32>
    %158 = vector.multi_reduction <add>, %157, %cst_182 [3] : vector<1x8x8x64xf32> to vector<1x8x8xf32>
    %159 = arith.addf %151, %158 : vector<1x8x8xf32>
    %c4_183 = arith.constant 4 : index
    %c0_184 = arith.constant 0 : index
    %160 = vector.load %arg6[%c4_183, %c0_184] : memref<25x64xf32, #tpu.memory_space<vmem>>, vector<1x64xf32>
    %161 = vector.shape_cast %160 : vector<1x64xf32> to vector<64xf32>
    %c0_185 = arith.constant 0 : index
    %c0_186 = arith.constant 0 : index
    %c4_187 = arith.constant 4 : index
    %c0_188 = arith.constant 0 : index
    %162 = vector.load %arg9[%c0_185, %c0_186, %c4_187, %c0_188] : memref<1x12x16x64xf32, #tpu.memory_space<vmem>>, vector<1x8x8x64xf32>
    %163 = vector.shape_cast %161 : vector<64xf32> to vector<1x1x1x64xf32>
    %164 = vector.broadcast %163 : vector<1x1x1x64xf32> to vector<1x8x8x64xf32>
    %165 = arith.mulf %162, %164 : vector<1x8x8x64xf32>
    %cst_189 = arith.constant dense<0.000000e+00> : vector<1x8x8xf32>
    %166 = vector.multi_reduction <add>, %165, %cst_189 [3] : vector<1x8x8x64xf32> to vector<1x8x8xf32>
    %167 = arith.addf %159, %166 : vector<1x8x8xf32>
    %c5 = arith.constant 5 : index
    %c0_190 = arith.constant 0 : index
    %168 = vector.load %arg6[%c5, %c0_190] : memref<25x64xf32, #tpu.memory_space<vmem>>, vector<1x64xf32>
    %169 = vector.shape_cast %168 : vector<1x64xf32> to vector<64xf32>
    %c0_191 = arith.constant 0 : index
    %c1_192 = arith.constant 1 : index
    %c0_193 = arith.constant 0 : index
    %c0_194 = arith.constant 0 : index
    %170 = vector.load %arg9[%c0_191, %c1_192, %c0_193, %c0_194] : memref<1x12x16x64xf32, #tpu.memory_space<vmem>>, vector<1x8x8x64xf32>
    %171 = vector.shape_cast %169 : vector<64xf32> to vector<1x1x1x64xf32>
    %172 = vector.broadcast %171 : vector<1x1x1x64xf32> to vector<1x8x8x64xf32>
    %173 = arith.mulf %170, %172 : vector<1x8x8x64xf32>
    %cst_195 = arith.constant dense<0.000000e+00> : vector<1x8x8xf32>
    %174 = vector.multi_reduction <add>, %173, %cst_195 [3] : vector<1x8x8x64xf32> to vector<1x8x8xf32>
    %175 = arith.addf %167, %174 : vector<1x8x8xf32>
    %c6 = arith.constant 6 : index
    %c0_196 = arith.constant 0 : index
    %176 = vector.load %arg6[%c6, %c0_196] : memref<25x64xf32, #tpu.memory_space<vmem>>, vector<1x64xf32>
    %177 = vector.shape_cast %176 : vector<1x64xf32> to vector<64xf32>
    %c0_197 = arith.constant 0 : index
    %c1_198 = arith.constant 1 : index
    %c1_199 = arith.constant 1 : index
    %c0_200 = arith.constant 0 : index
    %178 = vector.load %arg9[%c0_197, %c1_198, %c1_199, %c0_200] : memref<1x12x16x64xf32, #tpu.memory_space<vmem>>, vector<1x8x8x64xf32>
    %179 = vector.shape_cast %177 : vector<64xf32> to vector<1x1x1x64xf32>
    %180 = vector.broadcast %179 : vector<1x1x1x64xf32> to vector<1x8x8x64xf32>
    %181 = arith.mulf %178, %180 : vector<1x8x8x64xf32>
    %cst_201 = arith.constant dense<0.000000e+00> : vector<1x8x8xf32>
    %182 = vector.multi_reduction <add>, %181, %cst_201 [3] : vector<1x8x8x64xf32> to vector<1x8x8xf32>
    %183 = arith.addf %175, %182 : vector<1x8x8xf32>
    %c7 = arith.constant 7 : index
    %c0_202 = arith.constant 0 : index
    %184 = vector.load %arg6[%c7, %c0_202] : memref<25x64xf32, #tpu.memory_space<vmem>>, vector<1x64xf32>
    %185 = vector.shape_cast %184 : vector<1x64xf32> to vector<64xf32>
    %c0_203 = arith.constant 0 : index
    %c1_204 = arith.constant 1 : index
    %c2_205 = arith.constant 2 : index
    %c0_206 = arith.constant 0 : index
    %186 = vector.load %arg9[%c0_203, %c1_204, %c2_205, %c0_206] : memref<1x12x16x64xf32, #tpu.memory_space<vmem>>, vector<1x8x8x64xf32>
    %187 = vector.shape_cast %185 : vector<64xf32> to vector<1x1x1x64xf32>
    %188 = vector.broadcast %187 : vector<1x1x1x64xf32> to vector<1x8x8x64xf32>
    %189 = arith.mulf %186, %188 : vector<1x8x8x64xf32>
    %cst_207 = arith.constant dense<0.000000e+00> : vector<1x8x8xf32>
    %190 = vector.multi_reduction <add>, %189, %cst_207 [3] : vector<1x8x8x64xf32> to vector<1x8x8xf32>
    %191 = arith.addf %183, %190 : vector<1x8x8xf32>
    %c8 = arith.constant 8 : index
    %c0_208 = arith.constant 0 : index
    %192 = vector.load %arg6[%c8, %c0_208] : memref<25x64xf32, #tpu.memory_space<vmem>>, vector<1x64xf32>
    %193 = vector.shape_cast %192 : vector<1x64xf32> to vector<64xf32>
    %c0_209 = arith.constant 0 : index
    %c1_210 = arith.constant 1 : index
    %c3_211 = arith.constant 3 : index
    %c0_212 = arith.constant 0 : index
    %194 = vector.load %arg9[%c0_209, %c1_210, %c3_211, %c0_212] : memref<1x12x16x64xf32, #tpu.memory_space<vmem>>, vector<1x8x8x64xf32>
    %195 = vector.shape_cast %193 : vector<64xf32> to vector<1x1x1x64xf32>
    %196 = vector.broadcast %195 : vector<1x1x1x64xf32> to vector<1x8x8x64xf32>
    %197 = arith.mulf %194, %196 : vector<1x8x8x64xf32>
    %cst_213 = arith.constant dense<0.000000e+00> : vector<1x8x8xf32>
    %198 = vector.multi_reduction <add>, %197, %cst_213 [3] : vector<1x8x8x64xf32> to vector<1x8x8xf32>
    %199 = arith.addf %191, %198 : vector<1x8x8xf32>
    %c9 = arith.constant 9 : index
    %c0_214 = arith.constant 0 : index
    %200 = vector.load %arg6[%c9, %c0_214] : memref<25x64xf32, #tpu.memory_space<vmem>>, vector<1x64xf32>
    %201 = vector.shape_cast %200 : vector<1x64xf32> to vector<64xf32>
    %c0_215 = arith.constant 0 : index
    %c1_216 = arith.constant 1 : index
    %c4_217 = arith.constant 4 : index
    %c0_218 = arith.constant 0 : index
    %202 = vector.load %arg9[%c0_215, %c1_216, %c4_217, %c0_218] : memref<1x12x16x64xf32, #tpu.memory_space<vmem>>, vector<1x8x8x64xf32>
    %203 = vector.shape_cast %201 : vector<64xf32> to vector<1x1x1x64xf32>
    %204 = vector.broadcast %203 : vector<1x1x1x64xf32> to vector<1x8x8x64xf32>
    %205 = arith.mulf %202, %204 : vector<1x8x8x64xf32>
    %cst_219 = arith.constant dense<0.000000e+00> : vector<1x8x8xf32>
    %206 = vector.multi_reduction <add>, %205, %cst_219 [3] : vector<1x8x8x64xf32> to vector<1x8x8xf32>
    %207 = arith.addf %199, %206 : vector<1x8x8xf32>
    %c10_220 = arith.constant 10 : index
    %c0_221 = arith.constant 0 : index
    %208 = vector.load %arg6[%c10_220, %c0_221] : memref<25x64xf32, #tpu.memory_space<vmem>>, vector<1x64xf32>
    %209 = vector.shape_cast %208 : vector<1x64xf32> to vector<64xf32>
    %c0_222 = arith.constant 0 : index
    %c2_223 = arith.constant 2 : index
    %c0_224 = arith.constant 0 : index
    %c0_225 = arith.constant 0 : index
    %210 = vector.load %arg9[%c0_222, %c2_223, %c0_224, %c0_225] : memref<1x12x16x64xf32, #tpu.memory_space<vmem>>, vector<1x8x8x64xf32>
    %211 = vector.shape_cast %209 : vector<64xf32> to vector<1x1x1x64xf32>
    %212 = vector.broadcast %211 : vector<1x1x1x64xf32> to vector<1x8x8x64xf32>
    %213 = arith.mulf %210, %212 : vector<1x8x8x64xf32>
    %cst_226 = arith.constant dense<0.000000e+00> : vector<1x8x8xf32>
    %214 = vector.multi_reduction <add>, %213, %cst_226 [3] : vector<1x8x8x64xf32> to vector<1x8x8xf32>
    %215 = arith.addf %207, %214 : vector<1x8x8xf32>
    %c11 = arith.constant 11 : index
    %c0_227 = arith.constant 0 : index
    %216 = vector.load %arg6[%c11, %c0_227] : memref<25x64xf32, #tpu.memory_space<vmem>>, vector<1x64xf32>
    %217 = vector.shape_cast %216 : vector<1x64xf32> to vector<64xf32>
    %c0_228 = arith.constant 0 : index
    %c2_229 = arith.constant 2 : index
    %c1_230 = arith.constant 1 : index
    %c0_231 = arith.constant 0 : index
    %218 = vector.load %arg9[%c0_228, %c2_229, %c1_230, %c0_231] : memref<1x12x16x64xf32, #tpu.memory_space<vmem>>, vector<1x8x8x64xf32>
    %219 = vector.shape_cast %217 : vector<64xf32> to vector<1x1x1x64xf32>
    %220 = vector.broadcast %219 : vector<1x1x1x64xf32> to vector<1x8x8x64xf32>
    %221 = arith.mulf %218, %220 : vector<1x8x8x64xf32>
    %cst_232 = arith.constant dense<0.000000e+00> : vector<1x8x8xf32>
    %222 = vector.multi_reduction <add>, %221, %cst_232 [3] : vector<1x8x8x64xf32> to vector<1x8x8xf32>
    %223 = arith.addf %215, %222 : vector<1x8x8xf32>
    %c12 = arith.constant 12 : index
    %c0_233 = arith.constant 0 : index
    %224 = vector.load %arg6[%c12, %c0_233] : memref<25x64xf32, #tpu.memory_space<vmem>>, vector<1x64xf32>
    %225 = vector.shape_cast %224 : vector<1x64xf32> to vector<64xf32>
    %c0_234 = arith.constant 0 : index
    %c2_235 = arith.constant 2 : index
    %c2_236 = arith.constant 2 : index
    %c0_237 = arith.constant 0 : index
    %226 = vector.load %arg9[%c0_234, %c2_235, %c2_236, %c0_237] : memref<1x12x16x64xf32, #tpu.memory_space<vmem>>, vector<1x8x8x64xf32>
    %227 = vector.shape_cast %225 : vector<64xf32> to vector<1x1x1x64xf32>
    %228 = vector.broadcast %227 : vector<1x1x1x64xf32> to vector<1x8x8x64xf32>
    %229 = arith.mulf %226, %228 : vector<1x8x8x64xf32>
    %cst_238 = arith.constant dense<0.000000e+00> : vector<1x8x8xf32>
    %230 = vector.multi_reduction <add>, %229, %cst_238 [3] : vector<1x8x8x64xf32> to vector<1x8x8xf32>
    %231 = arith.addf %223, %230 : vector<1x8x8xf32>
    %c13 = arith.constant 13 : index
    %c0_239 = arith.constant 0 : index
    %232 = vector.load %arg6[%c13, %c0_239] : memref<25x64xf32, #tpu.memory_space<vmem>>, vector<1x64xf32>
    %233 = vector.shape_cast %232 : vector<1x64xf32> to vector<64xf32>
    %c0_240 = arith.constant 0 : index
    %c2_241 = arith.constant 2 : index
    %c3_242 = arith.constant 3 : index
    %c0_243 = arith.constant 0 : index
    %234 = vector.load %arg9[%c0_240, %c2_241, %c3_242, %c0_243] : memref<1x12x16x64xf32, #tpu.memory_space<vmem>>, vector<1x8x8x64xf32>
    %235 = vector.shape_cast %233 : vector<64xf32> to vector<1x1x1x64xf32>
    %236 = vector.broadcast %235 : vector<1x1x1x64xf32> to vector<1x8x8x64xf32>
    %237 = arith.mulf %234, %236 : vector<1x8x8x64xf32>
    %cst_244 = arith.constant dense<0.000000e+00> : vector<1x8x8xf32>
    %238 = vector.multi_reduction <add>, %237, %cst_244 [3] : vector<1x8x8x64xf32> to vector<1x8x8xf32>
    %239 = arith.addf %231, %238 : vector<1x8x8xf32>
    %c14 = arith.constant 14 : index
    %c0_245 = arith.constant 0 : index
    %240 = vector.load %arg6[%c14, %c0_245] : memref<25x64xf32, #tpu.memory_space<vmem>>, vector<1x64xf32>
    %241 = vector.shape_cast %240 : vector<1x64xf32> to vector<64xf32>
    %c0_246 = arith.constant 0 : index
    %c2_247 = arith.constant 2 : index
    %c4_248 = arith.constant 4 : index
    %c0_249 = arith.constant 0 : index
    %242 = vector.load %arg9[%c0_246, %c2_247, %c4_248, %c0_249] : memref<1x12x16x64xf32, #tpu.memory_space<vmem>>, vector<1x8x8x64xf32>
    %243 = vector.shape_cast %241 : vector<64xf32> to vector<1x1x1x64xf32>
    %244 = vector.broadcast %243 : vector<1x1x1x64xf32> to vector<1x8x8x64xf32>
    %245 = arith.mulf %242, %244 : vector<1x8x8x64xf32>
    %cst_250 = arith.constant dense<0.000000e+00> : vector<1x8x8xf32>
    %246 = vector.multi_reduction <add>, %245, %cst_250 [3] : vector<1x8x8x64xf32> to vector<1x8x8xf32>
    %247 = arith.addf %239, %246 : vector<1x8x8xf32>
    %c15 = arith.constant 15 : index
    %c0_251 = arith.constant 0 : index
    %248 = vector.load %arg6[%c15, %c0_251] : memref<25x64xf32, #tpu.memory_space<vmem>>, vector<1x64xf32>
    %249 = vector.shape_cast %248 : vector<1x64xf32> to vector<64xf32>
    %c0_252 = arith.constant 0 : index
    %c3_253 = arith.constant 3 : index
    %c0_254 = arith.constant 0 : index
    %c0_255 = arith.constant 0 : index
    %250 = vector.load %arg9[%c0_252, %c3_253, %c0_254, %c0_255] : memref<1x12x16x64xf32, #tpu.memory_space<vmem>>, vector<1x8x8x64xf32>
    %251 = vector.shape_cast %249 : vector<64xf32> to vector<1x1x1x64xf32>
    %252 = vector.broadcast %251 : vector<1x1x1x64xf32> to vector<1x8x8x64xf32>
    %253 = arith.mulf %250, %252 : vector<1x8x8x64xf32>
    %cst_256 = arith.constant dense<0.000000e+00> : vector<1x8x8xf32>
    %254 = vector.multi_reduction <add>, %253, %cst_256 [3] : vector<1x8x8x64xf32> to vector<1x8x8xf32>
    %255 = arith.addf %247, %254 : vector<1x8x8xf32>
    %c16 = arith.constant 16 : index
    %c0_257 = arith.constant 0 : index
    %256 = vector.load %arg6[%c16, %c0_257] : memref<25x64xf32, #tpu.memory_space<vmem>>, vector<1x64xf32>
    %257 = vector.shape_cast %256 : vector<1x64xf32> to vector<64xf32>
    %c0_258 = arith.constant 0 : index
    %c3_259 = arith.constant 3 : index
    %c1_260 = arith.constant 1 : index
    %c0_261 = arith.constant 0 : index
    %258 = vector.load %arg9[%c0_258, %c3_259, %c1_260, %c0_261] : memref<1x12x16x64xf32, #tpu.memory_space<vmem>>, vector<1x8x8x64xf32>
    %259 = vector.shape_cast %257 : vector<64xf32> to vector<1x1x1x64xf32>
    %260 = vector.broadcast %259 : vector<1x1x1x64xf32> to vector<1x8x8x64xf32>
    %261 = arith.mulf %258, %260 : vector<1x8x8x64xf32>
    %cst_262 = arith.constant dense<0.000000e+00> : vector<1x8x8xf32>
    %262 = vector.multi_reduction <add>, %261, %cst_262 [3] : vector<1x8x8x64xf32> to vector<1x8x8xf32>
    %263 = arith.addf %255, %262 : vector<1x8x8xf32>
    %c17 = arith.constant 17 : index
    %c0_263 = arith.constant 0 : index
    %264 = vector.load %arg6[%c17, %c0_263] : memref<25x64xf32, #tpu.memory_space<vmem>>, vector<1x64xf32>
    %265 = vector.shape_cast %264 : vector<1x64xf32> to vector<64xf32>
    %c0_264 = arith.constant 0 : index
    %c3_265 = arith.constant 3 : index
    %c2_266 = arith.constant 2 : index
    %c0_267 = arith.constant 0 : index
    %266 = vector.load %arg9[%c0_264, %c3_265, %c2_266, %c0_267] : memref<1x12x16x64xf32, #tpu.memory_space<vmem>>, vector<1x8x8x64xf32>
    %267 = vector.shape_cast %265 : vector<64xf32> to vector<1x1x1x64xf32>
    %268 = vector.broadcast %267 : vector<1x1x1x64xf32> to vector<1x8x8x64xf32>
    %269 = arith.mulf %266, %268 : vector<1x8x8x64xf32>
    %cst_268 = arith.constant dense<0.000000e+00> : vector<1x8x8xf32>
    %270 = vector.multi_reduction <add>, %269, %cst_268 [3] : vector<1x8x8x64xf32> to vector<1x8x8xf32>
    %271 = arith.addf %263, %270 : vector<1x8x8xf32>
    %c18 = arith.constant 18 : index
    %c0_269 = arith.constant 0 : index
    %272 = vector.load %arg6[%c18, %c0_269] : memref<25x64xf32, #tpu.memory_space<vmem>>, vector<1x64xf32>
    %273 = vector.shape_cast %272 : vector<1x64xf32> to vector<64xf32>
    %c0_270 = arith.constant 0 : index
    %c3_271 = arith.constant 3 : index
    %c3_272 = arith.constant 3 : index
    %c0_273 = arith.constant 0 : index
    %274 = vector.load %arg9[%c0_270, %c3_271, %c3_272, %c0_273] : memref<1x12x16x64xf32, #tpu.memory_space<vmem>>, vector<1x8x8x64xf32>
    %275 = vector.shape_cast %273 : vector<64xf32> to vector<1x1x1x64xf32>
    %276 = vector.broadcast %275 : vector<1x1x1x64xf32> to vector<1x8x8x64xf32>
    %277 = arith.mulf %274, %276 : vector<1x8x8x64xf32>
    %cst_274 = arith.constant dense<0.000000e+00> : vector<1x8x8xf32>
    %278 = vector.multi_reduction <add>, %277, %cst_274 [3] : vector<1x8x8x64xf32> to vector<1x8x8xf32>
    %279 = arith.addf %271, %278 : vector<1x8x8xf32>
    %c19 = arith.constant 19 : index
    %c0_275 = arith.constant 0 : index
    %280 = vector.load %arg6[%c19, %c0_275] : memref<25x64xf32, #tpu.memory_space<vmem>>, vector<1x64xf32>
    %281 = vector.shape_cast %280 : vector<1x64xf32> to vector<64xf32>
    %c0_276 = arith.constant 0 : index
    %c3_277 = arith.constant 3 : index
    %c4_278 = arith.constant 4 : index
    %c0_279 = arith.constant 0 : index
    %282 = vector.load %arg9[%c0_276, %c3_277, %c4_278, %c0_279] : memref<1x12x16x64xf32, #tpu.memory_space<vmem>>, vector<1x8x8x64xf32>
    %283 = vector.shape_cast %281 : vector<64xf32> to vector<1x1x1x64xf32>
    %284 = vector.broadcast %283 : vector<1x1x1x64xf32> to vector<1x8x8x64xf32>
    %285 = arith.mulf %282, %284 : vector<1x8x8x64xf32>
    %cst_280 = arith.constant dense<0.000000e+00> : vector<1x8x8xf32>
    %286 = vector.multi_reduction <add>, %285, %cst_280 [3] : vector<1x8x8x64xf32> to vector<1x8x8xf32>
    %287 = arith.addf %279, %286 : vector<1x8x8xf32>
    %c20 = arith.constant 20 : index
    %c0_281 = arith.constant 0 : index
    %288 = vector.load %arg6[%c20, %c0_281] : memref<25x64xf32, #tpu.memory_space<vmem>>, vector<1x64xf32>
    %289 = vector.shape_cast %288 : vector<1x64xf32> to vector<64xf32>
    %c0_282 = arith.constant 0 : index
    %c4_283 = arith.constant 4 : index
    %c0_284 = arith.constant 0 : index
    %c0_285 = arith.constant 0 : index
    %290 = vector.load %arg9[%c0_282, %c4_283, %c0_284, %c0_285] : memref<1x12x16x64xf32, #tpu.memory_space<vmem>>, vector<1x8x8x64xf32>
    %291 = vector.shape_cast %289 : vector<64xf32> to vector<1x1x1x64xf32>
    %292 = vector.broadcast %291 : vector<1x1x1x64xf32> to vector<1x8x8x64xf32>
    %293 = arith.mulf %290, %292 : vector<1x8x8x64xf32>
    %cst_286 = arith.constant dense<0.000000e+00> : vector<1x8x8xf32>
    %294 = vector.multi_reduction <add>, %293, %cst_286 [3] : vector<1x8x8x64xf32> to vector<1x8x8xf32>
    %295 = arith.addf %287, %294 : vector<1x8x8xf32>
    %c21 = arith.constant 21 : index
    %c0_287 = arith.constant 0 : index
    %296 = vector.load %arg6[%c21, %c0_287] : memref<25x64xf32, #tpu.memory_space<vmem>>, vector<1x64xf32>
    %297 = vector.shape_cast %296 : vector<1x64xf32> to vector<64xf32>
    %c0_288 = arith.constant 0 : index
    %c4_289 = arith.constant 4 : index
    %c1_290 = arith.constant 1 : index
    %c0_291 = arith.constant 0 : index
    %298 = vector.load %arg9[%c0_288, %c4_289, %c1_290, %c0_291] : memref<1x12x16x64xf32, #tpu.memory_space<vmem>>, vector<1x8x8x64xf32>
    %299 = vector.shape_cast %297 : vector<64xf32> to vector<1x1x1x64xf32>
    %300 = vector.broadcast %299 : vector<1x1x1x64xf32> to vector<1x8x8x64xf32>
    %301 = arith.mulf %298, %300 : vector<1x8x8x64xf32>
    %cst_292 = arith.constant dense<0.000000e+00> : vector<1x8x8xf32>
    %302 = vector.multi_reduction <add>, %301, %cst_292 [3] : vector<1x8x8x64xf32> to vector<1x8x8xf32>
    %303 = arith.addf %295, %302 : vector<1x8x8xf32>
    %c22 = arith.constant 22 : index
    %c0_293 = arith.constant 0 : index
    %304 = vector.load %arg6[%c22, %c0_293] : memref<25x64xf32, #tpu.memory_space<vmem>>, vector<1x64xf32>
    %305 = vector.shape_cast %304 : vector<1x64xf32> to vector<64xf32>
    %c0_294 = arith.constant 0 : index
    %c4_295 = arith.constant 4 : index
    %c2_296 = arith.constant 2 : index
    %c0_297 = arith.constant 0 : index
    %306 = vector.load %arg9[%c0_294, %c4_295, %c2_296, %c0_297] : memref<1x12x16x64xf32, #tpu.memory_space<vmem>>, vector<1x8x8x64xf32>
    %307 = vector.shape_cast %305 : vector<64xf32> to vector<1x1x1x64xf32>
    %308 = vector.broadcast %307 : vector<1x1x1x64xf32> to vector<1x8x8x64xf32>
    %309 = arith.mulf %306, %308 : vector<1x8x8x64xf32>
    %cst_298 = arith.constant dense<0.000000e+00> : vector<1x8x8xf32>
    %310 = vector.multi_reduction <add>, %309, %cst_298 [3] : vector<1x8x8x64xf32> to vector<1x8x8xf32>
    %311 = arith.addf %303, %310 : vector<1x8x8xf32>
    %c23 = arith.constant 23 : index
    %c0_299 = arith.constant 0 : index
    %312 = vector.load %arg6[%c23, %c0_299] : memref<25x64xf32, #tpu.memory_space<vmem>>, vector<1x64xf32>
    %313 = vector.shape_cast %312 : vector<1x64xf32> to vector<64xf32>
    %c0_300 = arith.constant 0 : index
    %c4_301 = arith.constant 4 : index
    %c3_302 = arith.constant 3 : index
    %c0_303 = arith.constant 0 : index
    %314 = vector.load %arg9[%c0_300, %c4_301, %c3_302, %c0_303] : memref<1x12x16x64xf32, #tpu.memory_space<vmem>>, vector<1x8x8x64xf32>
    %315 = vector.shape_cast %313 : vector<64xf32> to vector<1x1x1x64xf32>
    %316 = vector.broadcast %315 : vector<1x1x1x64xf32> to vector<1x8x8x64xf32>
    %317 = arith.mulf %314, %316 : vector<1x8x8x64xf32>
    %cst_304 = arith.constant dense<0.000000e+00> : vector<1x8x8xf32>
    %318 = vector.multi_reduction <add>, %317, %cst_304 [3] : vector<1x8x8x64xf32> to vector<1x8x8xf32>
    %319 = arith.addf %311, %318 : vector<1x8x8xf32>
    %c24 = arith.constant 24 : index
    %c0_305 = arith.constant 0 : index
    %320 = vector.load %arg6[%c24, %c0_305] : memref<25x64xf32, #tpu.memory_space<vmem>>, vector<1x64xf32>
    %321 = vector.shape_cast %320 : vector<1x64xf32> to vector<64xf32>
    %c0_306 = arith.constant 0 : index
    %c4_307 = arith.constant 4 : index
    %c4_308 = arith.constant 4 : index
    %c0_309 = arith.constant 0 : index
    %322 = vector.load %arg9[%c0_306, %c4_307, %c4_308, %c0_309] : memref<1x12x16x64xf32, #tpu.memory_space<vmem>>, vector<1x8x8x64xf32>
    %323 = vector.shape_cast %321 : vector<64xf32> to vector<1x1x1x64xf32>
    %324 = vector.broadcast %323 : vector<1x1x1x64xf32> to vector<1x8x8x64xf32>
    %325 = arith.mulf %322, %324 : vector<1x8x8x64xf32>
    %cst_310 = arith.constant dense<0.000000e+00> : vector<1x8x8xf32>
    %326 = vector.multi_reduction <add>, %325, %cst_310 [3] : vector<1x8x8x64xf32> to vector<1x8x8xf32>
    %327 = arith.addf %319, %326 : vector<1x8x8xf32>
    %328 = vector.shape_cast %327 : vector<1x8x8xf32> to vector<1x64xf32>
    %c0_311 = arith.constant 0 : index
    %c0_312 = arith.constant 0 : index
    %329 = vector.load %arg7[%c0_311, %c0_312] : memref<1x1xf32, #tpu.memory_space<vmem>>, vector<1x1xf32>
    %330 = vector.broadcast %329 : vector<1x1xf32> to vector<1x64xf32>
    %331 = arith.addf %328, %330 : vector<1x64xf32>
    %c0_313 = arith.constant 0 : index
    %c0_314 = arith.constant 0 : index
    %c0_315 = arith.constant 0 : index
    %332 = vector.load %arg8[%c0_313, %c0_314, %c0_315] : memref<1x1x64xf32, #tpu.memory_space<vmem>>, vector<1x1x64xf32>
    %333 = vector.shape_cast %332 : vector<1x1x64xf32> to vector<1x64xf32>
    %334 = vector.shape_cast %331 : vector<1x64xf32> to vector<1x1x64xf32>
    tpu.vector_store %arg8[%c0_313, %c0_314, %c0_315], %334 {strides = array<i32>} : memref<1x1x64xf32, #tpu.memory_space<vmem>>, vector<1x1x64xf32>,
    return
  }
  func.func @transform_0(%arg0: i32) -> (i32, i32, i32) {
    %c0_i32 = arith.constant 0 : i32
    %c0_i32_0 = arith.constant 0 : i32
    %c0_i32_1 = arith.constant 0 : i32
    return %arg0, %c0_i32, %c0_i32_0 : i32, i32, i32
  }
  func.func @transform_1(%arg0: i32) -> (i32, i32) {
    %c0_i32 = arith.constant 0 : i32
    %c0_i32_0 = arith.constant 0 : i32
    %c0_i32_1 = arith.constant 0 : i32
    return %c0_i32, %c0_i32_0 : i32, i32
  }
  func.func @transform_2(%arg0: i32) -> (i32, i32) {
    %c0_i32 = arith.constant 0 : i32
    %c0_i32_0 = arith.constant 0 : i32
    %c0_i32_1 = arith.constant 0 : i32
    return %c0_i32, %c0_i32_0 : i32, i32
  }
  func.func @transform_3(%arg0: i32) -> (i32, i32) {
    %c0_i32 = arith.constant 0 : i32
    %c0_i32_0 = arith.constant 0 : i32
    %c0_i32_1 = arith.constant 0 : i32
    return %c0_i32, %c0_i32_0 : i32, i32
  }
  func.func @transform_4(%arg0: i32) -> (i32, i32) {
    %c0_i32 = arith.constant 0 : i32
    %c0_i32_0 = arith.constant 0 : i32
    %c0_i32_1 = arith.constant 0 : i32
    return %c0_i32, %c0_i32_0 : i32, i32
  }
  func.func @transform_5(%arg0: i32) -> (i32, i32) {
    %c0_i32 = arith.constant 0 : i32
    %c0_i32_0 = arith.constant 0 : i32
    %c0_i32_1 = arith.constant 0 : i32
    return %c0_i32, %c0_i32_0 : i32, i32
  }
  func.func @transform_6(%arg0: i32) -> (i32, i32) {
    %c0_i32 = arith.constant 0 : i32
    %c0_i32_0 = arith.constant 0 : i32
    %c0_i32_1 = arith.constant 0 : i32
    return %c0_i32, %c0_i32_0 : i32, i32
  }
  func.func @transform_7(%arg0: i32) -> (i32, i32, i32) {
    %c0_i32 = arith.constant 0 : i32
    %c0_i32_0 = arith.constant 0 : i32
    %c0_i32_1 = arith.constant 0 : i32
    return %arg0, %c0_i32, %c0_i32_0 : i32, i32, i32
  }
}

</mosaic_0001>

<bundles_post_ra>
// kernel: finenet_forward.1
= control target key start
LH: loop header
LB: loop body
LE: loop exit
PB: predicated region body
PF: predicated region fallthrough
CT: control target
= control target key end

     0   :  { %s5816_s26 = smov 0   ;;  %s8084_s0 = inlined_call_operand.vmem [shape: bf16[2,256,256], index: 0, kind: input, shape index: {}]   ;;  %s8085_s1 = inlined_call_operand.vmem [shape: bf16[256,64], index: 1, kind: input, shape index: {}]   ;;  %s8086_s2 = inlined_call_operand.vmem [shape: f32[1,64], index: 2, kind: input, shape index: {}]   ;;  %s8087_s3 = inlined_call_operand.vmem [shape: bf16[1664,64], index: 3, kind: input, shape index: {}]   ;;  %s8088_s4 = inlined_call_operand.vmem [shape: f32[1,64], index: 4, kind: input, shape index: {}]   ;;  %s8089_s5 = inlined_call_operand.vmem [shape: f32[25,64], index: 5, kind: input, shape index: {}]   ;;  %s8090_s6 = inlined_call_operand.<no memory space> [shape: f32[1,1], index: 6, kind: input, shape index: {}]   ;;  %s8091_s7 = inlined_call_operand.vmem [shape: f32[2,1,64], index: 7, kind: output, shape index: {}]  }
   0x1   :  { %v12_v0 = vstv %s8090_s6 }
   0x2   :  { %13 = vst [vmem:[#allocation4] sm:$0x1] %v12_v0 }
   0x3 LB: > { %s4645_s27 = sadd.s32 4294967295, %s5758_s26   ;;  %p4649_p0 = scmp.ge.s32.totalorder %s5758_s26, 1  ;;  %s5758_s26 = sphi %s5816_s26, %s19_s26  }
   0x4   : > { %p239_p1 = scmp.lt.s32.totalorder %s5758_s26, 3 }
   0x6   : > { %p240_p2 = pnand %p4649_p0, %p239_p1 }
   0x8   : > { %243 = sbr.rel (%p240_p2) target bundleno = 1567 (0x61f), region = 48 }
   0xf   : > { %v5535_v1 = vld [vmem:[%s8085_s1 + $0x40] sm:$0xff]   ;;  %v5537_v3 = vld [vmem:[%s8085_s1 + $0x48] sm:$0xff]   ;;  %p269_p3 = scmp.lt.s32.totalorder %s4645_s27, 1  ;;  %v5539_v5 = vld [vmem:[%s8085_s1 + $0x50] sm:$0xff]   ;;  %v5760_v18 = vmov 127   ;;  %vm798_vm0 = vcmask 523264  }
  0x10   : > { %v5536_v2 = vld [vmem:[%s8085_s1] sm:$0xff]   ;;  %4846 = vmatprep.subr.bf16.mxu0 %v5535_v1  ;;  %v5538_v4 = vld [vmem:[%s8085_s1 + $0x8] sm:$0xff]   ;;  %v5540_v6 = vld [vmem:[%s8085_s1 + $0x10] sm:$0xff]   ;;  %5271 = vset.pattern.permute.xlu0 %v5760_v18  ;;  %v8092_v57 = vmov 0.0   ;;  %s5762_s18 = smov 64   ;;  %vm932_vm1 = vcmask 517120  }
  0x11   : > { %4847 = vmatpush3.bf16.msra.mxu0 %v5536_v2  ;;  %s8123_s27 = smov (!%p269_p3, %s4645_s27), 1  ;;  %v5541_v7 = vld [vmem:[%s8085_s1 + $0x58] sm:$0xff]   ;;  %v5543_v9 = vld [vmem:[%s8085_s1 + $0x60] sm:$0xff]   ;;  %v5545_v11 = vld [vmem:[%s8085_s1 + $0x68] sm:$0xff]   ;;  %5282 = vset.pattern.permute.xlu1 %v5760_v18  ;;  %922 = vst.msk [vmem:[#allocation2] sm:$0xff] %vm798_vm0, %v8092_v57  ;;  %vm4479_vm4 = vcmask 1041409  }
  0x12   : > { %4848 = vmatprep.subr.bf16.mxu0 %v5537_v3  ;;  %v5542_v8 = vld [vmem:[%s8085_s1 + $0x18] sm:$0xff]   ;;  %s4833_s20 = sshll.u32 %s8123_s27, 8  ;;  %v5544_v10 = vld [vmem:[%s8085_s1 + $0x20] sm:$0xff]   ;;  %v5546_v13 = vld [vmem:[%s8085_s1 + $0x28] sm:$0xff]   ;;  %923 = vst.msk [vmem:[#allocation2 + $0x8] sm:$0xff] %vm798_vm0, %v8092_v57  ;;  %vm4481_vm5 = vcmask 1042434   ;;  %s276_s6 = scalar_lea.vmem %s8091_s7, %s8123_s27 }
  0x13   : > { %s5857_s25 = scalar_lea.vmem %s8084_s0, %s4833_s20  ;;  %v5547_v14 = vld [vmem:[%s8085_s1 + $0x70] sm:$0xff]   ;;  %v5549_v16 = vld [vmem:[%s8085_s1 + $0x78] sm:$0xff]   ;;  %924 = vst.msk [vmem:[#allocation2 + $0x10] sm:$0xff] %vm798_vm0, %v8092_v57  ;;  %925 = vst.msk [vmem:[#allocation2 + $0x18] sm:$0xff] %vm798_vm0, %v8092_v57  ;;  %vm4483_vm6 = vcmask 1043459   ;;  %vm4485_vm7 = vcmask 1044484  }
  0x14   : > { %v5553_v12 = vld [vmem:[%s5857_s25 + $0x4] ss:$8 sps:$4 sm:$0xff]   ;;  %v5548_v15 = vld [vmem:[%s8085_s1 + $0x30] sm:$0xff]   ;;  %v5550_v17 = vld [vmem:[%s8085_s1 + $0x38] sm:$0xff]   ;;  %927 = vst.msk [vmem:[#allocation2 + $0xa0] sm:$0xff] %vm798_vm0, %v8092_v57  ;;  %vm4487_vm8 = vcmask 1045509  }
  0x15   : > { %4849 = vmatpush3.bf16.msra.mxu0 %v5538_v4  ;;  %637 = vmatprep.mubr.bf16.mxu0 %v5553_v12  ;;  %v5551_v19 = vld [vmem:[%s5857_s25] ss:$8 sps:$4 sm:$0xff]   ;;  %v5554_v20 = vld [vmem:[%s5857_s25 + $0x14] ss:$8 sps:$4 sm:$0xff]   ;;  %v5556_v21 = vld [vmem:[%s5857_s25 + $0x10] ss:$8 sps:$4 sm:$0xff]  }
  0x16   : > { %4850 = vmatprep.subr.bf16.mxu0 %v5539_v5  ;;  %v5557_v22 = vld [vmem:[%s5857_s25 + $0x24] ss:$8 sps:$4 sm:$0xff]   ;;  %v857_v24 = vld [vmem:[%s5857_s25 + $0x14] ss:$8 sps:$4 sm:$0xff]   ;;  %v5559_v39 = vld [vmem:[%s5857_s25 + $0x20] ss:$8 sps:$4 sm:$0xff]  }
  0x17   : > { %v855_v23 = vld [vmem:[%s5857_s25 + $0x4] ss:$8 sps:$4 sm:$0xff]   ;;  %v865_v27 = vunpack.c.l.bf16 %v857_v24  ;;  %v866_v28 = vunpack.c.h.bf16 %v857_v24  ;;  %v861_v30 = vld [vmem:[%s5857_s25 + $0x34] ss:$8 sps:$4 sm:$0xff]   ;;  %v5562_v41 = vld [vmem:[%s5857_s25 + $0x30] ss:$8 sps:$4 sm:$0xff]  }
  0x18   : > { %v863_v25 = vunpack.c.l.bf16 %v855_v23  ;;  %v864_v26 = vunpack.c.h.bf16 %v855_v23  ;;  %v859_v29 = vld [vmem:[%s5857_s25 + $0x24] ss:$8 sps:$4 sm:$0xff]   ;;  %v869_v33 = vunpack.c.l.bf16 %v861_v30  ;;  %v870_v34 = vunpack.c.h.bf16 %v861_v30  ;;  %v5560_v40 = vld [vmem:[%s5857_s25 + $0x34] ss:$8 sps:$4 sm:$0xff]   ;;  %v5565_v43 = vld [vmem:[%s5857_s25 + $0x40] ss:$8 sps:$4 sm:$0xff]  }
  0x19   : > { %4851 = vmatpush3.bf16.msra.mxu0 %v5540_v6  ;;  %v867_v31 = vunpack.c.l.bf16 %v859_v29  ;;  %v868_v32 = vunpack.c.h.bf16 %v859_v29  ;;  %v5277_v37 = vpack.i.bf16 %v866_v28, %v865_v27  ;;  %v5563_v42 = vld [vmem:[%s5857_s25 + $0x44] ss:$8 sps:$4 sm:$0xff]   ;;  %v5566_v44 = vld [vmem:[%s5857_s25 + $0x54] ss:$8 sps:$4 sm:$0xff]   ;;  %v5568_v45 = vld [vmem:[%s5857_s25 + $0x50] ss:$8 sps:$4 sm:$0xff]  }
  0x1a   : > { %4852 = vmatprep.subr.bf16.mxu0 %v5541_v7  ;;  %v5272_v35 = vpack.i.bf16 %v864_v26, %v863_v25  ;;  %v5288_v38 = vpack.i.bf16 %v870_v34, %v869_v33  ;;  %v5569_v46 = vld [vmem:[%s5857_s25 + $0x64] ss:$8 sps:$4 sm:$0xff]   ;;  %v5571_v47 = vld [vmem:[%s5857_s25 + $0x60] ss:$8 sps:$4 sm:$0xff]   ;;  %v5572_v48 = vld [vmem:[%s5857_s25 + $0x74] ss:$8 sps:$4 sm:$0xff]  }
  0x1b   : > { %v5283_v36 = vpack.i.bf16 %v868_v32, %v867_v31  ;;  %v5574_v49 = vld [vmem:[%s5857_s25 + $0x70] ss:$8 sps:$4 sm:$0xff]   ;;  %v5575_v50 = vld [vmem:[%s5857_s25 + $0x84] ss:$8 sps:$4 sm:$0xff]   ;;  %v5577_v51 = vld [vmem:[%s5857_s25 + $0x80] ss:$8 sps:$4 sm:$0xff]  }
  0x1c   : > { %5273 = vperm.xlu0 %5271, %v5272_v35   ;;  %v5578_v52 = vld [vmem:[%s5857_s25 + $0x94] ss:$8 sps:$4 sm:$0xff]   ;;  %v5580_v53 = vld [vmem:[%s5857_s25 + $0x90] ss:$8 sps:$4 sm:$0xff]   ;;  %v5581_v54 = vld [vmem:[%s5857_s25 + $0xa4] ss:$8 sps:$4 sm:$0xff]  }
  0x1d   : > { %4853 = vmatpush3.bf16.msra.mxu0 %v5542_v8  ;;  %5284 = vperm.xlu1 %5282, %v5283_v36   ;;  %v5583_v55 = vld [vmem:[%s5857_s25 + $0xa0] ss:$8 sps:$4 sm:$0xff]   ;;  %v5584_v56 = vld [vmem:[%s5857_s25 + $0xb4] ss:$8 sps:$4 sm:$0xff]   ;;  %928 = vst.msk [vmem:[#allocation2 + $0xa8] sm:$0xff] %vm798_vm0, %v8092_v57  ;;  %929 = vst.msk [vmem:[#allocation2 + $0xb0] sm:$0xff] %vm798_vm0, %v8092_v57 }
  0x1e   : > { %4854 = vmatprep.subr.bf16.mxu0 %v5543_v9  ;;  %930 = vst.msk [vmem:[#allocation2 + $0xb8] sm:$0xff] %vm798_vm0, %v8092_v57  ;;  %v5586_v58 = vld [vmem:[%s5857_s25 + $0xb0] ss:$8 sps:$4 sm:$0xff]   ;;  %v965_v59 = vld [vmem:[#allocation2 + $0x1] sm:$0xff]  ;;  %v5590_v3 = vld [vmem:[%s5857_s25 + $0xd4] ss:$8 sps:$4 sm:$0xff]  }
  0x1f   : > { %v5924_v60 = vld [vmem:[#allocation2 + $0x11] sm:$0xff]  ;;  %v5587_v61 = vld [vmem:[%s5857_s25 + $0xc4] ss:$8 sps:$4 sm:$0xff]   ;;  %v5589_v2 = vld [vmem:[%s5857_s25 + $0xc0] ss:$8 sps:$4 sm:$0xff]   ;;  %vm4489_vm9 = vcmask 1046534  }
  0x20   : > { %5278 = vperm.xlu0 %5271, %v5277_v37   ;;  %v5298_v62 = vpack.i.bf16 %v5924_v60, %v965_v59  ;;  %v1029_v4 = vld [vmem:[#allocation2 + $0x3] sm:$0xff]  ;;  %v5935_v5 = vld [vmem:[#allocation2 + $0x13] sm:$0xff]  ;;  %v4808_v24 = vld [vmem:[%s8089_s5 + $0x2] ss:$0 sm:$0xff]  ;;  %933 = vst.msk [vmem:[#allocation2 + $0x20] sm:$0x3] %vm932_vm1, %v8092_v57 }
  0x21   : > { %4855 = vmatpush3.bf16.msra.mxu0 %v5544_v10  ;;  %5289 = vperm.xlu1 %5282, %v5288_v38   ;;  %v5293_v6 = vpack.i.bf16 %v5935_v5, %v1029_v4  ;;  %v5592_v7 = vld [vmem:[%s5857_s25 + $0xd0] ss:$8 sps:$4 sm:$0xff]   ;;  %v5593_v10 = vld [vmem:[%s5857_s25 + $0xe4] ss:$8 sps:$4 sm:$0xff]   ;;  %v5595_v12 = vld [vmem:[%s5857_s25 + $0xe0] ss:$8 sps:$4 sm:$0xff]  }
  0x22   : > { %4856 = vmatprep.subr.bf16.mxu0 %v5545_v11  ;;  %v5965_v25 = vld [vmem:[#allocation2 + $0x2] sm:$0xff]  ;;  %v5976_v34 = vld [vmem:[#allocation2 + $0x12] sm:$0xff]  ;;  %934 = vst.msk [vmem:[#allocation2 + $0x30] sm:$0x3] %vm932_vm1, %v8092_v57  ;;  %935 = vst.msk [vmem:[#allocation2 + $0x40] sm:$0x3] %vm932_vm1, %v8092_v57 }
  0x23   : > { %v3233_v26 = vmul.f32 %v4808_v24, %v5965_v25  ;;  %v4809_v30 = vld [vmem:[%s8089_s5 + $0x3] ss:$0 sm:$0xff]  ;;  %v3234_v35 = vmul.f32 %v4808_v24, %v5976_v34  ;;  %v4810_v36 = vld [vmem:[%s8089_s5 + $0x4] ss:$0 sm:$0xff]  ;;  %936 = vst.msk [vmem:[#allocation2 + $0x50] sm:$0x3] %vm932_vm1, %v8092_v57  ;;  %vm7102_vm3 = vmpackc.low %vm798_vm0, %vm798_vm0 }
  0x24   : > { %v5929_v63 = vld [vmem:[#allocation2 + $0xa1] sm:$0xff]  ;;  %5294 = vrot.lane.b32.xlu0 %v5293_v6, %s5762_s18  ;;  %v3286_v31 = vmul.f32 %v4809_v30, %v1029_v4  ;;  %937 = vst.msk [vmem:[#allocation2 + $0x60] sm:$0x3] %vm932_vm1, %v8092_v57  ;;  %938 = vst.msk [vmem:[#allocation2 + $0x70] sm:$0x3] %vm932_vm1, %v8092_v57  ;;  %v5605_v24 = vld [vmem:[%s8087_s3 + $0x58] sm:$0xff]  }
  0x25   : > { %4857 = vmatpush3.bf16.msra.mxu0 %v5546_v13  ;;  %5299 = vrot.lane.b32.xlu1 %v5298_v62, %s5762_s18  ;;  %v1615_v0 = vld [vmem:[#allocation2 + $0xb1] sm:$0xff]  ;;  %v5940_v8 = vld [vmem:[#allocation2 + $0xa3] sm:$0xff]  ;;  %v3241_v28 = vsel %vm798_vm0, %v3233_v26, 0.0  ;;  %939 = vst.msk [vmem:[#allocation2 + $0x80] sm:$0x3] %vm932_vm1, %v8092_v57  ;;  %vm4491_vm10 = vcmask 1047559  }
  0x26   : > { %4858 = vmatprep.subr.bf16.mxu0 %v5547_v14  ;;  %v5308_v1 = vpack.i.bf16 %v1615_v0, %v5929_v63  ;;  %v1679_v9 = vld [vmem:[#allocation2 + $0xb3] sm:$0xff]  ;;  %v3294_v33 = vsel %vm798_vm0, %v3286_v31, 0.0  ;;  %v3327_v37 = vld [vmem:[#allocation2 + $0x4] sm:$0xff]  ;;  %940 = vst.msk [vmem:[#allocation2 + $0x90] sm:$0x3] %vm932_vm1, %v8092_v57  ;;  %s5766_s20 = smov 8  }
  0x27   : > { %v5303_v11 = vpack.i.bf16 %v1679_v9, %v5940_v8  ;;  %v5596_v13 = vld [vmem:[%s5857_s25 + $0xf4] ss:$8 sps:$4 sm:$0xff]   ;;  %v5598_v14 = vld [vmem:[%s5857_s25 + $0xf0] ss:$8 sps:$4 sm:$0xff]   ;;  %v3339_v38 = vmul.f32 %v4810_v36, %v3327_v37  ;;  %v4814_v62 = vld [vmem:[%s8089_s5 + $0x8] ss:$0 sm:$0xff] }
  0x28   : > { %v3551_v0 = vmul.f32 %v4814_v62, %v5935_v5  ;;  %v4023_v4 = vld [vmem:[#allocation2 + $0xa2] sm:$0xff]  ;;  %941 = vst.msk [vmem:[#allocation2 + $0x2a] sm:$0x3] %vm932_vm1, %v8092_v57  ;;  %942 = vst.msk [vmem:[#allocation2 + $0x3a] sm:$0x3] %vm932_vm1, %v8092_v57  ;;  %v5606_v26 = vld [vmem:[%s8087_s3 + $0x18] sm:$0xff]  }
  0x29   : > { %4859 = vmatpush3.bf16.msra.mxu0 %v5548_v15  ;;  %5309 = vrot.lane.b32.xlu1 %v5308_v1, %s5762_s18  ;;  %v4806_v15 = vld [vmem:[%s8089_s5] ss:$0 sm:$0xff]  ;;  %943 = vst.msk [vmem:[#allocation2 + $0x4a] sm:$0x3] %vm932_vm1, %v8092_v57  ;;  %944 = vst.msk [vmem:[#allocation2 + $0x5a] sm:$0x3] %vm932_vm1, %v8092_v57 }
  0x2a   : > { %4860 = vmatprep.subr.bf16.mxu0 %v5549_v16  ;;  %5304 = vrot.lane.b32.xlu0 %v5303_v11, %s5762_s18  ;;  %v5951_v16 = vld [vmem:[#allocation2 + $0x10] sm:$0xff]  ;;  %945 = vst.msk [vmem:[#allocation2 + $0x6a] sm:$0x3] %vm932_vm1, %v8092_v57  ;;  %946 = vst.msk [vmem:[#allocation2 + $0x7a] sm:$0x3] %vm932_vm1, %v8092_v57  ;;  %s5767_s21 = smov 16  }
  0x2b   : > { %947 = vst.msk [vmem:[#allocation2 + $0x8a] sm:$0x3] %vm932_vm1, %v8092_v57  ;;  %948 = vst.msk [vmem:[#allocation2 + $0x9a] sm:$0x3] %vm932_vm1, %v8092_v57  ;;  %v1422_v57 = vld [vmem:[#allocation2 + $0xa0] sm:$0xff]  ;;  %s5768_s22 = smov 24  }
  0x2c   : > { %s5769_s23 = smov 32   ;;  %s5770_s24 = smov 40   ;;  %vm4571_vm11 = vcmask 64512   ;;  %vm4573_vm12 = vcmask 130048   ;;  %vm4575_vm13 = vcmask 195584   ;;  %vm4577_vm14 = vcmask 261120  }
  0x2d   : > { %4861 = vmatpush3.bf16.msra.mxu0 %v5550_v17  ;;  %v3128_v17 = vmul.f32 %v4806_v15, %v5951_v16  ;;  %s5772_s25 = smov 56   ;;  %vm4579_vm15 = vcmask 326656   ;;  %vm4583_vm1 = vcmask 457728  }
  0x2f   : > { %v3138_v18 = vsel %vm798_vm0, %v3128_v17, 0.0 }
  0x30   : > { %638 = vmatmul.mubr.bf16.vlgmr.msra.gmra.mrb[0].mxu0 %v5551_v19  ;;  %v4807_v19 = vld [vmem:[%s8089_s5 + $0x1] ss:$0 sm:$0xff] }
  0x31   : > { %645 = vmatprep.mubr.bf16.mxu0 %v5554_v20  ;;  %v3180_v20 = vmul.f32 %v4807_v19, %v965_v59  ;;  %v3181_v29 = vmul.f32 %v4807_v19, %v5924_v60  ;;  %v5601_v19 = vld [vmem:[%s8087_s3 + $0x48] sm:$0xff]  }
  0x33   : > { %v3191_v32 = vsel %vm798_vm0, %v3181_v29, 0.0 }
  0x38   : > { %646 = vmatmul.mubr.bf16.gmra.mrb[4].mxu0 %v5556_v21  ;;  %v3188_v21 = vsel %vm798_vm0, %v3180_v20, 0.0  ;;  %v5602_v20 = vld [vmem:[%s8087_s3 + $0x8] sm:$0xff]  }
  0x39   : > { %653 = vmatprep.mubr.bf16.mxu0 %v5557_v22  ;;  %v5959_v22 = vld [vmem:[#allocation2] sm:$0xff] }
  0x3a   : > { %v3127_v23 = vmul.f32 %v4806_v15, %v5959_v22 }
  0x3c   : > { %v3135_v27 = vsel %vm798_vm0, %v3127_v23, 0.0  ;;  %v5604_v23 = vld [vmem:[%s8087_s3 + $0x10] sm:$0xff]  }
  0x40   : > { %654 = vmatmul.mubr.bf16.gmra.mrb[8].mxu0 %v5559_v39  ;;  %v3244_v39 = vsel %vm798_vm0, %v3234_v35, 0.0  ;;  %v5609_v35 = vld [vmem:[%s8087_s3 + $0x68] sm:$0xff]  }
  0x41   : > { %661 = vmatprep.mubr.bf16.mxu0 %v5560_v40  ;;  %v3347_v40 = vsel %vm798_vm0, %v3339_v38, 0.0 }
  0x48   : > { %662 = vmatmul.mubr.bf16.gmra.mrb[12].mxu0 %v5562_v41  ;;  %v3287_v41 = vmul.f32 %v4809_v30, %v5935_v5  ;;  %v5608_v30 = vld [vmem:[%s8087_s3 + $0x20] sm:$0xff]  }
  0x49   : > { %669 = vmatprep.mubr.bf16.mxu0 %v5563_v42  ;;  %3136 = vadd.xlane.f32.xlu0 %v3135_v27  ;;  %v4811_v42 = vld [vmem:[%s8089_s5 + $0x5] ss:$0 sm:$0xff] }
  0x4d   : > { %3139 = vadd.xlane.f32.xlu1 %v3138_v18  ;;  %3192 = vadd.xlane.f32.xlu0 %v3191_v32  ;;  %v5599_v18 = vld [vmem:[%s8087_s3 + $0x40] sm:$0xff]  }
  0x4e   : > { %4958 = vmatprep.subr.bf16.mxu1 %v5599_v18 }
  0x50   : > { %670 = vmatmul.mubr.bf16.gmra.mrb[16].mxu0 %v5565_v43  ;;  %v3392_v43 = vmul.f32 %v4811_v42, %v5951_v16  ;;  %v5611_v42 = vld [vmem:[%s8087_s3 + $0x70] sm:$0xff]  }
  0x51   : > { %677 = vmatprep.mubr.bf16.mxu0 %v5566_v44  ;;  %3189 = vadd.xlane.f32.xlu1 %v3188_v21  ;;  %v3297_v44 = vsel %vm798_vm0, %v3287_v41, 0.0  ;;  %v5603_v21 = vld [vmem:[%s8087_s3 + $0x50] sm:$0xff]  }
  0x52   : > { %3245 = vadd.xlane.f32.xlu0 %v3244_v39  ;;  %v5610_v39 = vld [vmem:[%s8087_s3 + $0x28] sm:$0xff]  }
  0x55   : > { %3242 = vadd.xlane.f32.xlu1 %v3241_v28  ;;  %v5607_v28 = vld [vmem:[%s8087_s3 + $0x60] sm:$0xff]  }
  0x56   : > { %3298 = vadd.xlane.f32.xlu0 %v3297_v44 }
  0x58   : > { %678 = vmatmul.mubr.bf16.gmra.mrb[20].mxu0 %v5568_v45  ;;  %v3400_v45 = vsel %vm798_vm0, %v3392_v43, 0.0  ;;  %v5612_v43 = vld [vmem:[%s8087_s3 + $0x30] sm:$0xff]  }
  0x59   : > { %685 = vmatprep.mubr.bf16.mxu0 %v5569_v46  ;;  %3295 = vadd.xlane.f32.xlu1 %v3294_v33  ;;  %v5991_v46 = vld [vmem:[#allocation2 + $0x14] sm:$0xff] }
  0x5d   : > { %3348 = vadd.xlane.f32.xlu1 %v3347_v40 }
  0x60   : > { %686 = vmatmul.mubr.bf16.gmra.mrb[24].mxu0 %v5571_v47  ;;  %v3340_v47 = vmul.f32 %v4810_v36, %v5991_v46 }
  0x61   : > { %693 = vmatprep.mubr.bf16.mxu0 %v5572_v48  ;;  %3401 = vadd.xlane.f32.xlu1 %v3400_v45  ;;  %v4812_v48 = vld [vmem:[%s8089_s5 + $0x6] ss:$0 sm:$0xff] }
  0x68   : > { %694 = vmatmul.mubr.bf16.gmra.mrb[28].mxu0 %v5574_v49  ;;  %v3445_v49 = vmul.f32 %v4812_v48, %v5924_v60  ;;  %v4822_v60 = vld [vmem:[%s8089_s5 + $0x10] ss:$0 sm:$0xff] }
  0x69   : > { %701 = vmatprep.mubr.bf16.mxu0 %v5575_v50  ;;  %v3350_v50 = vsel %vm798_vm0, %v3340_v47, 0.0  ;;  %v5613_v47 = vld [vmem:[%s8087_s3 + $0x78] sm:$0xff]  }
  0x6a   : > { %3351 = vadd.xlane.f32.xlu0 %v3350_v50 }
  0x70   : > { %702 = vmatmul.mubr.bf16.gmra.mrb[32].mxu0 %v5577_v51  ;;  %v3453_v51 = vsel %vm798_vm0, %v3445_v49, 0.0 }
  0x71   : > { %709 = vmatprep.mubr.bf16.mxu0 %v5578_v52  ;;  %v4821_v52 = vld [vmem:[%s8089_s5 + $0xf] ss:$0 sm:$0xff]  ;;  %3454 = vadd.xlane.f32.xlu1 %v3453_v51 }
  0x78   : > { %710 = vmatmul.mubr.bf16.gmra.mrb[36].mxu0 %v5580_v53  ;;  %v3917_v53 = vld [vmem:[#allocation2 + $0xa0] sm:$0xff] }
  0x79   : > { %717 = vmatprep.mubr.bf16.mxu0 %v5581_v54  ;;  %v3929_v54 = vmul.f32 %v4821_v52, %v3917_v53 }
  0x80   : > { %718 = vmatmul.mubr.bf16.gmra.mrb[40].mxu0 %v5583_v55  ;;  %v4813_v55 = vld [vmem:[%s8089_s5 + $0x7] ss:$0 sm:$0xff] }
  0x81   : > { %725 = vmatprep.mubr.bf16.mxu0 %v5584_v56  ;;  %v3498_v56 = vmul.f32 %v4813_v55, %v5976_v34 }
  0x83   : > { %v3506_v59 = vsel %vm798_vm0, %v3498_v56, 0.0  ;;  %v5614_v56 = vld [vmem:[%s8087_s3 + $0x38] sm:$0xff]  }
  0x84   : > { %3507 = vadd.xlane.f32.xlu1 %v3506_v59 }
  0x88   : > { %726 = vmatmul.mubr.bf16.gmra.mrb[44].mxu0 %v5586_v58  ;;  %v3951_v58 = vsel %vm798_vm0, %v3929_v54, 0.0 }
  0x89   : > { %733 = vmatprep.mubr.bf16.mxu0 %v5587_v61  ;;  %3952 = vadd.xlane.f32.xlu0 %v3951_v58  ;;  %v3982_v61 = vmul.f32 %v4822_v60, %v5929_v63  ;;  %v4815_v63 = vld [vmem:[%s8089_s5 + $0x9] ss:$0 sm:$0xff] }
  0x8b   : > { %v4004_v1 = vsel %vm798_vm0, %v3982_v61, 0.0 }
  0x8d   : > { %4005 = vadd.xlane.f32.xlu0 %v4004_v1 }
  0x90   : > { %734 = vmatmul.mubr.bf16.gmra.mrb[48].mxu0 %v5589_v2  ;;  %v3559_v2 = vsel %vm798_vm0, %v3551_v0, 0.0 }
  0x91   : > { %741 = vmatprep.mubr.bf16.mxu0 %v5590_v3  ;;  %v4823_v3 = vld [vmem:[%s8089_s5 + $0x11] ss:$0 sm:$0xff]  ;;  %3560 = vadd.xlane.f32.xlu1 %v3559_v2 }
  0x92   : > { %v4035_v6 = vmul.f32 %v4823_v3, %v4023_v4 }
  0x94   : > { %v4057_v5 = vsel %vm798_vm0, %v4035_v6, 0.0 }
  0x95   : > { %4058 = vadd.xlane.f32.xlu0 %v4057_v5 }
  0x98   : > { %742 = vmatmul.mubr.bf16.gmra.mrb[52].mxu0 %v5592_v7  ;;  %v3604_v7 = vmul.f32 %v4815_v63, %v5991_v46 }
  0x99   : > { %749 = vmatprep.mubr.bf16.mxu0 %v5593_v10  ;;  %v4824_v10 = vld [vmem:[%s8089_s5 + $0x12] ss:$0 sm:$0xff] }
  0x9a   : > { %v3612_v9 = vsel %vm798_vm0, %v3604_v7, 0.0  ;;  %v4088_v11 = vmul.f32 %v4824_v10, %v5940_v8  ;;  %v5600_v8 = vld [vmem:[%s8087_s3] sm:$0xff]  }
  0x9b   : > { %3613 = vadd.xlane.f32.xlu1 %v3612_v9  ;;  %4959 = vmatpush3.bf16.msra.mxu1 %v5600_v8  ;;  %v6093_v27 = vpop.permute.xlu0 %5273 }
  0x9c   : > { %4960 = vmatprep.subr.bf16.mxu1 %v5601_v19  ;;  %v6098_v29 = vpop.permute.xlu1 %5284 }
  0x9f   : > { %4961 = vmatpush3.bf16.msra.mxu1 %v5602_v20  ;;  %v6103_v33 = vpop.permute.xlu0 %5278 }
  0xa0   : > { %750 = vmatmul.mubr.bf16.gmra.mrb[56].mxu0 %v5595_v12  ;;  %v4110_v12 = vsel %vm798_vm0, %v4088_v11, 0.0  ;;  %4962 = vmatprep.subr.bf16.mxu1 %v5603_v21  ;;  %v6108_v38 = vpop.permute.xlu1 %5289 }
  0xa1   : > { %757 = vmatprep.mubr.bf16.mxu0 %v5596_v13  ;;  %4111 = vadd.xlane.f32.xlu0 %v4110_v12  ;;  %v4825_v13 = vld [vmem:[%s8089_s5 + $0x13] ss:$0 sm:$0xff] }
  0xa3   : > { %4963 = vmatpush3.bf16.msra.mxu1 %v5604_v23  ;;  %v5295_v44 = vpop.permute.xlu0 %5294 }
  0xa4   : > { %4964 = vmatprep.subr.bf16.mxu1 %v5605_v24  ;;  %v5300_v45 = vpop.permute.xlu1 %5299  ;;  %v5297_v48 = vunpack.i.h.bf16 %v5295_v44  ;;  %v5296_v49 = vunpack.i.l.bf16 %v5295_v44 }
  0xa5   : > { %v5302_v50 = vunpack.i.h.bf16 %v5300_v45  ;;  %v5301_v51 = vunpack.i.l.bf16 %v5300_v45 }
  0xa6   : > { %v1069_v58 = vsel %vm798_vm0, %v5965_v25, %v5296_v49  ;;  %v1070_v59 = vsel %vm798_vm0, %v5976_v34, %v5297_v48 }
  0xa7   : > { %4965 = vmatpush3.bf16.msra.mxu1 %v5606_v26  ;;  %v1077_v61 = vpack.c.bf16 %v1070_v59, %v1069_v58  ;;  %v1005_v62 = vsel %vm798_vm0, %v5959_v22, %v5301_v51  ;;  %v1006_v0 = vsel %vm798_vm0, %v5951_v16, %v5302_v50 }
  0xa8   : > { %758 = vmatmul.mubr.bf16.gmra.mrb[60].mxu0 %v5598_v14  ;;  %v4129_v14 = vld [vmem:[#allocation2 + $0xa4] sm:$0xff]  ;;  %4966 = vmatprep.subr.bf16.mxu1 %v5607_v28  ;;  %v1013_v2 = vpack.c.bf16 %v1006_v0, %v1005_v62 }
  0xa9   : > { %v4141_v15 = vmul.f32 %v4825_v13, %v4129_v14  ;;  %2675 = vmatprep.mubr.bf16.mxu1 %v1077_v61  ;;  %v6138_v13 = vld [vmem:[%s8086_s2] ss:$0 sm:$0xff] }
  0xab   : > { %v4163_v17 = vsel %vm798_vm0, %v4141_v15, 0.0  ;;  %4967 = vmatpush3.bf16.msra.mxu1 %v5608_v30 }
  0xac   : > { %4164 = vadd.xlane.f32.xlu0 %v4163_v17  ;;  %4968 = vmatprep.subr.bf16.mxu1 %v5609_v35 }
  0xaf   : > { %4969 = vmatpush3.bf16.msra.mxu1 %v5610_v39 }
  0xb0   : > { %4970 = vmatprep.subr.bf16.mxu1 %v5611_v42 }
  0xb3   : > { %4971 = vmatpush3.bf16.msra.mxu1 %v5612_v43 }
  0xb4   : > { %4972 = vmatprep.subr.bf16.mxu1 %v5613_v47 }
  0xb7   : > { %4973 = vmatpush3.bf16.msra.mxu1 %v5614_v56 }
  0xba   : > { %2676 = vmatmul.mubr.bf16.vlgmr.msra.gmra.mrb[0].mxu1 %v1013_v2 }
 0x103   : > { %v4862_v31 = vpop.f32.mrb[0].mxu0 }
 0x104   : > { %v4863_v32 = vpop.f32.mrb[1].mxu0 }
 0x105   : > { %v4864_v36 = vadd.f32 %v4863_v32, %v4862_v31  ;;  %v4865_v37 = vpop.f32.mrb[2].mxu0 }
 0x106   : > { %v4866_v40 = vpop.f32.mrb[3].mxu0 }
 0x107   : > { %v4867_v41 = vadd.f32 %v4866_v40, %v4865_v37  ;;  %v640_v14 = vadd.f32 %v4864_v36, %v6138_v13 }
 0x109   : > { %v643_v18 = vadd.f32 %v4867_v41, %v6138_v13  ;;  %v766_v21 = vmax.f32 %v640_v14, 0.0 }
 0x10b   : > { %v4868_v52 = vpop.f32.mrb[4].mxu0  ;;  %v767_v26 = vmax.f32 %v643_v18, 0.0  ;;  %v6145_v31 = vsel %vm798_vm0, %v766_v21, -inf }
 0x10c   : > { %v4869_v53 = vpop.f32.mrb[5].mxu0 }
 0x10d   : > { %v4870_v54 = vadd.f32 %v4869_v53, %v4868_v52  ;;  %v4871_v55 = vpop.f32.mrb[6].mxu0  ;;  %v6154_v41 = vsel %vm798_vm0, %v767_v26, -inf }
 0x10e   : > { %v4872_v60 = vpop.f32.mrb[7].mxu0 }
 0x10f   : > { %v4873_v1 = vadd.f32 %v4872_v60, %v4871_v55  ;;  %v648_v32 = vadd.f32 %v4870_v54, %v6138_v13 }
 0x111   : > { %v651_v42 = vadd.f32 %v4873_v1, %v6138_v13  ;;  %v768_v49 = vmax.f32 %v648_v32, 0.0 }
 0x113   : > { %v4874_v3 = vpop.f32.mrb[8].mxu0  ;;  %v769_v52 = vmax.f32 %v651_v42, 0.0  ;;  %v6165_v55 = vsel %vm798_vm0, %v768_v49, -inf }
 0x114   : > { %v4875_v4 = vpop.f32.mrb[9].mxu0 }
 0x115   : > { %v4876_v6 = vadd.f32 %v4875_v4, %v4874_v3  ;;  %v4877_v25 = vpop.f32.mrb[10].mxu0  ;;  %v6174_v0 = vsel %vm798_vm0, %v769_v52, -inf }
 0x116   : > { %v4878_v63 = vpop.f32.mrb[11].mxu0 }
 0x117   : > { %v4879_v7 = vadd.f32 %v4878_v63, %v4877_v25  ;;  %v656_v56 = vadd.f32 %v4876_v6, %v6138_v13 }
 0x119   : > { %v659_v1 = vadd.f32 %v4879_v7, %v6138_v13  ;;  %v770_v63 = vmax.f32 %v656_v56, 0.0 }
 0x11b   : > { %v4880_v5 = vpop.f32.mrb[12].mxu0 }
 0x11c   : > { %v4881_v9 = vpop.f32.mrb[13].mxu0 }
 0x11d   : > { %v4882_v10 = vadd.f32 %v4881_v9, %v4880_v5  ;;  %v4883_v11 = vpop.f32.mrb[14].mxu0 }
 0x11e   : > { %v4884_v12 = vpop.f32.mrb[15].mxu0 }
 0x11f   : > { %v6133_v22 = vadd.f32 %v4884_v12, %v4883_v11  ;;  %v771_v11 = vmax.f32 %v659_v1, 0.0  ;;  %v664_v7 = vadd.f32 %v4882_v10, %v6138_v13 }
 0x121   : > { %v6194_v21 = vsel %vm798_vm0, %v771_v11, -inf  ;;  %v772_v32 = vmax.f32 %v664_v7, 0.0 }
 0x123   : > { %v4886_v15 = vpop.f32.mrb[16].mxu0 }
 0x124   : > { %v4887_v17 = vpop.f32.mrb[17].mxu0 }
 0x125   : > { %v4888_v8 = vadd.f32 %v4887_v17, %v4886_v15  ;;  %v4889_v19 = vpop.f32.mrb[18].mxu0  ;;  %v6185_v15 = vsel %vm798_vm0, %v770_v63, -inf }
 0x126   : > { %v4890_v20 = vpop.f32.mrb[19].mxu0 }
 0x127   : > { %v672_v23 = vadd.f32 %v4888_v8, %v6138_v13  ;;  %v4891_v24 = vadd.f32 %v4890_v20, %v4889_v19 }
 0x129   : > { %v774_v28 = vmax.f32 %v672_v23, 0.0  ;;  %v675_v30 = vadd.f32 %v4891_v24, %v6138_v13  ;;  %v667_v23 = vadd.f32 %v6133_v22, %v6138_v13 }
 0x12b   : > { %v6149_v35 = vsel %vm798_vm0, %v774_v28, -inf  ;;  %v775_v36 = vmax.f32 %v675_v30, 0.0  ;;  %v4892_v37 = vpop.f32.mrb[20].mxu0 }
 0x12c   : > { %v801_v39 = vmax.f32 %v6145_v31, %v6149_v35  ;;  %v4893_v40 = vpop.f32.mrb[21].mxu0 }
 0x12d   : > { %v6158_v43 = vsel %vm798_vm0, %v775_v36, -inf  ;;  %v4894_v44 = vadd.f32 %v4893_v40, %v4892_v37  ;;  %v4895_v45 = vpop.f32.mrb[22].mxu0  ;;  %v773_v40 = vmax.f32 %v667_v23, 0.0 }
 0x12e   : > { %v808_v47 = vmax.f32 %v6154_v41, %v6158_v43  ;;  %v4896_v48 = vpop.f32.mrb[23].mxu0 }
 0x12f   : > { %v680_v50 = vadd.f32 %v4894_v44, %v6138_v13  ;;  %v4897_v51 = vadd.f32 %v4896_v48, %v4895_v45  ;;  %v6206_v45 = vsel %vm798_vm0, %v772_v32, -inf  ;;  %v6214_v52 = vsel %vm798_vm0, %v773_v40, -inf }
 0x131   : > { %v776_v53 = vmax.f32 %v680_v50, 0.0  ;;  %v683_v54 = vadd.f32 %v4897_v51, %v6138_v13 }
 0x133   : > { %v6169_v58 = vsel %vm798_vm0, %v776_v53, -inf  ;;  %v777_v59 = vmax.f32 %v683_v54, 0.0  ;;  %v4898_v60 = vpop.f32.mrb[24].mxu0 }
 0x134   : > { %v815_v61 = vmax.f32 %v6165_v55, %v6169_v58  ;;  %v4899_v62 = vpop.f32.mrb[25].mxu0 }
 0x135   : > { %v6178_v2 = vsel %vm798_vm0, %v777_v59, -inf  ;;  %v4900_v3 = vadd.f32 %v4899_v62, %v4898_v60  ;;  %v4901_v4 = vpop.f32.mrb[26].mxu0 }
 0x136   : > { %v822_v6 = vmax.f32 %v6174_v0, %v6178_v2  ;;  %v4902_v25 = vpop.f32.mrb[27].mxu0  ;;  %v5615_v2 = vld [vmem:[%s8087_s3 + $0x240] sm:$0xff]  }
 0x137   : > { %v688_v5 = vadd.f32 %v4900_v3, %v6138_v13  ;;  %v4903_v9 = vadd.f32 %v4902_v25, %v4901_v4  ;;  %5118 = vmatprep.subr.bf16.mxu0 %v5615_v2 }
 0x139   : > { %v778_v12 = vmax.f32 %v688_v5, 0.0  ;;  %v691_v14 = vadd.f32 %v4903_v9, %v6138_v13 }
 0x13b   : > { %v6189_v17 = vsel %vm798_vm0, %v778_v12, -inf  ;;  %v779_v18 = vmax.f32 %v691_v14, 0.0  ;;  %v4904_v8 = vpop.f32.mrb[28].mxu0 }
 0x13c   : > { %v829_v19 = vmax.f32 %v6185_v15, %v6189_v17  ;;  %v4905_v20 = vpop.f32.mrb[29].mxu0 }
 0x13d   : > { %v6199_v24 = vsel %vm798_vm0, %v779_v18, -inf  ;;  %v4906_v26 = vadd.f32 %v4905_v20, %v4904_v8  ;;  %v4907_v10 = vpop.f32.mrb[30].mxu0 }
 0x13e   : > { %v836_v28 = vmax.f32 %v6194_v21, %v6199_v24  ;;  %v4908_v30 = vpop.f32.mrb[31].mxu0 }
 0x13f   : > { %v696_v36 = vadd.f32 %v4906_v26, %v6138_v13  ;;  %v4909_v37 = vadd.f32 %v4908_v30, %v4907_v10 }
 0x141   : > { %v780_v42 = vmax.f32 %v696_v36, 0.0  ;;  %v699_v44 = vadd.f32 %v4909_v37, %v6138_v13 }
 0x143   : > { %v6209_v22 = vsel %vm798_vm0, %v780_v42, -inf  ;;  %v781_v48 = vmax.f32 %v699_v44, 0.0  ;;  %v4910_v49 = vpop.f32.mrb[32].mxu0 }
 0x144   : > { %v843_v50 = vmax.f32 %v6206_v45, %v6209_v22  ;;  %v4911_v51 = vpop.f32.mrb[33].mxu0 }
 0x145   : > { %v6217_v53 = vsel %vm798_vm0, %v781_v48, -inf  ;;  %v4912_v54 = vadd.f32 %v4911_v51, %v4910_v49  ;;  %v4913_v56 = vpop.f32.mrb[34].mxu0 }
 0x146   : > { %v850_v59 = vmax.f32 %v6214_v52, %v6217_v53  ;;  %v4914_v60 = vpop.f32.mrb[35].mxu0 }
 0x147   : > { %v704_v62 = vadd.f32 %v4912_v54, %v6138_v13  ;;  %v4915_v1 = vadd.f32 %v4914_v60, %v4913_v56  ;;  %v8094_v60 = vlaneseq }
 0x149   : > { %v782_v3 = vmax.f32 %v704_v62, 0.0  ;;  %v707_v4 = vadd.f32 %v4915_v1, %v6138_v13 }
 0x14b   : > { %v802_v25 = vsel %vm798_vm0, %v782_v3, -inf  ;;  %v783_v63 = vmax.f32 %v707_v4, 0.0  ;;  %v4916_v5 = vpop.f32.mrb[36].mxu0 }
 0x14c   : > { %v6227_v9 = vmax.f32 %v801_v39, %v802_v25  ;;  %v4917_v11 = vpop.f32.mrb[37].mxu0 }
 0x14d   : > { %v809_v12 = vsel %vm798_vm0, %v783_v63, -inf  ;;  %v4918_v14 = vadd.f32 %v4917_v11, %v4916_v5  ;;  %v4919_v15 = vpop.f32.mrb[38].mxu0 }
 0x14e   : > { %v6233_v7 = vmax.f32 %v808_v47, %v809_v12  ;;  %v4920_v17 = vpop.f32.mrb[39].mxu0  ;;  %v6273_v12 = vand.u32 127, %v8094_v60 }
 0x14f   : > { %v712_v18 = vadd.f32 %v4918_v14, %v6138_v13  ;;  %v4921_v8 = vadd.f32 %v4920_v17, %v4919_v15 }
 0x150   : > { %8096 = vst [vmem:[#allocation5_spill] sm:$0xff] %v6273_v12  ;;  %vm873_vm2 = vcmp.eq.s32.totalorder %v6273_v12, 63 }
 0x151   : > { %v784_v20 = vmax.f32 %v712_v18, 0.0  ;;  %v715_v21 = vadd.f32 %v4921_v8, %v6138_v13 }
 0x153   : > { %v816_v31 = vsel %vm798_vm0, %v784_v20, -inf  ;;  %v785_v35 = vmax.f32 %v715_v21, 0.0  ;;  %v4922_v39 = vpop.f32.mrb[40].mxu0  ;;  %v5617_v21 = vld [vmem:[%s8087_s3 + $0x248] sm:$0xff]  }
 0x154   : > { %v6241_v23 = vmax.f32 %v815_v61, %v816_v31  ;;  %v4923_v24 = vpop.f32.mrb[41].mxu0 }
 0x155   : > { %v823_v41 = vsel %vm798_vm0, %v785_v35, -inf  ;;  %v4924_v43 = vadd.f32 %v4923_v24, %v4922_v39  ;;  %v4925_v47 = vpop.f32.mrb[42].mxu0  ;;  %v5618_v24 = vld [vmem:[%s8087_s3 + $0x208] sm:$0xff]  }
 0x156   : > { %v6247_v26 = vmax.f32 %v822_v6, %v823_v41  ;;  %v4926_v10 = vpop.f32.mrb[43].mxu0  ;;  %v5616_v6 = vld [vmem:[%s8087_s3 + $0x200] sm:$0xff]  }
 0x157   : > { %v720_v30 = vadd.f32 %v4924_v43, %v6138_v13  ;;  %v4927_v32 = vadd.f32 %v4926_v10, %v4925_v47  ;;  %5119 = vmatpush3.bf16.msra.mxu0 %v5616_v6  ;;  %v5276_v43 = vunpack.i.h.bf16 %v6093_v27 }
 0x158   : > { %5120 = vmatprep.subr.bf16.mxu0 %v5617_v21 }
 0x159   : > { %v786_v36 = vmax.f32 %v720_v30, 0.0  ;;  %v723_v37 = vadd.f32 %v4927_v32, %v6138_v13 }
 0x15b   : > { %v830_v55 = vsel %vm798_vm0, %v786_v36, -inf  ;;  %v787_v58 = vmax.f32 %v723_v37, 0.0  ;;  %v4928_v61 = vpop.f32.mrb[44].mxu0  ;;  %5121 = vmatpush3.bf16.msra.mxu0 %v5618_v24  ;;  %v5620_v37 = vld [vmem:[%s8087_s3 + $0x210] sm:$0xff]  }
 0x15c   : > { %v6252_v40 = vmax.f32 %v829_v19, %v830_v55  ;;  %v4929_v42 = vpop.f32.mrb[45].mxu0 }
 0x15d   : > { %v837_v44 = vsel %vm798_vm0, %v787_v58, -inf  ;;  %v4930_v45 = vadd.f32 %v4929_v42, %v4928_v61  ;;  %v4931_v0 = vpop.f32.mrb[46].mxu0  ;;  %v5280_v42 = vunpack.i.l.bf16 %v6103_v33 }
 0x15e   : > { %v6261_v22 = vmax.f32 %v836_v28, %v837_v44  ;;  %v4932_v48 = vpop.f32.mrb[47].mxu0 }
 0x15f   : > { %v728_v49 = vadd.f32 %v4930_v45, %v6138_v13  ;;  %v4933_v19 = vadd.f32 %v4932_v48, %v4931_v0  ;;  %v5621_v48 = vld [vmem:[%s8087_s3 + $0x258] sm:$0xff]  }
 0x161   : > { %v788_v51 = vmax.f32 %v728_v49, 0.0  ;;  %v731_v52 = vadd.f32 %v4933_v19, %v6138_v13  ;;  %v5281_v49 = vunpack.i.h.bf16 %v6103_v33 }
 0x163   : > { %v844_v53 = vsel %vm798_vm0, %v788_v51, -inf  ;;  %v789_v54 = vmax.f32 %v731_v52, 0.0  ;;  %v4934_v56 = vpop.f32.mrb[48].mxu0 }
 0x164   : > { %v6266_v62 = vmax.f32 %v843_v50, %v844_v53  ;;  %v4935_v1 = vpop.f32.mrb[49].mxu0  ;;  %v5275_v50 = vunpack.i.l.bf16 %v6093_v27 }
 0x165   : > { %v851_v28 = vsel %vm798_vm0, %v789_v54, -inf  ;;  %v4936_v3 = vadd.f32 %v4935_v1, %v4934_v56  ;;  %v4937_v4 = vpop.f32.mrb[50].mxu0 }
 0x166   : > { %v6269_v25 = vmax.f32 %v850_v59, %v851_v28  ;;  %v4938_v63 = vpop.f32.mrb[51].mxu0 }
 0x167   : > { %v736_v5 = vadd.f32 %v4936_v3, %v6138_v13  ;;  %v4939_v11 = vadd.f32 %v4938_v63, %v4937_v4 }
 0x169   : > { %v790_v14 = vmax.f32 %v736_v5, 0.0  ;;  %v739_v15 = vadd.f32 %v4939_v11, %v6138_v13 }
 0x16b   : > { %v804_v17 = vsel %vm798_vm0, %v790_v14, -inf  ;;  %v791_v18 = vmax.f32 %v739_v15, 0.0  ;;  %v4940_v8 = vpop.f32.mrb[52].mxu0  ;;  %v5624_v14 = vld [vmem:[%s8087_s3 + $0x220] sm:$0xff]  }
 0x16c   : > { %v805_v59 = vmax.f32 %v6227_v9, %v804_v17  ;;  %v4941_v20 = vpop.f32.mrb[53].mxu0 }
 0x16d   : > { %v811_v31 = vsel %vm798_vm0, %v791_v18, -inf  ;;  %v4942_v35 = vadd.f32 %v4941_v20, %v4940_v8  ;;  %v4943_v39 = vpop.f32.mrb[54].mxu0  ;;  %v5287_v20 = vunpack.i.h.bf16 %v6098_v29 }
 0x16e   : > { %v812_v41 = vmax.f32 %v6233_v7, %v811_v31  ;;  %v914_v9 = vsel %vm873_vm2, %v5275_v50, %v805_v59  ;;  %v4944_v47 = vpop.f32.mrb[55].mxu0  ;;  %v5619_v7 = vld [vmem:[%s8087_s3 + $0x250] sm:$0xff]  }
 0x16f   : > { %949 = vst.msk [vmem:[#allocation2 + $0x22] sm:$0xff] %vm798_vm0, %v914_v9  ;;  %v744_v10 = vadd.f32 %v4942_v35, %v6138_v13  ;;  %v4945_v30 = vadd.f32 %v4944_v47, %v4943_v39  ;;  %5122 = vmatprep.subr.bf16.mxu0 %v5619_v7  ;;  %v5625_v35 = vld [vmem:[%s8087_s3 + $0x268] sm:$0xff]  }
 0x170   : > { %v915_v32 = vsel %vm873_vm2, %v5276_v43, %v812_v41  ;;  %5123 = vmatpush3.bf16.msra.mxu0 %v5620_v37  ;;  %v5626_v9 = vld [vmem:[%s8087_s3 + $0x228] sm:$0xff]   ;;  %v5291_v37 = vunpack.i.l.bf16 %v6108_v38 }
 0x171   : > { %950 = vst.msk [vmem:[#allocation2 + $0x32] sm:$0xff] %vm798_vm0, %v915_v32  ;;  %v792_v27 = vmax.f32 %v744_v10, 0.0  ;;  %v747_v36 = vadd.f32 %v4945_v30, %v6138_v13  ;;  %5124 = vmatprep.subr.bf16.mxu0 %v5621_v48 }
 0x173   : > { %v818_v55 = vsel %vm798_vm0, %v792_v27, -inf  ;;  %v793_v58 = vmax.f32 %v747_v36, 0.0  ;;  %v4946_v61 = vpop.f32.mrb[56].mxu0  ;;  %v5627_v36 = vld [vmem:[%s8087_s3 + $0x270] sm:$0xff]  }
 0x174   : > { %v819_v44 = vmax.f32 %v6241_v23, %v818_v55  ;;  %v4947_v45 = vpop.f32.mrb[57].mxu0 }
 0x175   : > { %v825_v0 = vsel %vm798_vm0, %v793_v58, -inf  ;;  %v4948_v2 = vadd.f32 %v4947_v45, %v4946_v61  ;;  %v4949_v6 = vpop.f32.mrb[58].mxu0  ;;  %v5628_v58 = vld [vmem:[%s8087_s3 + $0x230] sm:$0xff]   ;;  %v5292_v45 = vunpack.i.h.bf16 %v6108_v38 }
 0x176   : > { %v916_v19 = vsel %vm873_vm2, %v5280_v42, %v819_v44  ;;  %v826_v51 = vmax.f32 %v6247_v26, %v825_v0  ;;  %v4950_v52 = vpop.f32.mrb[59].mxu0  ;;  %v6314_v53 = vld [vmem:[#allocation2 + $0x22] sm:$0xff]  ;;  %v5622_v26 = vld [vmem:[%s8087_s3 + $0x218] sm:$0xff]  }
 0x177   : > { %v6316_v23 = vld [vmem:[#allocation2 + $0x20] sm:$0xff]  ;;  %951 = vst.msk [vmem:[#allocation2 + $0x42] sm:$0xff] %vm798_vm0, %v916_v19  ;;  %v752_v54 = vadd.f32 %v4948_v2, %v6138_v13  ;;  %v4951_v56 = vadd.f32 %v4950_v52, %v4949_v6  ;;  %v5313_v1 = vpack.i.bf16 %v6314_v53, %v5976_v34  ;;  %v5286_v34 = vunpack.i.l.bf16 %v6098_v29  ;;  %5125 = vmatpush3.bf16.msra.mxu0 %v5622_v26  ;;  %v5629_v6 = vld [vmem:[%s8087_s3 + $0x278] sm:$0xff]  }
 0x178   : > { %v5318_v33 = vpack.i.bf16 %v6316_v23, %v5951_v16  ;;  %v917_v28 = vsel %vm873_vm2, %v5281_v49, %v826_v51  ;;  %v1223_v3 = vld [vmem:[#allocation2 + $0x24] sm:$0xff]  ;;  %v6329_v4 = vld [vmem:[#allocation2 + $0x33] sm:$0xff] }
 0x179   : > { %952 = vst.msk [vmem:[#allocation2 + $0x52] sm:$0xff] %vm798_vm0, %v917_v28  ;;  %v794_v63 = vmax.f32 %v752_v54, 0.0  ;;  %v755_v5 = vadd.f32 %v4951_v56, %v6138_v13  ;;  %5314 = vrot.lane.b32.xlu0 %v5313_v1, %s5762_s18  ;;  %v5623_v16 = vld [vmem:[%s8087_s3 + $0x260] sm:$0xff]   ;;  %v5323_v18 = vpack.i.bf16 %v1223_v3, %v5991_v46  ;;  %v6350_v31 = vld [vmem:[#allocation2 + $0x31] sm:$0xff] }
 0x17a   : > { %5319 = vrot.lane.b32.xlu1 %v5318_v33, %s5762_s18  ;;  %v6339_v11 = vld [vmem:[#allocation2 + $0x23] sm:$0xff]  ;;  %5126 = vmatprep.subr.bf16.mxu0 %v5623_v16  ;;  %v6379_v55 = vld [vmem:[#allocation2 + $0x32] sm:$0xff] }
 0x17b   : > { %v832_v15 = vsel %vm798_vm0, %v794_v63, -inf  ;;  %v795_v50 = vmax.f32 %v755_v5, 0.0  ;;  %v4952_v17 = vpop.f32.mrb[60].mxu0  ;;  %v5328_v8 = vpack.i.bf16 %v6329_v4, %v6339_v11  ;;  %v1286_v43 = vld [vmem:[#allocation2 + $0x21] sm:$0xff]  ;;  %5127 = vmatpush3.bf16.msra.mxu0 %v5624_v14  ;;  %v5630_v19 = vld [vmem:[%s8087_s3 + $0x238] sm:$0xff]   ;;  %v5635_v14 = vld [vmem:[%s8087_s3 + $0xd0] sm:$0xff]  }
 0x17c   : > { %v833_v59 = vmax.f32 %v6252_v40, %v832_v15  ;;  %v4953_v21 = vpop.f32.mrb[61].mxu0  ;;  %v5338_v30 = vpack.i.bf16 %v6350_v31, %v1286_v43  ;;  %5128 = vmatprep.subr.bf16.mxu0 %v5625_v35  ;;  %v1543_v52 = vld [vmem:[#allocation2 + $0x34] sm:$0xff]  ;;  %v5631_v1 = vld [vmem:[%s8087_s3 + $0xc0] sm:$0xff]   ;;  %v5633_v63 = vld [vmem:[%s8087_s3 + $0xc8] sm:$0xff]  }
 0x17d   : > { %v839_v39 = vsel %vm798_vm0, %v795_v50, -inf  ;;  %v4954_v24 = vadd.f32 %v4953_v21, %v4952_v17  ;;  %v4955_v41 = vpop.f32.mrb[62].mxu0  ;;  %5329 = vrot.lane.b32.xlu0 %v5328_v8, %s5762_s18  ;;  %v5632_v33 = vld [vmem:[%s8087_s3 + $0x80] sm:$0xff]   ;;  %4998 = vmatprep.subr.bf16.mxu1 %v5631_v1  ;;  %v5634_v16 = vld [vmem:[%s8087_s3 + $0x88] sm:$0xff]   ;;  %v5636_v15 = vld [vmem:[%s8087_s3 + $0x90] sm:$0xff]  }
 0x17e   : > { %5324 = vrot.lane.b32.xlu1 %v5323_v18, %s5762_s18  ;;  %v840_v46 = vmax.f32 %v6261_v22, %v839_v39  ;;  %v918_v29 = vsel %vm873_vm2, %v5286_v34, %v833_v59  ;;  %v4956_v40 = vpop.f32.mrb[63].mxu0  ;;  %v6369_v32 = vld [vmem:[#allocation2 + $0x42] sm:$0xff]  ;;  %4999 = vmatpush3.bf16.msra.mxu1 %v5632_v33  ;;  %v5637_v17 = vld [vmem:[%s8087_s3 + $0xd8] sm:$0xff]  }
 0x17f   : > { %953 = vst.msk [vmem:[#allocation2 + $0x62] sm:$0xff] %vm798_vm0, %v918_v29  ;;  %v760_v47 = vadd.f32 %v4954_v24, %v6138_v13  ;;  %v4957_v10 = vadd.f32 %v4956_v40, %v4955_v41  ;;  %5129 = vmatpush3.bf16.msra.mxu0 %v5626_v9  ;;  %v5348_v42 = vpack.i.bf16 %v6369_v32, %v6379_v55  ;;  %v6389_v0 = vld [vmem:[#allocation2 + $0x40] sm:$0xff]  ;;  %v5638_v18 = vld [vmem:[%s8087_s3 + $0x98] sm:$0xff]   ;;  %v5642_v29 = vld [vmem:[%s8087_s3 + $0xa8] sm:$0xff]  }
 0x180   : > { %v919_v22 = vsel %vm873_vm2, %v5287_v20, %v840_v46  ;;  %5130 = vmatprep.subr.bf16.mxu0 %v5627_v36  ;;  %v6413_v56 = vld [vmem:[#allocation2 + $0x53] sm:$0xff]  ;;  %v6423_v26 = vld [vmem:[#allocation2 + $0x43] sm:$0xff]  ;;  %5000 = vmatprep.subr.bf16.mxu1 %v5633_v63 }
 0x181   : > { %954 = vst.msk [vmem:[#allocation2 + $0x72] sm:$0xff] %vm798_vm0, %v919_v22  ;;  %v796_v7 = vmax.f32 %v760_v47, 0.0  ;;  %v763_v27 = vadd.f32 %v4957_v10, %v6138_v13  ;;  %5339 = vrot.lane.b32.xlu0 %v5338_v30, %s5762_s18  ;;  %v5378_v28 = vpack.i.bf16 %v6413_v56, %v6423_v26  ;;  %v6427_v3 = vld [vmem:[#allocation2 + $0x51] sm:$0xff]  ;;  %v6434_v5 = vld [vmem:[#allocation2 + $0x41] sm:$0xff] }
 0x182   : > { %5334 = vrot.lane.b32.xlu1 %v5338_v30, %s5762_s18  ;;  %v5388_v34 = vpack.i.bf16 %v6427_v3, %v6434_v5  ;;  %5001 = vmatpush3.bf16.msra.mxu1 %v5634_v16  ;;  %v5639_v21 = vld [vmem:[%s8087_s3 + $0xe0] sm:$0xff]   ;;  %v6473_v39 = vld [vmem:[#allocation2 + $0x50] sm:$0xff]  ;;  %v5641_v46 = vld [vmem:[%s8087_s3 + $0xe8] sm:$0xff]  }
 0x183   : > { %v846_v61 = vsel %vm798_vm0, %v796_v7, -inf  ;;  %v797_v13 = vmax.f32 %v763_v27, 0.0  ;;  %5131 = vmatpush3.bf16.msra.mxu0 %v5628_v58  ;;  %5002 = vmatprep.subr.bf16.mxu1 %v5635_v14  ;;  %v5640_v35 = vld [vmem:[%s8087_s3 + $0xa0] sm:$0xff]   ;;  %v6485_v40 = vld [vmem:[#allocation2 + $0x54] sm:$0xff]  ;;  %v6511_v58 = vpop.permute.xlu0 %5304 }
 0x184   : > { %v847_v44 = vmax.f32 %v6266_v62, %v846_v61  ;;  %v6400_v62 = vld [vmem:[#allocation2 + $0x30] sm:$0xff]  ;;  %5132 = vmatprep.subr.bf16.mxu0 %v5629_v6  ;;  %v5645_v27 = vld [vmem:[%s8087_s3 + $0xf8] sm:$0xff]  }
 0x185   : > { %v853_v2 = vsel %vm798_vm0, %v797_v13, -inf  ;;  %5349 = vrot.lane.b32.xlu0 %v5348_v42, %s5762_s18  ;;  %v5363_v38 = vpack.i.bf16 %v6389_v0, %v6400_v62  ;;  %v5643_v47 = vld [vmem:[%s8087_s3 + $0xf0] sm:$0xff]   ;;  %v5646_v36 = vld [vmem:[%s8087_s3 + $0xb8] sm:$0xff]   ;;  %v6515_v13 = vpop.permute.xlu1 %5309 }
 0x186   : > { %5344 = vrot.lane.b32.xlu1 %v5328_v8, %s5762_s18  ;;  %v854_v48 = vmax.f32 %v6269_v25, %v853_v2  ;;  %v920_v49 = vsel %vm873_vm2, %v5291_v37, %v847_v44  ;;  %v1544_v25 = vld [vmem:[#allocation2 + $0x44] sm:$0xff]  ;;  %5003 = vmatpush3.bf16.msra.mxu1 %v5636_v15  ;;  %v6459_v8 = vld [vmem:[#allocation2 + $0x52] sm:$0xff] }
 0x187   : > { %955 = vst.msk [vmem:[#allocation2 + $0x82] sm:$0xff] %vm798_vm0, %v920_v49  ;;  %5133 = vmatpush3.bf16.msra.mxu0 %v5630_v19  ;;  %v5368_v54 = vpack.i.bf16 %v1544_v25, %v1543_v52  ;;  %v6449_v50 = vld [vmem:[#allocation2 + $0x62] sm:$0xff]  ;;  %5004 = vmatprep.subr.bf16.mxu1 %v5637_v17  ;;  %v5644_v10 = vld [vmem:[%s8087_s3 + $0xb0] sm:$0xff]   ;;  %v6522_v44 = vpop.xlane.xlu0 %3136 }
 0x188   : > { %v921_v51 = vsel %vm873_vm2, %v5292_v45, %v854_v48  ;;  %v5408_v59 = vpack.i.bf16 %v6449_v50, %v6459_v8  ;;  %v6463_v20 = vld [vmem:[#allocation2 + $0x60] sm:$0xff]  ;;  %v1036_v9 = vld [vmem:[#allocation2 + $0x73] sm:$0xff]  ;;  %vm4596_vm2 = vcmask 516096  }
 0x189   : > { %956 = vst.msk [vmem:[#allocation2 + $0x92] sm:$0xff] %vm798_vm0, %v921_v51  ;;  %5364 = vrot.lane.b32.xlu0 %v5363_v38, %s5762_s18  ;;  %v5423_v24 = vpack.i.bf16 %v6463_v20, %v6473_v39  ;;  %v1546_v41 = vld [vmem:[#allocation2 + $0x64] sm:$0xff]  ;;  %v6499_v7 = vld [vmem:[#allocation2 + $0x71] sm:$0xff]  ;;  %v6526_v2 = vpop.xlane.xlu1 %3139 }
 0x18a   : > { %5354 = vrot.lane.b32.xlu1 %v5363_v38, %s5762_s18  ;;  %5005 = vmatpush3.bf16.msra.mxu1 %v5638_v18  ;;  %v5428_v43 = vpack.i.bf16 %v1546_v41, %v6485_v40  ;;  %v6496_v30 = vld [vmem:[#allocation2 + $0x63] sm:$0xff]  ;;  %v6528_v6 = vld [vmem:[#allocation2 + $0x72] sm:$0xff] }
 0x18b   : > { %5006 = vmatprep.subr.bf16.mxu1 %v5639_v21  ;;  %v5438_v22 = vpack.i.bf16 %v1036_v9, %v6496_v30  ;;  %v6509_v37 = vld [vmem:[#allocation2 + $0x61] sm:$0xff]  ;;  %v6533_v38 = vpop.xlane.xlu0 %3192  ;;  %v6535_v19 = vld [vmem:[#allocation2 + $0x70] sm:$0xff] }
 0x18c   : > { %v5448_v61 = vpack.i.bf16 %v6499_v7, %v6509_v37  ;;  %v4826_v16 = vld [vmem:[%s8089_s5 + $0x14] ss:$0 sm:$0xff] }
 0x18d   : > { %5369 = vrot.lane.b32.xlu0 %v5368_v54, %s5762_s18  ;;  %v6538_v25 = vpop.xlane.xlu1 %3189 }
 0x18e   : > { %5359 = vrot.lane.b32.xlu1 %v5368_v54, %s5762_s18  ;;  %5007 = vmatpush3.bf16.msra.mxu1 %v5640_v35  ;;  %v1165_v45 = vld [vmem:[#allocation2 + $0x82] sm:$0xff] }
 0x18f   : > { %5008 = vmatprep.subr.bf16.mxu1 %v5641_v46  ;;  %v5468_v48 = vpack.i.bf16 %v1165_v45, %v6528_v6  ;;  %v1101_v49 = vld [vmem:[#allocation2 + $0x80] sm:$0xff]  ;;  %v6541_v52 = vpop.xlane.xlu0 %3245 }
 0x190   : > { %v5473_v51 = vpack.i.bf16 %v1101_v49, %v6535_v19  ;;  %v5703_v35 = vld [vmem:[#allocation2 + $0xa0] sm:$0xff]  ;;  %v1357_v60 = vld [vmem:[#allocation2 + $0x93] sm:$0xff] }
 0x191   : > { %5379 = vrot.lane.b32.xlu0 %v5378_v28, %s5762_s18  ;;  %v6543_v54 = vpop.xlane.xlu1 %3242  ;;  %v1548_v45 = vld [vmem:[#allocation2 + $0x84] sm:$0xff] }
 0x192   : > { %5374 = vrot.lane.b32.xlu1 %v5348_v42, %s5762_s18  ;;  %5009 = vmatpush3.bf16.msra.mxu1 %v5642_v29  ;;  %v5647_v42 = vld [vmem:[%s8087_s3 + $0x140] sm:$0xff]  }
 0x193   : > { %5010 = vmatprep.subr.bf16.mxu1 %v5643_v47  ;;  %v6545_v1 = vpop.xlane.xlu0 %3298 }
 0x195   : > { %5389 = vrot.lane.b32.xlu0 %v5388_v34, %s5762_s18  ;;  %v6547_v33 = vpop.xlane.xlu1 %3295 }
 0x196   : > { %5384 = vrot.lane.b32.xlu1 %v5388_v34, %s5762_s18  ;;  %5011 = vmatpush3.bf16.msra.mxu1 %v5644_v10  ;;  %v4974_v10 = vpop.f32.mrb[0].mxu1 }
 0x197   : > { %5012 = vmatprep.subr.bf16.mxu1 %v5645_v27 }
 0x199   : > { %5399 = vrot.lane.b32.xlu0 %v5378_v28, %s5762_s18  ;;  %v6551_v63 = vpop.xlane.xlu1 %3348 }
 0x19a   : > { %5394 = vrot.lane.b32.xlu1 %v5378_v28, %s5762_s18  ;;  %5013 = vmatpush3.bf16.msra.mxu1 %v5646_v36  ;;  %v6549_v28 = vpop.xlane.xlu0 %3351 }
 0x19b   : > { %5038 = vmatprep.subr.bf16.mxu1 %v5647_v42  ;;  %8097 = vst [vmem:[#allocation6_spill] sm:$0xff] %v6549_v28 }
 0x19d   : > { %5409 = vrot.lane.b32.xlu0 %v5408_v59, %s5762_s18  ;;  %v6558_v17 = vpop.xlane.xlu1 %3401 }
 0x19e   : > { %5404 = vrot.lane.b32.xlu1 %v5388_v34, %s5762_s18  ;;  %v4182_v34 = vld [vmem:[#allocation2 + $0xb0] sm:$0xff]  ;;  %v6556_v15 = vpop.xlane.xlu0 %3952 }
 0x19f   : > { %v4194_v14 = vmul.f32 %v4826_v16, %v4182_v34  ;;  %8098 = vst [vmem:[#allocation7_spill] sm:$0xff] %v6556_v15 }
 0x1a1   : > { %5424 = vrot.lane.b32.xlu0 %v5423_v24, %s5762_s18  ;;  %v4216_v18 = vsel %vm798_vm0, %v4194_v14, 0.0  ;;  %v6563_v21 = vpop.xlane.xlu1 %3454  ;;  %v6587_v14 = vld [vmem:[#allocation2 + $0x74] sm:$0xff] }
 0x1a2   : > { %5414 = vrot.lane.b32.xlu1 %v5423_v24, %s5762_s18  ;;  %8100 = vst [vmem:[#allocation9_spill] sm:$0xff] %v6563_v21  ;;  %v4193_v24 = vmul.f32 %v5703_v35, %v4826_v16  ;;  %v1293_v35 = vld [vmem:[#allocation2 + $0x91] sm:$0xff] }
 0x1a4   : > { %v4213_v46 = vsel %vm798_vm0, %v4193_v24, 0.0 }
 0x1a5   : > { %5429 = vrot.lane.b32.xlu0 %v5428_v43, %s5762_s18  ;;  %v6568_v29 = vpop.xlane.xlu1 %3507 }
 0x1a6   : > { %5419 = vrot.lane.b32.xlu1 %v5428_v43, %s5762_s18  ;;  %8102 = vst [vmem:[#allocation11_spill] sm:$0xff] %v6568_v29 }
 0x1a9   : > { %5439 = vrot.lane.b32.xlu0 %v5438_v22, %s5762_s18  ;;  %v6572_v9 = vpop.xlane.xlu1 %3560 }
 0x1aa   : > { %5434 = vrot.lane.b32.xlu1 %v5408_v59, %s5762_s18  ;;  %v6561_v59 = vpop.xlane.xlu0 %4005  ;;  %8104 = vst [vmem:[#allocation13_spill] sm:$0xff] %v6572_v9 }
 0x1ab   : > { %8099 = vst [vmem:[#allocation8_spill] sm:$0xff] %v6561_v59 }
 0x1ad   : > { %5449 = vrot.lane.b32.xlu0 %v5448_v61, %s5762_s18  ;;  %v6576_v27 = vpop.xlane.xlu1 %3613 }
 0x1ae   : > { %5444 = vrot.lane.b32.xlu1 %v5448_v61, %s5762_s18  ;;  %v6565_v41 = vpop.xlane.xlu0 %4058  ;;  %8106 = vst [vmem:[#allocation15_spill] sm:$0xff] %v6576_v27 }
 0x1af   : > { %8101 = vst [vmem:[#allocation10_spill] sm:$0xff] %v6565_v41 }
 0x1b1   : > { %5459 = vrot.lane.b32.xlu0 %v5438_v22, %s5762_s18 }
 0x1b2   : > { %5454 = vrot.lane.b32.xlu1 %v5438_v22, %s5762_s18  ;;  %v6570_v43 = vpop.xlane.xlu0 %4111  ;;  %v4975_v22 = vpop.f32.mrb[1].mxu1 }
 0x1b3   : > { %8103 = vst [vmem:[#allocation12_spill] sm:$0xff] %v6570_v43  ;;  %v6578_v36 = vadd.f32 %v4975_v22, %v4974_v10  ;;  %v6594_v10 = vld [vmem:[#allocation2 + $0x81] sm:$0xff] }
 0x1b5   : > { %5469 = vrot.lane.b32.xlu0 %v5468_v48, %s5762_s18 }
 0x1b6   : > { %5464 = vrot.lane.b32.xlu1 %v5448_v61, %s5762_s18  ;;  %v6574_v47 = vpop.xlane.xlu0 %4164  ;;  %v4977_v61 = vpop.f32.mrb[2].mxu1 }
 0x1b7   : > { %8105 = vst [vmem:[#allocation14_spill] sm:$0xff] %v6574_v47  ;;  %v4978_v42 = vpop.f32.mrb[3].mxu1 }
 0x1b8   : > { %v6580_v49 = vadd.f32 %v4978_v42, %v4977_v61  ;;  %v6597_v61 = vpack.i.bf16 %v1293_v35, %v6594_v10  ;;  %v6599_v42 = vld [vmem:[#allocation2 + $0x90] sm:$0xff]  ;;  %v6610_v35 = vld [vmem:[#allocation2 + $0x83] sm:$0xff] }
 0x1b9   : > { %v5503_v59 = vpack.i.bf16 %v1422_v57, %v6599_v42  ;;  %v6614_v15 = vpack.i.bf16 %v1357_v60, %v6610_v35 }
 0x1ba   : > { %5474 = vrot.lane.b32.xlu1 %v5473_v51, %s5762_s18 }
 0x1d4   : > { %4217 = vadd.xlane.f32.xlu0 %v4216_v18  ;;  %v5488_v18 = vpack.i.bf16 %v1548_v45, %v6587_v14 }
 0x1de   : > { %4214 = vadd.xlane.f32.xlu1 %v4213_v46 }
 0x1ea   : > { %5484 = vrot.lane.b32.xlu0 %v5473_v51, %s5762_s18 }
 0x1eb   : > { %v6583_v16 = vpop.permute.xlu0 %5314 }
 0x1ec   : > { %v6585_v34 = vpop.permute.xlu1 %5319 }
 0x1ee   : > { %5489 = vrot.lane.b32.xlu0 %v5488_v18, %s5762_s18 }
 0x1ef   : > { %5479 = vrot.lane.b32.xlu1 %v5488_v18, %s5762_s18  ;;  %v5330_v46 = vpop.permute.xlu0 %5329 }
 0x1f0   : > { %v6592_v24 = vpop.permute.xlu1 %5324  ;;  %v5332_v22 = vunpack.i.h.bf16 %v5330_v46  ;;  %v5331_v51 = vunpack.i.l.bf16 %v5330_v46 }
 0x1f2   : > { %5499 = vrot.lane.b32.xlu0 %v6597_v61, %s5762_s18  ;;  %v1071_v45 = vsel %vm798_vm0, %v6314_v53, %v5331_v51  ;;  %v1072_v46 = vsel %vm798_vm0, %v6379_v55, %v5332_v22 }
 0x1f3   : > { %5494 = vrot.lane.b32.xlu1 %v5468_v48, %s5762_s18  ;;  %v6606_v18 = vpop.permute.xlu0 %5339  ;;  %v1078_v12 = vpack.c.bf16 %v1072_v46, %v1071_v45 }
 0x1f4   : > { %v5335_v47 = vpop.permute.xlu1 %5334 }
 0x1f5   : > { %v5337_v43 = vunpack.i.h.bf16 %v5335_v47  ;;  %v5336_v41 = vunpack.i.l.bf16 %v5335_v47  ;;  %2683 = vmatprep.mubr.bf16.mxu1 %v1078_v12 }
 0x1f6   : > { %5504 = vrot.lane.b32.xlu0 %v5503_v59, %s5762_s18 }
 0x1f7   : > { %5509 = vrot.lane.b32.xlu1 %v6614_v15, %s5762_s18  ;;  %v1007_v53 = vsel %vm798_vm0, %v6316_v23, %v5336_v41  ;;  %v1008_v55 = vsel %vm798_vm0, %v6400_v62, %v5337_v43  ;;  %v6623_v48 = vpop.permute.xlu0 %5349 }
 0x1f8   : > { %v6625_v47 = vpop.permute.xlu1 %5344  ;;  %v1014_v57 = vpack.c.bf16 %v1008_v55, %v1007_v53 }
 0x1fa   : > { %2684 = vmatmul.mubr.bf16.gmra.mrb[4].mxu1 %v1014_v57 }
 0x1fb   : > { %v6627_v60 = vpop.permute.xlu0 %5364 }
 0x1fc   : > { %v6629_v22 = vpop.permute.xlu1 %5354 }
 0x1ff   : > { %v5370_v59 = vpop.permute.xlu0 %5369 }
 0x200   : > { %v6631_v51 = vpop.permute.xlu1 %5359  ;;  %v5372_v45 = vunpack.i.h.bf16 %v5370_v59  ;;  %v5371_v46 = vunpack.i.l.bf16 %v5370_v59 }
 0x202   : > { %v1583_v23 = vsel %vm798_vm0, %v6329_v4, %v5371_v46  ;;  %v1584_v12 = vsel %vm798_vm0, %v6423_v26, %v5372_v45 }
 0x203   : > { %v5380_v62 = vpop.permute.xlu0 %5379  ;;  %v1591_v43 = vpack.c.bf16 %v1584_v12, %v1583_v23 }
 0x204   : > { %v5375_v41 = vpop.permute.xlu1 %5374  ;;  %v5382_v53 = vunpack.i.h.bf16 %v5380_v62  ;;  %v5381_v55 = vunpack.i.l.bf16 %v5380_v62 }
 0x205   : > { %v5377_v57 = vunpack.i.h.bf16 %v5375_v41  ;;  %v5376_v27 = vunpack.i.l.bf16 %v5375_v41  ;;  %2935 = vmatprep.mubr.bf16.mxu0 %v1591_v43 }
 0x206   : > { %v1073_v4 = vsel %vm798_vm0, %v6369_v32, %v5381_v55  ;;  %v1074_v26 = vsel %vm798_vm0, %v6459_v8, %v5382_v53  ;;  %v4235_v53 = vld [vmem:[#allocation2 + $0xb1] sm:$0xff] }
 0x207   : > { %v1520_v9 = vsel %vm798_vm0, %v6434_v5, %v5377_v57  ;;  %v1519_v59 = vsel %vm798_vm0, %v6350_v31, %v5376_v27  ;;  %v6645_v46 = vpop.permute.xlu0 %5389  ;;  %v1079_v12 = vpack.c.bf16 %v1074_v26, %v1073_v4 }
 0x208   : > { %v1527_v45 = vpack.c.bf16 %v1520_v9, %v1519_v59  ;;  %v5385_v23 = vpop.permute.xlu1 %5384  ;;  %v4827_v9 = vld [vmem:[%s8089_s5 + $0x15] ss:$0 sm:$0xff] }
 0x209   : > { %v5387_v62 = vunpack.i.h.bf16 %v5385_v23  ;;  %v5386_v41 = vunpack.i.l.bf16 %v5385_v23  ;;  %2691 = vmatprep.mubr.bf16.mxu1 %v1079_v12  ;;  %v4247_v55 = vmul.f32 %v4827_v9, %v4235_v53 }
 0x20a   : > { %2936 = vmatmul.mubr.bf16.vlgmr.msra.gmra.mrb[64].mxu0 %v1527_v45 }
 0x20b   : > { %v1009_v43 = vsel %vm798_vm0, %v6389_v0, %v5386_v41  ;;  %v1010_v31 = vsel %vm798_vm0, %v6473_v39, %v5387_v62  ;;  %v6651_v27 = vpop.permute.xlu0 %5399  ;;  %v4234_v0 = vld [vmem:[#allocation2 + $0xa1] sm:$0xff]  ;;  %v4269_v4 = vsel %vm798_vm0, %v4247_v55, 0.0 }
 0x20c   : > { %v6653_v32 = vpop.permute.xlu1 %5394  ;;  %v1015_v8 = vpack.c.bf16 %v1010_v31, %v1009_v43  ;;  %v4246_v45 = vmul.f32 %v4827_v9, %v4234_v0 }
 0x20e   : > { %2692 = vmatmul.mubr.bf16.gmra.mrb[8].mxu1 %v1015_v8  ;;  %v4266_v62 = vsel %vm798_vm0, %v4246_v45, 0.0  ;;  %v6677_v45 = vld [vmem:[%s8087_s3 + $0x300] sm:$0xff]  }
 0x20f   : > { %v6658_v57 = vpop.permute.xlu0 %5409  ;;  %5210 = vmatprep.subr.bf16.mxu0 %v6677_v45 }
 0x210   : > { %v6660_v59 = vpop.permute.xlu1 %5404  ;;  %5211 = vmatpush3.bf16.msra.mxu0 %v6677_v45 }
 0x213   : > { %v6663_v39 = vpop.permute.xlu0 %5424 }
 0x214   : > { %v6665_v26 = vpop.permute.xlu1 %5414 }
 0x215   : > { %4270 = vadd.xlane.f32.xlu0 %v4269_v4 }
 0x217   : > { %v5430_v23 = vpop.permute.xlu0 %5429 }
 0x218   : > { %v6667_v12 = vpop.permute.xlu1 %5419  ;;  %v5432_v41 = vunpack.i.h.bf16 %v5430_v23  ;;  %v5431_v43 = vunpack.i.l.bf16 %v5430_v23  ;;  %v5317_v23 = vunpack.i.h.bf16 %v6583_v16 }
 0x21a   : > { %v1585_v31 = vsel %vm798_vm0, %v6413_v56, %v5431_v43  ;;  %v1586_v8 = vsel %vm798_vm0, %v6496_v30, %v5432_v41  ;;  %v6684_v56 = vld [vmem:[%s8087_s3 + $0x308] sm:$0xff]  }
 0x21b   : > { %4267 = vadd.xlane.f32.xlu1 %v4266_v62  ;;  %v5440_v53 = vpop.permute.xlu0 %5439  ;;  %v1592_v29 = vpack.c.bf16 %v1586_v8, %v1585_v31  ;;  %v5316_v62 = vunpack.i.l.bf16 %v6583_v16  ;;  %v1150_v8 = vld [vmem:[#allocation2 + $0x11] sm:$0xff]  ;;  %5212 = vmatprep.subr.bf16.mxu0 %v6684_v56 }
 0x21c   : > { %v5435_v55 = vpop.permute.xlu1 %5434  ;;  %v5442_v21 = vunpack.i.h.bf16 %v5440_v53  ;;  %v5441_v9 = vunpack.i.l.bf16 %v5440_v53  ;;  %5213 = vmatpush3.bf16.msra.mxu0 %v6684_v56 }
 0x21d   : > { %v5437_v0 = vunpack.i.h.bf16 %v5435_v55  ;;  %v5436_v4 = vunpack.i.l.bf16 %v5435_v55  ;;  %2943 = vmatprep.mubr.bf16.mxu0 %v1592_v29 }
 0x21e   : > { %v1075_v30 = vsel %vm798_vm0, %v6449_v50, %v5441_v9  ;;  %v1076_v41 = vsel %vm798_vm0, %v6528_v6, %v5442_v21  ;;  %v1151_v50 = vld [vmem:[#allocation2 + $0x21] sm:$0xff] }
 0x21f   : > { %v1521_v43 = vsel %vm798_vm0, %v6427_v3, %v5436_v4  ;;  %v1522_v31 = vsel %vm798_vm0, %v6509_v37, %v5437_v0  ;;  %v1080_v16 = vpack.c.bf16 %v1076_v41, %v1075_v30  ;;  %v1198_v3 = vsel %vm798_vm0, %v1150_v8, %v5316_v62  ;;  %v6709_v62 = vld [vmem:[%s8087_s3 + $0x310] sm:$0xff]  }
 0x220   : > { %v5445_v29 = vpop.permute.xlu1 %5444  ;;  %v1528_v53 = vpack.c.bf16 %v1522_v31, %v1521_v43  ;;  %v1199_v6 = vsel %vm798_vm0, %v1151_v50, %v5317_v23  ;;  %v5322_v4 = vunpack.i.h.bf16 %v6585_v34  ;;  %v5321_v30 = vunpack.i.l.bf16 %v6585_v34  ;;  %5214 = vmatprep.subr.bf16.mxu0 %v6709_v62  ;;  %v5704_v34 = vld [vmem:[#allocation2 + $0x14] sm:$0xff]  ;;  %v5705_v31 = vld [vmem:[#allocation2 + $0x4] sm:$0xff] }
 0x221   : > { %v5447_v55 = vunpack.i.h.bf16 %v5445_v29  ;;  %v5446_v28 = vunpack.i.l.bf16 %v5445_v29  ;;  %2699 = vmatprep.mubr.bf16.mxu1 %v1080_v16  ;;  %v1206_v41 = vpack.c.bf16 %v1199_v6, %v1198_v3  ;;  %v5352_v23 = vunpack.i.h.bf16 %v6623_v48  ;;  %v1152_v29 = vld [vmem:[#allocation2 + $0x31] sm:$0xff]  ;;  %5215 = vmatpush3.bf16.msra.mxu0 %v6709_v62  ;;  %v5648_v50 = vld [vmem:[%s8087_s3 + $0x100] sm:$0xff]  }
 0x222   : > { %2944 = vmatmul.mubr.bf16.gmra.mrb[68].mxu0 %v1528_v53  ;;  %v1135_v43 = vsel %vm798_vm0, %v5704_v34, %v5322_v4  ;;  %v1134_v8 = vsel %vm798_vm0, %v5705_v31, %v5321_v30  ;;  %v6727_v53 = vld [vmem:[#allocation2 + $0xa4] sm:$0xff]  ;;  %v6735_v3 = vld [vmem:[#allocation2 + $0x94] sm:$0xff] }
 0x223   : > { %v1011_v21 = vsel %vm798_vm0, %v6463_v20, %v5446_v28  ;;  %v1012_v9 = vsel %vm798_vm0, %v6535_v19, %v5447_v55  ;;  %v5351_v20 = vunpack.i.l.bf16 %v6623_v48  ;;  %v6713_v28 = vpop.permute.xlu0 %5449  ;;  %v6719_v19 = vld [vmem:[%s8087_s3 + $0x318] sm:$0xff]   ;;  %v1201_v16 = vsel %vm798_vm0, %v6434_v5, %v5352_v23  ;;  %v6729_v55 = vld [vmem:[#allocation2 + $0xa2] sm:$0xff]  ;;  %v5651_v31 = vld [vmem:[%s8087_s3 + $0x150] sm:$0xff]  }
 0x224   : > { %v1016_v0 = vpack.c.bf16 %v1012_v9, %v1011_v21  ;;  %5216 = vmatprep.subr.bf16.mxu0 %v6719_v19  ;;  %v6737_v6 = vld [vmem:[#allocation2 + $0x92] sm:$0xff]  ;;  %v1142_v21 = vpack.c.bf16 %v1135_v43, %v1134_v8  ;;  %v5357_v5 = vunpack.i.h.bf16 %v6629_v22  ;;  %v5356_v9 = vunpack.i.l.bf16 %v6629_v22  ;;  %v5649_v30 = vld [vmem:[%s8087_s3 + $0x148] sm:$0xff]   ;;  %v6758_v23 = vpop.permute.xlu1 %5454 }
 0x225   : > { %v1200_v48 = vsel %vm798_vm0, %v1152_v29, %v5351_v20  ;;  %5217 = vmatpush3.bf16.msra.mxu0 %v6719_v19  ;;  %v5523_v22 = vpack.i.bf16 %v6727_v53, %v6735_v3  ;;  %v5528_v20 = vpack.i.bf16 %v6729_v55, %v6737_v6  ;;  %v5650_v34 = vld [vmem:[%s8087_s3 + $0x108] sm:$0xff]   ;;  %v6771_v43 = vld [vmem:[#allocation2 + $0x34] sm:$0xff] }
 0x226   : > { %2700 = vmatmul.mubr.bf16.gmra.mrb[12].mxu1 %v1016_v0  ;;  %v1207_v4 = vpack.c.bf16 %v1201_v16, %v1200_v48  ;;  %v1137_v29 = vsel %vm798_vm0, %v6771_v43, %v5357_v5  ;;  %v1154_v48 = vld [vmem:[#allocation2 + $0x51] sm:$0xff]  ;;  %v6784_v16 = vld [vmem:[%s8087_s3 + $0x328] sm:$0xff]  }
 0x227   : > { %2740 = vmatprep.mubr.bf16.mxu1 %v1206_v41  ;;  %v6745_v0 = vpop.permute.xlu0 %5459  ;;  %v5411_v41 = vunpack.i.l.bf16 %v6658_v57  ;;  %v5652_v5 = vld [vmem:[%s8087_s3 + $0x110] sm:$0xff]  }
 0x22b   : > { %5514 = vrot.lane.b32.xlu0 %v6614_v15, %s5762_s18  ;;  %v6754_v15 = vld [vmem:[%s8087_s3 + $0x320] sm:$0xff]  }
 0x22c   : > { %5519 = vrot.lane.b32.xlu1 %v6597_v61, %s5762_s18  ;;  %v5412_v61 = vunpack.i.h.bf16 %v6658_v57  ;;  %v6769_v57 = vld [vmem:[#allocation2 + $0x24] sm:$0xff]  ;;  %5218 = vmatprep.subr.bf16.mxu0 %v6754_v15 }
 0x22d   : > { %v1136_v8 = vsel %vm798_vm0, %v6769_v57, %v5356_v9  ;;  %5219 = vmatpush3.bf16.msra.mxu0 %v6754_v15  ;;  %v6794_v9 = vpop.permute.xlu1 %5464 }
 0x22e   : > { %2741 = vmatmul.mubr.bf16.vlgmr.msra.gmra.mrb[16].mxu1 %v1142_v21  ;;  %v1203_v21 = vsel %vm798_vm0, %v6509_v37, %v5412_v61  ;;  %5220 = vmatprep.subr.bf16.mxu0 %v6784_v16  ;;  %v6802_v37 = vld [vmem:[%s8087_s3 + $0x330] sm:$0xff]   ;;  %v5417_v61 = vunpack.i.h.bf16 %v6665_v26 }
 0x22f   : > { %2748 = vmatprep.mubr.bf16.mxu1 %v1207_v4  ;;  %5039 = vmatpush3.bf16.msra.mxu1 %v5648_v50  ;;  %v1202_v50 = vsel %vm798_vm0, %v1154_v48, %v5411_v41  ;;  %v5470_v4 = vpop.permute.xlu0 %5469  ;;  %v5653_v41 = vld [vmem:[%s8087_s3 + $0x158] sm:$0xff]  }
 0x230   : > { %5524 = vrot.lane.b32.xlu0 %v5523_v22, %s5762_s18  ;;  %5529 = vrot.lane.b32.xlu1 %v5528_v20, %s5762_s18  ;;  %v5416_v22 = vunpack.i.l.bf16 %v6665_v26  ;;  %v1208_v20 = vpack.c.bf16 %v1203_v21, %v1202_v50  ;;  %v5471_v48 = vunpack.i.l.bf16 %v5470_v4  ;;  %v5655_v26 = vld [vmem:[%s8087_s3 + $0x160] sm:$0xff]   ;;  %v1139_v21 = vsel %vm798_vm0, %v6485_v40, %v5417_v61  ;;  %v5657_v40 = vld [vmem:[%s8087_s3 + $0x168] sm:$0xff]   ;;  %s5771_s18 = smov 48  }
 0x231   : > { %5040 = vmatprep.subr.bf16.mxu1 %v5649_v30  ;;  %v1143_v30 = vpack.c.bf16 %v1137_v29, %v1136_v8  ;;  %5221 = vmatpush3.bf16.msra.mxu0 %v6784_v16  ;;  %v6813_v8 = vld [vmem:[%s8087_s3 + $0x338] sm:$0xff]   ;;  %v6815_v29 = vld [vmem:[#allocation2 + $0x44] sm:$0xff] }
 0x232   : > { %5222 = vmatprep.subr.bf16.mxu0 %v6802_v37  ;;  %v1138_v50 = vsel %vm798_vm0, %v6815_v29, %v5416_v22 }
 0x233   : > { %5041 = vmatpush3.bf16.msra.mxu1 %v5650_v34  ;;  %v5472_v34 = vunpack.i.h.bf16 %v5470_v4  ;;  %v5475_v4 = vpop.permute.xlu1 %5474  ;;  %v1144_v22 = vpack.c.bf16 %v1139_v21, %v1138_v50  ;;  %v1278_v21 = vld [vmem:[#allocation2 + $0x20] sm:$0xff] }
 0x234   : > { %5042 = vmatprep.subr.bf16.mxu1 %v5651_v31  ;;  %v5654_v31 = vld [vmem:[%s8087_s3 + $0x118] sm:$0xff]   ;;  %v5477_v61 = vunpack.i.h.bf16 %v5475_v4 }
 0x235   : > { %5223 = vmatpush3.bf16.msra.mxu0 %v6802_v37 }
 0x236   : > { %2749 = vmatmul.mubr.bf16.gmra.mrb[20].mxu1 %v1143_v30  ;;  %v1205_v30 = vsel %vm798_vm0, %v6594_v10, %v5472_v34  ;;  %5224 = vmatprep.subr.bf16.mxu0 %v6813_v8  ;;  %v5342_v10 = vunpack.i.h.bf16 %v6606_v18  ;;  %v5341_v34 = vunpack.i.l.bf16 %v6606_v18  ;;  %v1141_v18 = vsel %vm798_vm0, %v6587_v14, %v5477_v61 }
 0x237   : > { %2756 = vmatprep.mubr.bf16.mxu1 %v1208_v20  ;;  %5043 = vmatpush3.bf16.msra.mxu1 %v5652_v5  ;;  %v1204_v5 = vsel %vm798_vm0, %v6499_v7, %v5471_v48  ;;  %v5476_v7 = vunpack.i.l.bf16 %v5475_v4  ;;  %v5658_v48 = vld [vmem:[%s8087_s3 + $0x128] sm:$0xff]   ;;  %v1279_v4 = vld [vmem:[#allocation2 + $0x30] sm:$0xff]  ;;  %v5326_v14 = vunpack.i.l.bf16 %v6592_v24 }
 0x238   : > { %5044 = vmatprep.subr.bf16.mxu1 %v5653_v41  ;;  %v5656_v41 = vld [vmem:[%s8087_s3 + $0x120] sm:$0xff]   ;;  %v1209_v20 = vpack.c.bf16 %v1205_v30, %v1204_v5  ;;  %v1326_v5 = vsel %vm798_vm0, %v1278_v21, %v5341_v34  ;;  %v1327_v30 = vsel %vm798_vm0, %v1279_v4, %v5342_v10  ;;  %v5392_v34 = vunpack.i.h.bf16 %v6645_v46  ;;  %v1281_v21 = vld [vmem:[#allocation2 + $0x50] sm:$0xff] }
 0x239   : > { %5225 = vmatpush3.bf16.msra.mxu0 %v6813_v8  ;;  %v1334_v61 = vpack.c.bf16 %v1327_v30, %v1326_v5  ;;  %v5391_v10 = vunpack.i.l.bf16 %v6645_v46  ;;  %v5664_v5 = vld [vmem:[%s8087_s3 + $0x180] sm:$0xff]  }
 0x23a   : > { %v1329_v4 = vsel %vm798_vm0, %v1281_v21, %v5392_v34  ;;  %v1217_v34 = vld [vmem:[#allocation2 + $0x43] sm:$0xff] }
 0x23b   : > { %5045 = vmatpush3.bf16.msra.mxu1 %v5654_v31  ;;  %v6843_v31 = vld [vmem:[#allocation2 + $0x64] sm:$0xff] }
 0x23c   : > { %5046 = vmatprep.subr.bf16.mxu1 %v5655_v26  ;;  %v5659_v26 = vld [vmem:[%s8087_s3 + $0x170] sm:$0xff]   ;;  %v1140_v50 = vsel %vm798_vm0, %v6843_v31, %v5476_v7  ;;  %v5327_v7 = vunpack.i.h.bf16 %v6592_v24 }
 0x23e   : > { %2757 = vmatmul.mubr.bf16.gmra.mrb[24].mxu1 %v1144_v22  ;;  %v1145_v22 = vpack.c.bf16 %v1141_v18, %v1140_v50  ;;  %v1263_v24 = vsel %vm798_vm0, %v6339_v11, %v5327_v7  ;;  %v1280_v18 = vld [vmem:[#allocation2 + $0x40] sm:$0xff]  ;;  %v5362_v11 = vunpack.i.h.bf16 %v6631_v51  ;;  %v5452_v7 = vunpack.i.h.bf16 %v6713_v28 }
 0x23f   : > { %2764 = vmatprep.mubr.bf16.mxu1 %v1209_v20  ;;  %5047 = vmatpush3.bf16.msra.mxu1 %v5656_v41  ;;  %v5660_v41 = vld [vmem:[%s8087_s3 + $0x130] sm:$0xff]   ;;  %v1328_v46 = vsel %vm798_vm0, %v1280_v18, %v5391_v10 }
 0x240   : > { %5048 = vmatprep.subr.bf16.mxu1 %v5657_v40  ;;  %v5661_v40 = vld [vmem:[%s8087_s3 + $0x178] sm:$0xff]   ;;  %v5667_v10 = vld [vmem:[%s8087_s3 + $0x1d0] sm:$0xff]  }
 0x241   : > { %v1214_v20 = vld [vmem:[#allocation2 + $0x13] sm:$0xff] }
 0x242   : > { %v1262_v50 = vsel %vm798_vm0, %v1214_v20, %v5326_v14  ;;  %v5451_v14 = vunpack.i.l.bf16 %v6713_v28  ;;  %v1216_v20 = vld [vmem:[#allocation2 + $0x33] sm:$0xff] }
 0x243   : > { %5049 = vmatpush3.bf16.msra.mxu1 %v5658_v48  ;;  %v5662_v48 = vld [vmem:[%s8087_s3 + $0x138] sm:$0xff]   ;;  %v1270_v30 = vpack.c.bf16 %v1263_v24, %v1262_v50  ;;  %v6895_v28 = vld [vmem:[#allocation2 + $0x70] sm:$0xff] }
 0x244   : > { %5050 = vmatprep.subr.bf16.mxu1 %v5659_v26  ;;  %v5663_v26 = vld [vmem:[%s8087_s3 + $0x1c0] sm:$0xff]   ;;  %v1331_v50 = vsel %vm798_vm0, %v6895_v28, %v5452_v7  ;;  %v5668_v18 = vld [vmem:[%s8087_s3 + $0x190] sm:$0xff]  }
 0x246   : > { %2765 = vmatmul.mubr.bf16.gmra.mrb[28].mxu1 %v1145_v22  ;;  %v5361_v22 = vunpack.i.l.bf16 %v6631_v51 }
 0x247   : > { %5051 = vmatpush3.bf16.msra.mxu1 %v5660_v41  ;;  %2805 = vmatprep.mubr.bf16.mxu1 %v1334_v61  ;;  %v5665_v41 = vld [vmem:[%s8087_s3 + $0x1c8] sm:$0xff]  }
 0x248   : > { %5052 = vmatprep.subr.bf16.mxu1 %v5661_v40  ;;  %v1335_v40 = vpack.c.bf16 %v1329_v4, %v1328_v46  ;;  %v5666_v61 = vld [vmem:[%s8087_s3 + $0x188] sm:$0xff]   ;;  %v1264_v51 = vsel %vm798_vm0, %v1216_v20, %v5361_v22  ;;  %v5669_v46 = vld [vmem:[%s8087_s3 + $0x1d8] sm:$0xff]   ;;  %v5422_v4 = vunpack.i.h.bf16 %v6667_v12 }
 0x249   : > { %v1219_v22 = vld [vmem:[#allocation2 + $0x63] sm:$0xff] }
 0x24a   : > { %v5673_v20 = vld [vmem:[%s8087_s3 + $0x1e8] sm:$0xff]  }
 0x24b   : > { %5053 = vmatpush3.bf16.msra.mxu1 %v5662_v48  ;;  %v1265_v48 = vsel %vm798_vm0, %v1217_v34, %v5362_v11  ;;  %v1218_v11 = vld [vmem:[#allocation2 + $0x53] sm:$0xff]  ;;  %v5674_v34 = vld [vmem:[%s8087_s3 + $0x1a8] sm:$0xff]  }
 0x24c   : > { %5078 = vmatprep.subr.bf16.mxu1 %v5663_v26  ;;  %v6893_v26 = vld [vmem:[#allocation2 + $0x60] sm:$0xff]  ;;  %v1271_v21 = vpack.c.bf16 %v1265_v48, %v1264_v51  ;;  %v5676_v48 = vld [vmem:[%s8087_s3 + $0x1b0] sm:$0xff]  }
 0x24d   : > { %v1330_v24 = vsel %vm798_vm0, %v6893_v26, %v5451_v14  ;;  %v1267_v14 = vsel %vm798_vm0, %v1219_v22, %v5422_v4  ;;  %v5366_v22 = vunpack.i.l.bf16 %v6627_v60 }
 0x24e   : > { %2806 = vmatmul.mubr.bf16.vlgmr.msra.gmra.mrb[32].mxu1 %v1270_v30  ;;  %v1336_v30 = vpack.c.bf16 %v1331_v50, %v1330_v24  ;;  %v5677_v24 = vld [vmem:[%s8087_s3 + $0x1f8] sm:$0xff]  }
 0x24f   : > { %2813 = vmatprep.mubr.bf16.mxu1 %v1335_v40  ;;  %5079 = vmatpush3.bf16.msra.mxu1 %v5664_v5  ;;  %v5421_v5 = vunpack.i.l.bf16 %v6667_v12  ;;  %v5671_v40 = vld [vmem:[%s8087_s3 + $0x1e0] sm:$0xff]  }
 0x250   : > { %5080 = vmatprep.subr.bf16.mxu1 %v5665_v41  ;;  %v5670_v41 = vld [vmem:[%s8087_s3 + $0x198] sm:$0xff]   ;;  %v5672_v12 = vld [vmem:[%s8087_s3 + $0x1a0] sm:$0xff]  }
 0x251   : > { %v1266_v7 = vsel %vm798_vm0, %v1218_v11, %v5421_v5  ;;  %v5367_v11 = vunpack.i.h.bf16 %v6627_v60 }
 0x253   : > { %5081 = vmatpush3.bf16.msra.mxu1 %v5666_v61  ;;  %v1272_v61 = vpack.c.bf16 %v1267_v14, %v1266_v7 }
 0x254   : > { %5082 = vmatprep.subr.bf16.mxu1 %v5667_v10  ;;  %v5675_v10 = vld [vmem:[%s8087_s3 + $0x1f0] sm:$0xff]  }
 0x256   : > { %2814 = vmatmul.mubr.bf16.gmra.mrb[36].mxu1 %v1271_v21  ;;  %v5679_v21 = vld [vmem:[%s8087_s3 + $0x2c0] sm:$0xff]  }
 0x257   : > { %2821 = vmatprep.mubr.bf16.mxu1 %v1336_v30  ;;  %5083 = vmatpush3.bf16.msra.mxu1 %v5668_v18  ;;  %v5678_v18 = vld [vmem:[%s8087_s3 + $0x1b8] sm:$0xff]  }
 0x258   : > { %5084 = vmatprep.subr.bf16.mxu1 %v5669_v46 }
 0x25b   : > { %5085 = vmatpush3.bf16.msra.mxu1 %v5670_v41  ;;  %v1539_v41 = vld [vmem:[#allocation2 + $0x73] sm:$0xff] }
 0x25c   : > { %5086 = vmatprep.subr.bf16.mxu1 %v5671_v40 }
 0x25e   : > { %2822 = vmatmul.mubr.bf16.gmra.mrb[40].mxu1 %v1272_v61 }
 0x25f   : > { %5087 = vmatpush3.bf16.msra.mxu1 %v5672_v12 }
 0x260   : > { %5088 = vmatprep.subr.bf16.mxu1 %v5673_v20 }
 0x261   : > { %v6929_v51 = vpop.xlane.xlu0 %4217 }
 0x263   : > { %5089 = vmatpush3.bf16.msra.mxu1 %v5674_v34 }
 0x264   : > { %5090 = vmatprep.subr.bf16.mxu1 %v5675_v10 }
 0x265   : > { %v6937_v50 = vpop.permute.xlu0 %5484 }
 0x267   : > { %5091 = vmatpush3.bf16.msra.mxu1 %v5676_v48 }
 0x268   : > { %5092 = vmatprep.subr.bf16.mxu1 %v5677_v24  ;;  %v6952_v24 = vld [vmem:[#allocation2 + $0x80] sm:$0xff] }
 0x269   : > { %v5490_v46 = vpop.permute.xlu0 %5489 }
 0x26a   : > { %v5492_v4 = vunpack.i.h.bf16 %v5490_v46  ;;  %v5491_v5 = vunpack.i.l.bf16 %v5490_v46  ;;  %v1456_v46 = vsel %vm798_vm0, %v6771_v43, %v5367_v11  ;;  %v5426_v43 = vunpack.i.l.bf16 %v6663_v39  ;;  %v1475_v11 = vld [vmem:[#allocation2 + $0x71] sm:$0xff] }
 0x26b   : > { %v6945_v30 = vpop.xlane.xlu1 %4214  ;;  %5093 = vmatpush3.bf16.msra.mxu1 %v5678_v18 }
 0x26c   : > { %5158 = vmatprep.subr.bf16.mxu1 %v5679_v21  ;;  %v1587_v40 = vsel %vm798_vm0, %v1539_v41, %v5491_v5  ;;  %v1588_v7 = vsel %vm798_vm0, %v6610_v35, %v5492_v4  ;;  %v1455_v21 = vsel %vm798_vm0, %v6769_v57, %v5366_v22  ;;  %v5427_v57 = vunpack.i.h.bf16 %v6663_v39 }
 0x26d   : > { %v5500_v14 = vpop.permute.xlu0 %5499  ;;  %v1593_v12 = vpack.c.bf16 %v1588_v7, %v1587_v40  ;;  %v5347_v7 = vunpack.i.h.bf16 %v6625_v47  ;;  %v1457_v39 = vsel %vm798_vm0, %v6815_v29, %v5426_v43  ;;  %v5683_v43 = vld [vmem:[%s8087_s3 + $0x2d0] sm:$0xff]  }
 0x26e   : > { %v5502_v61 = vunpack.i.h.bf16 %v5500_v14  ;;  %v5501_v20 = vunpack.i.l.bf16 %v5500_v14 }
 0x26f   : > { %v5480_v34 = vpop.permute.xlu1 %5479  ;;  %2951 = vmatprep.mubr.bf16.mxu0 %v1593_v12 }
 0x270   : > { %v5482_v10 = vunpack.i.h.bf16 %v5480_v34  ;;  %v5481_v48 = vunpack.i.l.bf16 %v5480_v34  ;;  %v1332_v18 = vsel %vm798_vm0, %v6952_v24, %v5501_v20  ;;  %v1333_v60 = vsel %vm798_vm0, %v6599_v42, %v5502_v61 }
 0x271   : > { %v1337_v4 = vpack.c.bf16 %v1333_v60, %v1332_v18  ;;  %v5346_v20 = vunpack.i.l.bf16 %v6625_v47  ;;  %v1463_v61 = vpack.c.bf16 %v1456_v46, %v1455_v21  ;;  %v5707_v18 = vld [vmem:[#allocation2 + $0x22] sm:$0xff]  ;;  %v6973_v21 = vld [vmem:[#allocation2 + $0x54] sm:$0xff] }
 0x272   : > { %v1268_v5 = vsel %vm798_vm0, %v1539_v41, %v5481_v48  ;;  %v1269_v40 = vsel %vm798_vm0, %v6610_v35, %v5482_v10  ;;  %v1476_v41 = vld [vmem:[#allocation2 + $0x81] sm:$0xff]  ;;  %v5706_v48 = vld [vmem:[#allocation2 + $0x32] sm:$0xff]  ;;  %v1458_v46 = vsel %vm798_vm0, %v6973_v21, %v5427_v57 }
 0x273   : > { %v5495_v14 = vpop.permute.xlu1 %5494  ;;  %v1273_v12 = vpack.c.bf16 %v1269_v40, %v1268_v5  ;;  %2829 = vmatprep.mubr.bf16.mxu1 %v1337_v4  ;;  %v1391_v47 = vsel %vm798_vm0, %v5706_v48, %v5347_v7  ;;  %v1390_v60 = vsel %vm798_vm0, %v5707_v18, %v5346_v20  ;;  %v5680_v4 = vld [vmem:[%s8087_s3 + $0x280] sm:$0xff]   ;;  %v5681_v40 = vld [vmem:[%s8087_s3 + $0x2c8] sm:$0xff]   ;;  %v5397_v7 = vunpack.i.h.bf16 %v6653_v32  ;;  %v1345_v57 = vld [vmem:[#allocation2 + $0x52] sm:$0xff] }
 0x274   : > { %v5497_v34 = vunpack.i.h.bf16 %v5495_v14  ;;  %v5496_v42 = vunpack.i.l.bf16 %v5495_v14  ;;  %v1398_v5 = vpack.c.bf16 %v1391_v47, %v1390_v60  ;;  %v5396_v14 = vunpack.i.l.bf16 %v6653_v32  ;;  %v5685_v47 = vld [vmem:[%s8087_s3 + $0x2d8] sm:$0xff]  }
 0x275   : > { %2830 = vmatmul.mubr.bf16.gmra.mrb[44].mxu1 %v1273_v12  ;;  %v1464_v12 = vpack.c.bf16 %v1458_v46, %v1457_v39  ;;  %v5487_v20 = vunpack.i.h.bf16 %v6937_v50  ;;  %v5457_v18 = vunpack.i.h.bf16 %v6758_v23  ;;  %v5456_v60 = vunpack.i.l.bf16 %v6758_v23 }
 0x276   : > { %2870 = vmatprep.mubr.bf16.mxu1 %v1463_v61  ;;  %v1523_v35 = vsel %vm798_vm0, %v1475_v11, %v5496_v42  ;;  %v1524_v22 = vsel %vm798_vm0, %v1476_v41, %v5497_v34  ;;  %v5486_v34 = vunpack.i.l.bf16 %v6937_v50  ;;  %v5682_v42 = vld [vmem:[%s8087_s3 + $0x288] sm:$0xff]   ;;  %v1393_v11 = vsel %vm798_vm0, %v1345_v57, %v5397_v7  ;;  %v6997_v41 = vld [vmem:[#allocation2 + $0x74] sm:$0xff] }
 0x277   : > { %v1529_v10 = vpack.c.bf16 %v1524_v22, %v1523_v35  ;;  %v1344_v61 = vld [vmem:[#allocation2 + $0x42] sm:$0xff]  ;;  %v1460_v35 = vsel %vm798_vm0, %v6997_v41, %v5487_v20  ;;  %v5505_v22 = vpop.permute.xlu0 %5504  ;;  %v1347_v7 = vld [vmem:[#allocation2 + $0x72] sm:$0xff] }
 0x278   : > { %v1392_v32 = vsel %vm798_vm0, %v1344_v61, %v5396_v14  ;;  %v1459_v50 = vsel %vm798_vm0, %v6843_v31, %v5486_v34  ;;  %v5507_v46 = vunpack.i.h.bf16 %v5505_v22  ;;  %v5687_v14 = vld [vmem:[%s8087_s3 + $0x2e0] sm:$0xff]   ;;  %v1395_v23 = vsel %vm798_vm0, %v1347_v7, %v5457_v18  ;;  %v5510_v34 = vpop.permute.xlu1 %5509  ;;  %v5690_v18 = vld [vmem:[%s8087_s3 + $0x2a8] sm:$0xff]  }
 0x279   : > { %2952 = vmatmul.mubr.bf16.gmra.mrb[72].mxu0 %v1529_v10  ;;  %v5684_v10 = vld [vmem:[%s8087_s3 + $0x290] sm:$0xff]   ;;  %v1399_v48 = vpack.c.bf16 %v1393_v11, %v1392_v32  ;;  %v1465_v39 = vpack.c.bf16 %v1460_v35, %v1459_v50  ;;  %v7019_v20 = vld [vmem:[#allocation2 + $0x84] sm:$0xff]  ;;  %v5512_v35 = vunpack.i.h.bf16 %v5510_v34 }
 0x27a   : > { %v5688_v32 = vld [vmem:[%s8087_s3 + $0x2a0] sm:$0xff]   ;;  %v5689_v50 = vld [vmem:[%s8087_s3 + $0x2e8] sm:$0xff]  }
 0x27d   : > { %2871 = vmatmul.mubr.bf16.vlgmr.msra.gmra.mrb[48].mxu1 %v1398_v5  ;;  %v5686_v5 = vld [vmem:[%s8087_s3 + $0x298] sm:$0xff]  }
 0x27e   : > { %2878 = vmatprep.mubr.bf16.mxu1 %v1464_v12  ;;  %5159 = vmatpush3.bf16.msra.mxu1 %v5680_v4  ;;  %v5506_v4 = vunpack.i.l.bf16 %v5505_v22  ;;  %v5511_v22 = vunpack.i.l.bf16 %v5510_v34  ;;  %v5407_v34 = vunpack.i.h.bf16 %v6660_v59 }
 0x27f   : > { %5160 = vmatprep.subr.bf16.mxu1 %v5681_v40  ;;  %v1346_v40 = vld [vmem:[#allocation2 + $0x62] sm:$0xff] }
 0x280   : > { %v1394_v12 = vsel %vm798_vm0, %v1346_v40, %v5456_v60  ;;  %v1348_v60 = vld [vmem:[#allocation2 + $0x82] sm:$0xff] }
 0x281   : > { %v1400_v11 = vpack.c.bf16 %v1395_v23, %v1394_v12  ;;  %v5693_v23 = vld [vmem:[%s8087_s3 + $0x2f8] sm:$0xff]  }
 0x282   : > { %5161 = vmatpush3.bf16.msra.mxu1 %v5682_v42  ;;  %v1461_v42 = vsel %vm798_vm0, %v7019_v20, %v5506_v4  ;;  %v1397_v4 = vsel %vm798_vm0, %v6737_v6, %v5512_v35  ;;  %v5709_v35 = vld [vmem:[#allocation2 + $0x40] sm:$0xff] }
 0x283   : > { %5162 = vmatprep.subr.bf16.mxu1 %v5683_v43  ;;  %v1462_v43 = vsel %vm798_vm0, %v6735_v3, %v5507_v46  ;;  %v1396_v46 = vsel %vm798_vm0, %v1348_v60, %v5511_v22 }
 0x284   : > { %v1401_v12 = vpack.c.bf16 %v1397_v4, %v1396_v46 }
 0x285   : > { %2879 = vmatmul.mubr.bf16.gmra.mrb[52].mxu1 %v1399_v48  ;;  %v5402_v48 = vunpack.i.h.bf16 %v6651_v27 }
 0x286   : > { %2886 = vmatprep.mubr.bf16.mxu1 %v1465_v39  ;;  %5163 = vmatpush3.bf16.msra.mxu1 %v5684_v10  ;;  %v1466_v10 = vpack.c.bf16 %v1462_v43, %v1461_v42  ;;  %v5691_v39 = vld [vmem:[%s8087_s3 + $0x2f0] sm:$0xff]   ;;  %v5406_v42 = vunpack.i.l.bf16 %v6660_v59 }
 0x287   : > { %5164 = vmatprep.subr.bf16.mxu1 %v5685_v47  ;;  %v5401_v47 = vunpack.i.l.bf16 %v6651_v27 }
 0x288   : > { %v1648_v22 = vsel %vm798_vm0, %v5709_v35, %v5406_v42 }
 0x289   : > { %v1712_v27 = vsel %vm798_vm0, %v1344_v61, %v5401_v47  ;;  %v5462_v61 = vunpack.i.h.bf16 %v6745_v0  ;;  %v5466_v47 = vunpack.i.l.bf16 %v6794_v9 }
 0x28a   : > { %5165 = vmatpush3.bf16.msra.mxu1 %v5686_v5  ;;  %v1713_v5 = vsel %vm798_vm0, %v1345_v57, %v5402_v48  ;;  %v5461_v57 = vunpack.i.l.bf16 %v6745_v0  ;;  %v5467_v48 = vunpack.i.h.bf16 %v6794_v9 }
 0x28b   : > { %5166 = vmatprep.subr.bf16.mxu1 %v5687_v14  ;;  %v5692_v14 = vld [vmem:[%s8087_s3 + $0x2b0] sm:$0xff]   ;;  %v1720_v43 = vpack.c.bf16 %v1713_v5, %v1712_v27 }
 0x28c   : > { %v1714_v59 = vsel %vm798_vm0, %v1346_v40, %v5461_v57  ;;  %v1650_v40 = vsel %vm798_vm0, %v6893_v26, %v5466_v47  ;;  %v5307_v26 = vunpack.i.h.bf16 %v6511_v58  ;;  %v5311_v47 = vunpack.i.l.bf16 %v6515_v13 }
 0x28d   : > { %2887 = vmatmul.mubr.bf16.gmra.mrb[56].mxu1 %v1400_v11  ;;  %v5708_v11 = vld [vmem:[#allocation2 + $0x50] sm:$0xff] }
 0x28e   : > { %2894 = vmatprep.mubr.bf16.mxu1 %v1466_v10  ;;  %5167 = vmatpush3.bf16.msra.mxu1 %v5688_v32  ;;  %v5694_v32 = vld [vmem:[%s8087_s3 + $0x2b8] sm:$0xff]   ;;  %v1715_v10 = vsel %vm798_vm0, %v1347_v7, %v5462_v61  ;;  %v1651_v7 = vsel %vm798_vm0, %v6895_v28, %v5467_v48  ;;  %v5306_v28 = vunpack.i.l.bf16 %v6511_v58  ;;  %v1478_v48 = vld [vmem:[#allocation2 + $0xa1] sm:$0xff] }
 0x28f   : > { %5168 = vmatprep.subr.bf16.mxu1 %v5689_v50  ;;  %v1649_v50 = vsel %vm798_vm0, %v5708_v11, %v5407_v34  ;;  %v1657_v46 = vpack.c.bf16 %v1651_v7, %v1650_v40  ;;  %v1541_v58 = vld [vmem:[#allocation2 + $0x93] sm:$0xff]  ;;  %v1606_v7 = vld [vmem:[#allocation2 + $0xa0] sm:$0xff] }
 0x290   : > { %v1656_v0 = vpack.c.bf16 %v1649_v50, %v1648_v22 }
 0x292   : > { %5169 = vmatpush3.bf16.msra.mxu1 %v5690_v18  ;;  %v1721_v18 = vpack.c.bf16 %v1715_v10, %v1714_v59  ;;  %v5312_v59 = vunpack.i.h.bf16 %v6515_v13 }
 0x293   : > { %5170 = vmatprep.subr.bf16.mxu1 %v5691_v39 }
 0x295   : > { %2895 = vmatmul.mubr.bf16.gmra.mrb[60].mxu1 %v1401_v12  ;;  %v1542_v12 = vld [vmem:[#allocation2 + $0xa3] sm:$0xff] }
 0x296   : > { %5171 = vmatpush3.bf16.msra.mxu1 %v5692_v14  ;;  %3000 = vmatprep.mubr.bf16.mxu1 %v1720_v43 }
 0x297   : > { %5172 = vmatprep.subr.bf16.mxu1 %v5693_v23  ;;  %v1671_v23 = vld [vmem:[#allocation2 + $0xb2] sm:$0xff] }
 0x298   : > { %v1719_v11 = vsel %vm798_vm0, %v1671_v23, %v5307_v26  ;;  %v1654_v26 = vsel %vm798_vm0, %v1606_v7, %v5311_v47 }
 0x29a   : > { %5173 = vmatpush3.bf16.msra.mxu1 %v5694_v32 }
 0x29b   : > { %5234 = vmatprep.subr.bf16.mxu1 %v6677_v45 }
 0x29d   : > { %3001 = vmatmul.mubr.bf16.vlgmr.msra.gmra.mrb[64].mxu1 %v1656_v0 }
 0x29e   : > { %3008 = vmatprep.mubr.bf16.mxu1 %v1721_v18  ;;  %5242 = vmatpush3.bf16.msra.mxu1 %v6677_v45 }
 0x29f   : > { %5235 = vmatprep.subr.bf16.mxu1 %v6684_v56 }
 0x2a2   : > { %5243 = vmatpush3.bf16.msra.mxu1 %v6684_v56  ;;  %v7071_v39 = vpop.xlane.xlu0 %4270 }
 0x2a3   : > { %5236 = vmatprep.subr.bf16.mxu1 %v6709_v62 }
 0x2a5   : > { %3009 = vmatmul.mubr.bf16.gmra.mrb[68].mxu1 %v1657_v46  ;;  %v1607_v46 = vld [vmem:[#allocation2 + $0xb0] sm:$0xff] }
 0x2a6   : > { %5244 = vmatpush3.bf16.msra.mxu1 %v6709_v62  ;;  %v5515_v9 = vpop.permute.xlu0 %5514 }
 0x2a7   : > { %5237 = vmatprep.subr.bf16.mxu1 %v6719_v19  ;;  %v5517_v45 = vunpack.i.h.bf16 %v5515_v9  ;;  %v5516_v4 = vunpack.i.l.bf16 %v5515_v9 }
 0x2a8   : > { %v7076_v27 = vpop.xlane.xlu1 %4267 }
 0x2a9   : > { %v1716_v56 = vsel %vm798_vm0, %v1348_v60, %v5516_v4  ;;  %v1717_v5 = vsel %vm798_vm0, %v6737_v6, %v5517_v45  ;;  %v1605_v6 = vld [vmem:[#allocation2 + $0x90] sm:$0xff]  ;;  %v4835_v4 = vpack.c.bf16 %v6973_v21, %v6815_v29  ;;  %v4838_v21 = vpack.c.bf16 %v6997_v41, %v6843_v31 }
 0x2aa   : > { %5245 = vmatpush3.bf16.msra.mxu1 %v6719_v19  ;;  %v5525_v14 = vpop.permute.xlu0 %5524  ;;  %v1722_v62 = vpack.c.bf16 %v1717_v5, %v1716_v56  ;;  %v1718_v19 = vsel %vm798_vm0, %v6729_v55, %v5306_v28  ;;  %v1655_v28 = vsel %vm798_vm0, %v1607_v46, %v5312_v59  ;;  %v4841_v56 = vpack.c.bf16 %v6735_v3, %v7019_v20  ;;  %v1735_v29 = vld [vmem:[#allocation2 + $0xb4] sm:$0xff] }
 0x2ab   : > { %5238 = vmatprep.subr.bf16.mxu1 %v6754_v15  ;;  %v5527_v34 = vunpack.i.h.bf16 %v5525_v14  ;;  %v5526_v42 = vunpack.i.l.bf16 %v5525_v14  ;;  %v1723_v40 = vpack.c.bf16 %v1719_v11, %v1718_v19 }
 0x2ac   : > { %v5520_v43 = vpop.permute.xlu1 %5519  ;;  %3016 = vmatprep.mubr.bf16.mxu1 %v1722_v62 }
 0x2ad   : > { %v5522_v61 = vunpack.i.h.bf16 %v5520_v43  ;;  %v5521_v57 = vunpack.i.l.bf16 %v5520_v43  ;;  %v1589_v60 = vsel %vm798_vm0, %v1541_v58, %v5526_v42  ;;  %v1590_v32 = vsel %vm798_vm0, %v1542_v12, %v5527_v34 }
 0x2ae   : > { %5246 = vmatpush3.bf16.msra.mxu1 %v6754_v15  ;;  %v1594_v50 = vpack.c.bf16 %v1590_v32, %v1589_v60  ;;  %v1477_v15 = vld [vmem:[#allocation2 + $0x91] sm:$0xff] }
 0x2af   : > { %v1652_v35 = vsel %vm798_vm0, %v6952_v24, %v5521_v57  ;;  %v1653_v22 = vsel %vm798_vm0, %v1605_v6, %v5522_v61  ;;  %5239 = vmatprep.subr.bf16.mxu1 %v6784_v16 }
 0x2b0   : > { %v5530_v10 = vpop.permute.xlu1 %5529  ;;  %v1658_v0 = vpack.c.bf16 %v1653_v22, %v1652_v35  ;;  %2959 = vmatprep.mubr.bf16.mxu0 %v1594_v50 }
 0x2b1   : > { %v5532_v55 = vunpack.i.h.bf16 %v5530_v10  ;;  %v5531_v18 = vunpack.i.l.bf16 %v5530_v10 }
 0x2b2   : > { %3017 = vmatmul.mubr.bf16.gmra.mrb[72].mxu1 %v1658_v0 }
 0x2b3   : > { %3024 = vmatprep.mubr.bf16.mxu1 %v1723_v40  ;;  %v1525_v24 = vsel %vm798_vm0, %v1477_v15, %v5531_v18  ;;  %v1526_v9 = vsel %vm798_vm0, %v1478_v48, %v5532_v55  ;;  %5247 = vmatpush3.bf16.msra.mxu1 %v6784_v16  ;;  %v1659_v16 = vpack.c.bf16 %v1655_v28, %v1654_v26  ;;  %v4701_v55 = vld [vmem:[%s8088_s4] ss:$0 sm:$0xff] }
 0x2b4   : > { %v1530_v45 = vpack.c.bf16 %v1526_v9, %v1525_v24  ;;  %5240 = vmatprep.subr.bf16.mxu1 %v6802_v37  ;;  %v2678_v15 = vadd.f32 %v6578_v36, %v4701_v55  ;;  %v2681_v9 = vadd.f32 %v6580_v49, %v4701_v55 }
 0x2b6   : > { %2960 = vmatmul.mubr.bf16.gmra.mrb[76].mxu0 %v1530_v45 }
 0x2b7   : > { %5226 = vmatprep.mubr.msk.bf16.mxu0 %vm7102_vm3, %v4835_v4  ;;  %5248 = vmatpush3.bf16.msra.mxu1 %v6802_v37  ;;  %v4844_v37 = vpack.c.bf16 %v1735_v29, %v6727_v53 }
 0x2b8   : > { %5241 = vmatprep.subr.bf16.mxu1 %v6813_v8 }
 0x2ba   : > { %3025 = vmatmul.mubr.bf16.gmra.mrb[76].mxu1 %v1659_v16 }
 0x2bb   : > { %5230 = vmatprep.mubr.msk.bf16.mxu1 %vm7102_vm3, %v4841_v56  ;;  %5249 = vmatpush3.bf16.msra.mxu1 %v6813_v8 }
 0x2be   : > { %5227 = vmatmul.mubr.msk.bf16.vlgmr.msra.gmra.mrb[80].mxu0 %vm7102_vm3, %v4838_v21 }
 0x2c2   : > { %5231 = vmatmul.mubr.msk.bf16.vlgmr.msra.gmra.mrb[80].mxu1 %vm7102_vm3, %v4844_v37 }
 0x2cd   : > { %v4980_v5 = vpop.f32.mrb[4].mxu1 }
 0x2ce   : > { %v4981_v3 = vpop.f32.mrb[5].mxu1 }
 0x2cf   : > { %v4982_v20 = vadd.f32 %v4981_v3, %v4980_v5  ;;  %v4983_v14 = vpop.f32.mrb[6].mxu1 }
 0x2d0   : > { %v4984_v62 = vpop.f32.mrb[7].mxu1 }
 0x2d1   : > { %v4985_v12 = vadd.f32 %v4984_v62, %v4983_v14  ;;  %v2686_v16 = vadd.f32 %v4982_v20, %v4701_v55 }
 0x2d3   : > { %v2689_v37 = vadd.f32 %v4985_v12, %v4701_v55 }
 0x2dd   : > { %v5134_v23 = vpop.f32.mrb[64].mxu0 }
 0x2de   : > { %v5135_v8 = vpop.f32.mrb[65].mxu0 }
 0x2df   : > { %v7127_v34 = vadd.f32 %v5135_v8, %v5134_v23  ;;  %v5137_v42 = vpop.f32.mrb[66].mxu0 }
 0x2e0   : > { %v5138_v31 = vpop.f32.mrb[67].mxu0 }
 0x2e1   : > { %v7129_v41 = vadd.f32 %v5138_v31, %v5137_v42  ;;  %v4986_v43 = vpop.f32.mrb[8].mxu1 }
 0x2e2   : > { %v4987_v61 = vpop.f32.mrb[9].mxu1 }
 0x2e3   : > { %v4988_v53 = vadd.f32 %v4987_v61, %v4986_v43  ;;  %v4989_v57 = vpop.f32.mrb[10].mxu1 }
 0x2e4   : > { %v4990_v58 = vpop.f32.mrb[11].mxu1 }
 0x2e5   : > { %v4991_v60 = vadd.f32 %v4990_v58, %v4989_v57  ;;  %v2694_v23 = vadd.f32 %v4988_v53, %v4701_v55 }
 0x2e7   : > { %v2697_v49 = vadd.f32 %v4991_v60, %v4701_v55 }
 0x2f5   : > { %v5140_v32 = vpop.f32.mrb[68].mxu0 }
 0x2f6   : > { %v5141_v6 = vpop.f32.mrb[69].mxu0 }
 0x2f7   : > { %v7131_v19 = vadd.f32 %v5141_v6, %v5140_v32  ;;  %v5143_v11 = vpop.f32.mrb[70].mxu0 }
 0x2f8   : > { %v5144_v50 = vpop.f32.mrb[71].mxu0 }
 0x2f9   : > { %v7133_v35 = vadd.f32 %v5144_v50, %v5143_v11  ;;  %v4992_v22 = vpop.f32.mrb[12].mxu1 }
 0x2fa   : > { %v4993_v59 = vpop.f32.mrb[13].mxu1 }
 0x2fb   : > { %v4994_v10 = vadd.f32 %v4993_v59, %v4992_v22  ;;  %v4995_v0 = vpop.f32.mrb[14].mxu1 }
 0x2fc   : > { %v4996_v48 = vpop.f32.mrb[15].mxu1 }
 0x2fd   : > { %v4997_v47 = vadd.f32 %v4996_v48, %v4995_v0  ;;  %v2702_v20 = vadd.f32 %v4994_v10, %v4701_v55 }
 0x2ff   : > { %v2705_v12 = vadd.f32 %v4997_v47, %v4701_v55 }
 0x301   : > { %v5014_v18 = vpop.f32.mrb[16].mxu1 }
 0x302   : > { %v5015_v40 = vpop.f32.mrb[17].mxu1 }
 0x303   : > { %v5016_v7 = vadd.f32 %v5015_v40, %v5014_v18  ;;  %v5017_v46 = vpop.f32.mrb[18].mxu1 }
 0x304   : > { %v5018_v24 = vpop.f32.mrb[19].mxu1 }
 0x305   : > { %v2743_v45 = vadd.f32 %v5016_v7, %v2678_v15  ;;  %v5019_v13 = vadd.f32 %v5018_v24, %v5017_v46 }
 0x307   : > { %v2746_v4 = vadd.f32 %v5019_v13, %v2681_v9 }
 0x309   : > { %v5020_v26 = vpop.f32.mrb[20].mxu1 }
 0x30a   : > { %v5021_v28 = vpop.f32.mrb[21].mxu1 }
 0x30b   : > { %v5022_v56 = vadd.f32 %v5021_v28, %v5020_v26  ;;  %v5023_v29 = vpop.f32.mrb[22].mxu1 }
 0x30c   : > { %v5024_v21 = vpop.f32.mrb[23].mxu1 }
 0x30d   : > { %v2751_v5 = vadd.f32 %v5022_v56, %v2686_v16  ;;  %v5025_v3 = vadd.f32 %v5024_v21, %v5023_v29 }
 0x30f   : > { %v2754_v14 = vadd.f32 %v5025_v3, %v2689_v37 }
 0x311   : > { %v5026_v62 = vpop.f32.mrb[24].mxu1 }
 0x312   : > { %v5027_v36 = vpop.f32.mrb[25].mxu1 }
 0x313   : > { %v5028_v8 = vadd.f32 %v5027_v36, %v5026_v62  ;;  %v5029_v42 = vpop.f32.mrb[26].mxu1 }
 0x314   : > { %v5030_v31 = vpop.f32.mrb[27].mxu1 }
 0x315   : > { %v2759_v43 = vadd.f32 %v5028_v8, %v2694_v23  ;;  %v5031_v61 = vadd.f32 %v5030_v31, %v5029_v42 }
 0x317   : > { %v2762_v57 = vadd.f32 %v5031_v61, %v2697_v49 }
 0x319   : > { %v5032_v58 = vpop.f32.mrb[28].mxu1 }
 0x31a   : > { %v5033_v32 = vpop.f32.mrb[29].mxu1 }
 0x31b   : > { %v5034_v6 = vadd.f32 %v5033_v32, %v5032_v58  ;;  %v5035_v11 = vpop.f32.mrb[30].mxu1 }
 0x31c   : > { %v5036_v50 = vpop.f32.mrb[31].mxu1 }
 0x31d   : > { %v2767_v22 = vadd.f32 %v5034_v6, %v2702_v20  ;;  %v5037_v59 = vadd.f32 %v5036_v50, %v5035_v11 }
 0x31f   : > { %v2770_v0 = vadd.f32 %v5037_v59, %v2705_v12 }
 0x321   : > { %v5054_v48 = vpop.f32.mrb[32].mxu1 }
 0x322   : > { %v5055_v18 = vpop.f32.mrb[33].mxu1 }
 0x323   : > { %v5056_v53 = vadd.f32 %v5055_v18, %v5054_v48  ;;  %v5057_v40 = vpop.f32.mrb[34].mxu1 }
 0x324   : > { %v5058_v15 = vpop.f32.mrb[35].mxu1 }
 0x325   : > { %v2808_v7 = vadd.f32 %v5056_v53, %v2743_v45  ;;  %v5059_v60 = vadd.f32 %v5058_v15, %v5057_v40 }
 0x327   : > { %v2811_v46 = vadd.f32 %v5059_v60, %v2746_v4 }
 0x329   : > { %v5060_v24 = vpop.f32.mrb[36].mxu1 }
 0x32a   : > { %v5061_v9 = vpop.f32.mrb[37].mxu1 }
 0x32b   : > { %v5062_v13 = vadd.f32 %v5061_v9, %v5060_v24  ;;  %v5063_v26 = vpop.f32.mrb[38].mxu1 }
 0x32c   : > { %v5064_v10 = vpop.f32.mrb[39].mxu1 }
 0x32d   : > { %v2816_v28 = vadd.f32 %v5062_v13, %v2751_v5  ;;  %v5065_v16 = vadd.f32 %v5064_v10, %v5063_v26 }
 0x32f   : > { %v2819_v56 = vadd.f32 %v5065_v16, %v2754_v14 }
 0x331   : > { %v5066_v47 = vpop.f32.mrb[40].mxu1 }
 0x332   : > { %v5067_v55 = vpop.f32.mrb[41].mxu1 }
 0x333   : > { %v5068_v29 = vadd.f32 %v5067_v55, %v5066_v47  ;;  %v5069_v21 = vpop.f32.mrb[42].mxu1 }
 0x334   : > { %v5070_v37 = vpop.f32.mrb[43].mxu1 }
 0x335   : > { %v2824_v3 = vadd.f32 %v5068_v29, %v2759_v43  ;;  %v5071_v62 = vadd.f32 %v5070_v37, %v5069_v21 }
 0x337   : > { %v2827_v36 = vadd.f32 %v5071_v62, %v2762_v57 }
 0x348   : > { %v5072_v23 = vpop.f32.mrb[44].mxu1 }
 0x349   : > { %v5073_v45 = vpop.f32.mrb[45].mxu1 }
 0x34a   : > { %v5074_v8 = vadd.f32 %v5073_v45, %v5072_v23  ;;  %v5075_v4 = vpop.f32.mrb[46].mxu1 }
 0x34b   : > { %v5076_v42 = vpop.f32.mrb[47].mxu1 }
 0x34c   : > { %v2832_v31 = vadd.f32 %v5074_v8, %v2767_v22  ;;  %v5077_v49 = vadd.f32 %v5076_v42, %v5075_v4  ;;  %v5146_v61 = vpop.f32.mrb[72].mxu0 }
 0x34d   : > { %v5147_v58 = vpop.f32.mrb[73].mxu0 }
 0x34e   : > { %v2835_v5 = vadd.f32 %v5077_v49, %v2770_v0  ;;  %v5148_v32 = vadd.f32 %v5147_v58, %v5146_v61  ;;  %v5149_v14 = vpop.f32.mrb[74].mxu0 }
 0x34f   : > { %v5150_v20 = vpop.f32.mrb[75].mxu0 }
 0x350   : > { %v5151_v6 = vadd.f32 %v5150_v20, %v5149_v14  ;;  %v5094_v11 = vpop.f32.mrb[48].mxu1 }
 0x351   : > { %v5095_v50 = vpop.f32.mrb[49].mxu1 }
 0x352   : > { %v5096_v12 = vadd.f32 %v5095_v50, %v5094_v11  ;;  %v5097_v43 = vpop.f32.mrb[50].mxu1 }
 0x353   : > { %v5098_v59 = vpop.f32.mrb[51].mxu1 }
 0x354   : > { %v2873_v57 = vadd.f32 %v5096_v12, %v2808_v7  ;;  %v5099_v48 = vadd.f32 %v5098_v59, %v5097_v43 }
 0x356   : > { %v2876_v18 = vadd.f32 %v5099_v48, %v2811_v46  ;;  %v2938_v53 = vadd.f32 %v7127_v34, %v2873_v57 }
 0x358   : > { %v5100_v40 = vpop.f32.mrb[52].mxu1  ;;  %v2941_v22 = vadd.f32 %v7129_v41, %v2876_v18 }
 0x359   : > { %v5101_v15 = vpop.f32.mrb[53].mxu1 }
 0x35a   : > { %v5102_v60 = vadd.f32 %v5101_v15, %v5100_v40  ;;  %v5103_v0 = vpop.f32.mrb[54].mxu1 }
 0x35b   : > { %v5104_v24 = vpop.f32.mrb[55].mxu1 }
 0x35c   : > { %v2881_v9 = vadd.f32 %v5102_v60, %v2816_v28  ;;  %v5105_v13 = vadd.f32 %v5104_v24, %v5103_v0 }
 0x35e   : > { %v2884_v26 = vadd.f32 %v5105_v13, %v2819_v56  ;;  %v2946_v10 = vadd.f32 %v7131_v19, %v2881_v9 }
 0x360   : > { %v5106_v16 = vpop.f32.mrb[56].mxu1  ;;  %v2949_v47 = vadd.f32 %v7133_v35, %v2884_v26 }
 0x361   : > { %v5107_v7 = vpop.f32.mrb[57].mxu1 }
 0x362   : > { %v5108_v55 = vadd.f32 %v5107_v7, %v5106_v16  ;;  %v5109_v46 = vpop.f32.mrb[58].mxu1 }
 0x363   : > { %v5110_v29 = vpop.f32.mrb[59].mxu1 }
 0x364   : > { %v2889_v34 = vadd.f32 %v5108_v55, %v2824_v3  ;;  %v5111_v21 = vadd.f32 %v5110_v29, %v5109_v46 }
 0x366   : > { %v2892_v37 = vadd.f32 %v5111_v21, %v2827_v36  ;;  %v2954_v41 = vadd.f32 %v5148_v32, %v2889_v34 }
 0x368   : > { %v5112_v62 = vpop.f32.mrb[60].mxu1  ;;  %v2957_v23 = vadd.f32 %v5151_v6, %v2892_v37 }
 0x369   : > { %v5113_v45 = vpop.f32.mrb[61].mxu1 }
 0x36a   : > { %v5114_v8 = vadd.f32 %v5113_v45, %v5112_v62  ;;  %v5115_v28 = vpop.f32.mrb[62].mxu1 }
 0x36b   : > { %v5116_v4 = vpop.f32.mrb[63].mxu1 }
 0x36c   : > { %v2897_v56 = vadd.f32 %v5114_v8, %v2832_v31  ;;  %v5117_v42 = vadd.f32 %v5116_v4, %v5115_v28 }
 0x36e   : > { %v2900_v19 = vadd.f32 %v5117_v42, %v2835_v5 }
 0x370   : > { %v5174_v49 = vpop.f32.mrb[64].mxu1 }
 0x371   : > { %v5175_v61 = vpop.f32.mrb[65].mxu1 }
 0x372   : > { %v5176_v35 = vadd.f32 %v5175_v61, %v5174_v49  ;;  %v5177_v58 = vpop.f32.mrb[66].mxu1 }
 0x373   : > { %v5178_v14 = vpop.f32.mrb[67].mxu1 }
 0x374   : > { %v5179_v20 = vadd.f32 %v5178_v14, %v5177_v58  ;;  %v3003_v11 = vadd.f32 %v5176_v35, %v2938_v53 }
 0x376   : > { %v3006_v3 = vadd.f32 %v5179_v20, %v2941_v22 }
 0x378   : > { %v5180_v50 = vpop.f32.mrb[68].mxu1 }
 0x379   : > { %v5181_v36 = vpop.f32.mrb[69].mxu1 }
 0x37a   : > { %v5182_v32 = vadd.f32 %v5181_v36, %v5180_v50  ;;  %v5183_v12 = vpop.f32.mrb[70].mxu1 }
 0x37b   : > { %v5184_v6 = vpop.f32.mrb[71].mxu1 }
 0x37c   : > { %v5185_v43 = vadd.f32 %v5184_v6, %v5183_v12  ;;  %v3011_v59 = vadd.f32 %v5182_v32, %v2946_v10 }
 0x37e   : > { %v3014_v57 = vadd.f32 %v5185_v43, %v2949_v47 }
 0x385   : > { %v5186_v48 = vpop.f32.mrb[72].mxu1 }
 0x386   : > { %v5187_v31 = vpop.f32.mrb[73].mxu1 }
 0x387   : > { %v5188_v18 = vadd.f32 %v5187_v31, %v5186_v48  ;;  %v5189_v5 = vpop.f32.mrb[74].mxu1  ;;  %v7155_v31 = vld [vmem:[%s8089_s5 + $0x1] ss:$0 sm:$0xff] }
 0x388   : > { %v5190_v40 = vpop.f32.mrb[75].mxu1 }
 0x389   : > { %v5191_v15 = vadd.f32 %v5190_v40, %v5189_v5  ;;  %v5152_v60 = vpop.f32.mrb[76].mxu0  ;;  %v3019_v0 = vadd.f32 %v5188_v18, %v2954_v41  ;;  %v7161_v5 = vld [vmem:[%s8089_s5] ss:$0 sm:$0xff] }
 0x38a   : > { %v5153_v24 = vpop.f32.mrb[77].mxu0 }
 0x38b   : > { %v5154_v9 = vadd.f32 %v5153_v24, %v5152_v60  ;;  %v5155_v53 = vpop.f32.mrb[78].mxu0  ;;  %v3022_v22 = vadd.f32 %v5191_v15, %v2957_v23 }
 0x38c   : > { %v5156_v13 = vpop.f32.mrb[79].mxu0 }
 0x38d   : > { %v2962_v26 = vadd.f32 %v5154_v9, %v2897_v56  ;;  %v5157_v16 = vadd.f32 %v5156_v13, %v5155_v53  ;;  %v5192_v7 = vpop.f32.mrb[76].mxu1  ;;  %v7175_v9 = vld [vmem:[%s8089_s5 + $0x5] ss:$0 sm:$0xff] }
 0x38e   : > { %v5193_v55 = vpop.f32.mrb[77].mxu1 }
 0x38f   : > { %v2965_v46 = vadd.f32 %v5157_v16, %v2900_v19  ;;  %v5194_v10 = vadd.f32 %v5193_v55, %v5192_v7  ;;  %v5195_v47 = vpop.f32.mrb[78].mxu1  ;;  %v7183_v16 = vld [vmem:[%s8089_s5 + $0x3] ss:$0 sm:$0xff]  ;;  %v7189_v55 = vld [vmem:[%s8089_s5 + $0x6] ss:$0 sm:$0xff] }
 0x390   : > { %v5196_v29 = vpop.f32.mrb[79].mxu1 }
 0x391   : > { %v5197_v34 = vadd.f32 %v5196_v29, %v5195_v47  ;;  %v5228_v21 = vpop.f32.mrb[80].mxu0  ;;  %v3027_v37 = vadd.f32 %v5194_v10, %v2962_v26 }
 0x392   : > { %v3076_v62 = vadd.f32 %v5228_v21, %v3011_v59  ;;  %v3067_v45 = vpop.f32.mrb[81].mxu0 }
 0x393   : > { %v3068_v8 = vadd.f32 %v3067_v45, %v3003_v11  ;;  %v5229_v41 = vpop.f32.mrb[82].mxu0  ;;  %v3030_v28 = vadd.f32 %v5197_v34, %v2965_v46  ;;  %v7197_v34 = vld [vmem:[%s8089_s5 + $0x4] ss:$0 sm:$0xff]  ;;  %v7209_v45 = vld [vmem:[%s8089_s5 + $0xa] ss:$0 sm:$0xff] }
 0x394   : > { %v3100_v4 = vmax.f32 %v3076_v62, 0.0  ;;  %v3079_v42 = vadd.f32 %v5229_v41, %v3014_v57  ;;  %v3070_v23 = vpop.f32.mrb[83].mxu0 }
 0x395   : > { %v3098_v49 = vmax.f32 %v3068_v8, 0.0  ;;  %v3071_v56 = vadd.f32 %v3070_v23, %v3006_v3  ;;  %v5232_v61 = vpop.f32.mrb[80].mxu1  ;;  %v7223_v23 = vld [vmem:[%s8089_s5 + $0xb] ss:$0 sm:$0xff] }
 0x396   : > { %3108 = vst.msk [vmem:[#allocation2 + $0x42] sm:$0xff] %vm798_vm0, %v3100_v4  ;;  %v3101_v19 = vmax.f32 %v3079_v42, 0.0  ;;  %v3092_v35 = vadd.f32 %v5232_v61, %v3027_v37  ;;  %v3083_v58 = vpop.f32.mrb[81].mxu1  ;;  %v7203_v37 = vld [vmem:[%s8089_s5 + $0x7] ss:$0 sm:$0xff] }
 0x397   : > { %3106 = vst.msk [vmem:[#allocation2 + $0x22] sm:$0xff] %vm798_vm0, %v3098_v49  ;;  %v3099_v14 = vmax.f32 %v3071_v56, 0.0  ;;  %v3084_v20 = vadd.f32 %v3083_v58, %v3019_v0  ;;  %v5233_v50 = vpop.f32.mrb[82].mxu1  ;;  %v7169_v0 = vld [vmem:[%s8089_s5 + $0x2] ss:$0 sm:$0xff] }
 0x398   : > { %3109 = vst.msk [vmem:[#allocation2 + $0x52] sm:$0xff] %vm798_vm0, %v3101_v19  ;;  %v3104_v11 = vmax.f32 %v3092_v35, 0.0  ;;  %v3095_v36 = vadd.f32 %v5233_v50, %v3030_v28  ;;  %v3086_v32 = vpop.f32.mrb[83].mxu1  ;;  %v7217_v4 = vld [vmem:[%s8089_s5 + $0x8] ss:$0 sm:$0xff] }
 0x399   : > { %3107 = vst.msk [vmem:[#allocation2 + $0x32] sm:$0xff] %vm798_vm0, %v3099_v14  ;;  %v3102_v12 = vmax.f32 %v3084_v20, 0.0  ;;  %v3087_v3 = vadd.f32 %v3086_v32, %v3022_v22  ;;  %v7231_v19 = vld [vmem:[%s8089_s5 + $0x9] ss:$0 sm:$0xff]  ;;  %v7237_v58 = vld [vmem:[%s8089_s5 + $0xc] ss:$0 sm:$0xff] }
 0x39a   : > { %3112 = vst.msk [vmem:[#allocation2 + $0x82] sm:$0xff] %vm798_vm0, %v3104_v11  ;;  %v3105_v6 = vmax.f32 %v3095_v36, 0.0  ;;  %v7246_v32 = vld [vmem:[%s8089_s5 + $0xd] ss:$0 sm:$0xff] }
 0x39b   : > { %3110 = vst.msk [vmem:[#allocation2 + $0x62] sm:$0xff] %vm798_vm0, %v3102_v12  ;;  %v3103_v43 = vmax.f32 %v3087_v3, 0.0 }
 0x39c   : > { %3113 = vst.msk [vmem:[#allocation2 + $0x92] sm:$0xff] %vm798_vm0, %v3105_v6 }
 0x39d   : > { %3111 = vst.msk [vmem:[#allocation2 + $0x72] sm:$0xff] %vm798_vm0, %v3103_v43 }
 0x39e   : > { %v3170_v59 = vld [vmem:[#allocation2 + $0x21] sm:$0xff] }
 0x39f   : > { %v3117_v57 = vld [vmem:[#allocation2 + $0x20] sm:$0xff]  ;;  %v3182_v18 = vmul.f32 %v7155_v31, %v3170_v59  ;;  %v3446_v46 = vmul.f32 %v7189_v55, %v3170_v59  ;;  %v3710_v61 = vmul.f32 %v7223_v23, %v3170_v59 }
 0x3a0   : > { %v3223_v48 = vld [vmem:[#allocation2 + $0x22] sm:$0xff]  ;;  %v3129_v40 = vmul.f32 %v7161_v5, %v3117_v57  ;;  %v3393_v53 = vmul.f32 %v7175_v9, %v3117_v57  ;;  %v3657_v28 = vmul.f32 %v7209_v45, %v3117_v57  ;;  %v3118_v14 = vld [vmem:[#allocation2 + $0x30] sm:$0xff]  ;;  %v7255_v57 = vld [vmem:[%s8089_s5 + $0xe] ss:$0 sm:$0xff] }
 0x3a1   : > { %v3194_v15 = vsel %vm798_vm0, %v3182_v18, 0.0  ;;  %v3235_v24 = vmul.f32 %v7169_v0, %v3223_v48  ;;  %v3276_v22 = vld [vmem:[#allocation2 + $0x23] sm:$0xff]  ;;  %v3456_v29 = vsel %vm798_vm0, %v3446_v46, 0.0  ;;  %v3499_v62 = vmul.f32 %v7203_v37, %v3223_v48  ;;  %v3171_v12 = vld [vmem:[#allocation2 + $0x31] sm:$0xff] }
 0x3a2   : > { %v3141_v60 = vsel %vm798_vm0, %v3129_v40, 0.0  ;;  %3195 = vadd.xlane.f32.xlu1 %v3194_v15  ;;  %v3403_v26 = vsel %vm798_vm0, %v3393_v53, 0.0  ;;  %v3288_v7 = vmul.f32 %v7183_v16, %v3276_v22  ;;  %v3329_v10 = vld [vmem:[#allocation2 + $0x24] sm:$0xff]  ;;  %v3552_v42 = vmul.f32 %v7217_v4, %v3276_v22 }
 0x3a3   : > { %3142 = vadd.xlane.f32.xlu0 %v3141_v60  ;;  %v3247_v13 = vsel %vm798_vm0, %v3235_v24, 0.0  ;;  %v3341_v21 = vmul.f32 %v7197_v34, %v3329_v10  ;;  %v3509_v41 = vsel %vm798_vm0, %v3499_v62, 0.0  ;;  %v3665_v49 = vsel %vm798_vm0, %v3657_v28, 0.0  ;;  %v3277_v24 = vld [vmem:[#allocation2 + $0x33] sm:$0xff] }
 0x3a4   : > { %v3300_v47 = vsel %vm798_vm0, %v3288_v7, 0.0  ;;  %v3562_v56 = vsel %vm798_vm0, %v3552_v42, 0.0  ;;  %v3605_v35 = vmul.f32 %v7231_v19, %v3329_v10  ;;  %v3718_v20 = vsel %vm798_vm0, %v3710_v61, 0.0  ;;  %v3330_v7 = vld [vmem:[#allocation2 + $0x34] sm:$0xff] }
 0x3a5   : > { %v3353_v8 = vsel %vm798_vm0, %v3341_v21, 0.0  ;;  %v3763_v11 = vmul.f32 %v7237_v58, %v3223_v48  ;;  %v3130_v36 = vmul.f32 %v7161_v5, %v3118_v14  ;;  %v3816_v43 = vmul.f32 %v7246_v32, %v3276_v22  ;;  %v3224_v48 = vld [vmem:[#allocation2 + $0x32] sm:$0xff] }
 0x3a6   : > { %3248 = vadd.xlane.f32.xlu1 %v3247_v13  ;;  %v3615_v50 = vsel %vm798_vm0, %v3605_v35, 0.0  ;;  %v3183_v59 = vmul.f32 %v7155_v31, %v3171_v12  ;;  %v3869_v15 = vmul.f32 %v7255_v57, %v3329_v10  ;;  %v3236_v60 = vmul.f32 %v7169_v0, %v3224_v48 }
 0x3a7   : > { %3404 = vadd.xlane.f32.xlu0 %v3403_v26  ;;  %v3771_v3 = vsel %vm798_vm0, %v3763_v11, 0.0  ;;  %v3144_v6 = vsel %vm798_vm0, %v3130_v36, 0.0  ;;  %v3824_v18 = vsel %vm798_vm0, %v3816_v43, 0.0  ;;  %v3394_v13 = vmul.f32 %v7175_v9, %v3118_v14 }
 0x3a8   : > { %v3197_v40 = vsel %vm798_vm0, %v3183_v59, 0.0  ;;  %v3877_v53 = vsel %vm798_vm0, %v3869_v15, 0.0  ;;  %v3250_v22 = vsel %vm798_vm0, %v3236_v60, 0.0  ;;  %v3289_v26 = vmul.f32 %v7183_v16, %v3277_v24 }
 0x3a9   : > { %v3406_v46 = vsel %vm798_vm0, %v3394_v13, 0.0  ;;  %v3817_v43 = vmul.f32 %v7246_v32, %v3277_v24  ;;  %v3870_v60 = vmul.f32 %v7255_v57, %v3330_v7  ;;  %v7306_v13 = vld [vmem:[%s8089_s5 + $0x11] ss:$0 sm:$0xff] }
 0x3aa   : > { %3301 = vadd.xlane.f32.xlu1 %v3300_v47  ;;  %v3303_v10 = vsel %vm798_vm0, %v3289_v26, 0.0  ;;  %v3447_v47 = vmul.f32 %v7189_v55, %v3171_v12  ;;  %v4028_v26 = vmul.f32 %v7306_v13, %v3224_v48 }
 0x3ab   : > { %3457 = vadd.xlane.f32.xlu0 %v3456_v29  ;;  %v3342_v29 = vmul.f32 %v7197_v34, %v3330_v7 }
 0x3ac   : > { %v3459_v21 = vsel %vm798_vm0, %v3447_v47, 0.0 }
 0x3ad   : > { %v3356_v62 = vsel %vm798_vm0, %v3342_v29, 0.0  ;;  %v7318_v29 = vld [vmem:[%s8089_s5 + $0x12] ss:$0 sm:$0xff] }
 0x3ae   : > { %3354 = vadd.xlane.f32.xlu1 %v3353_v8  ;;  %v3500_v8 = vmul.f32 %v7203_v37, %v3224_v48 }
 0x3af   : > { %3510 = vadd.xlane.f32.xlu0 %v3509_v41  ;;  %v3658_v41 = vmul.f32 %v7209_v45, %v3118_v14 }
 0x3b0   : > { %v3512_v28 = vsel %vm798_vm0, %v3500_v8, 0.0 }
 0x3b1   : > { %v3668_v42 = vsel %vm798_vm0, %v3658_v41, 0.0 }
 0x3b2   : > { %3666 = vadd.xlane.f32.xlu1 %v3665_v49  ;;  %v3553_v49 = vmul.f32 %v7217_v4, %v3277_v24 }
 0x3b3   : > { %3563 = vadd.xlane.f32.xlu0 %v3562_v56  ;;  %v3711_v56 = vmul.f32 %v7223_v23, %v3171_v12 }
 0x3b4   : > { %v3565_v61 = vsel %vm798_vm0, %v3553_v49, 0.0  ;;  %v7335_v49 = vld [vmem:[#allocation2 + $0x43] sm:$0xff] }
 0x3b5   : > { %v3721_v35 = vsel %vm798_vm0, %v3711_v56, 0.0 }
 0x3b6   : > { %3719 = vadd.xlane.f32.xlu1 %v3718_v20  ;;  %v3606_v20 = vmul.f32 %v7231_v19, %v3330_v7 }
 0x3b7   : > { %3616 = vadd.xlane.f32.xlu0 %v3615_v50  ;;  %v3764_v50 = vmul.f32 %v7237_v58, %v3224_v48 }
 0x3b8   : > { %v3618_v11 = vsel %vm798_vm0, %v3606_v20, 0.0 }
 0x3b9   : > { %v3774_v36 = vsel %vm798_vm0, %v3764_v50, 0.0 }
 0x3ba   : > { %3772 = vadd.xlane.f32.xlu1 %v3771_v3  ;;  %v7286_v3 = vld [vmem:[%s8089_s5 + $0xf] ss:$0 sm:$0xff] }
 0x3bb   : > { %3145 = vadd.xlane.f32.xlu0 %v3144_v6  ;;  %v3922_v6 = vmul.f32 %v7286_v3, %v3118_v14  ;;  %v7299_v14 = vld [vmem:[#allocation2 + $0x40] sm:$0xff] }
 0x3bc   : > { %v3131_v20 = vmul.f32 %v7161_v5, %v7299_v14 }
 0x3bd   : > { %v3930_v59 = vsel %vm798_vm0, %v3922_v6, 0.0 }
 0x3be   : > { %3825 = vadd.xlane.f32.xlu1 %v3824_v18  ;;  %v3827_v18 = vsel %vm798_vm0, %v3817_v43, 0.0 }
 0x3bf   : > { %3198 = vadd.xlane.f32.xlu0 %v3197_v40  ;;  %v7295_v40 = vld [vmem:[%s8089_s5 + $0x10] ss:$0 sm:$0xff] }
 0x3c0   : > { %v3975_v15 = vmul.f32 %v7295_v40, %v3171_v12  ;;  %v3395_v12 = vmul.f32 %v7175_v9, %v7299_v14 }
 0x3c2   : > { %3878 = vadd.xlane.f32.xlu1 %v3877_v53  ;;  %v3983_v53 = vsel %vm798_vm0, %v3975_v15, 0.0  ;;  %v3409_v47 = vsel %vm798_vm0, %v3395_v12, 0.0 }
 0x3c3   : > { %3251 = vadd.xlane.f32.xlu0 %v3250_v22  ;;  %v3880_v22 = vsel %vm798_vm0, %v3870_v60, 0.0 }
 0x3c6   : > { %3407 = vadd.xlane.f32.xlu1 %v3406_v46  ;;  %v7311_v46 = vld [vmem:[#allocation2 + $0x41] sm:$0xff] }
 0x3c7   : > { %3304 = vadd.xlane.f32.xlu0 %v3303_v10  ;;  %v4036_v10 = vsel %vm798_vm0, %v4028_v26, 0.0  ;;  %v3448_v48 = vmul.f32 %v7189_v55, %v7311_v46  ;;  %v3184_v6 = vmul.f32 %v7155_v31, %v7311_v46  ;;  %v3290_v26 = vmul.f32 %v7183_v16, %v7335_v49 }
 0x3c9   : > { %v3462_v41 = vsel %vm798_vm0, %v3448_v48, 0.0 }
 0x3ca   : > { %3460 = vadd.xlane.f32.xlu1 %v3459_v21  ;;  %v4081_v21 = vmul.f32 %v7318_v29, %v3277_v24 }
 0x3cb   : > { %3357 = vadd.xlane.f32.xlu0 %v3356_v62  ;;  %v7323_v62 = vld [vmem:[#allocation2 + $0x42] sm:$0xff] }
 0x3cc   : > { %v4089_v8 = vsel %vm798_vm0, %v4081_v21, 0.0  ;;  %v3501_v24 = vmul.f32 %v7203_v37, %v7323_v62  ;;  %v3237_v15 = vmul.f32 %v7169_v0, %v7323_v62 }
 0x3ce   : > { %3513 = vadd.xlane.f32.xlu1 %v3512_v28  ;;  %v7330_v28 = vld [vmem:[%s8089_s5 + $0x13] ss:$0 sm:$0xff] }
 0x3cf   : > { %3669 = vadd.xlane.f32.xlu0 %v3668_v42  ;;  %v4134_v42 = vmul.f32 %v7330_v28, %v3330_v7  ;;  %v7343_v7 = vld [vmem:[#allocation2 + $0x44] sm:$0xff] }
 0x3d0   : > { %v3343_v21 = vmul.f32 %v7197_v34, %v7343_v7 }
 0x3d1   : > { %v4142_v56 = vsel %vm798_vm0, %v4134_v42, 0.0  ;;  %v3659_v42 = vmul.f32 %v7209_v45, %v7299_v14 }
 0x3d2   : > { %3566 = vadd.xlane.f32.xlu1 %v3565_v61  ;;  %v3515_v61 = vsel %vm798_vm0, %v3501_v24, 0.0 }
 0x3d3   : > { %3722 = vadd.xlane.f32.xlu0 %v3721_v35  ;;  %v3554_v35 = vmul.f32 %v7217_v4, %v7335_v49 }
 0x3d5   : > { %v3568_v50 = vsel %vm798_vm0, %v3554_v35, 0.0  ;;  %v3712_v35 = vmul.f32 %v7223_v23, %v7311_v46 }
 0x3d6   : > { %3619 = vadd.xlane.f32.xlu1 %v3618_v11  ;;  %v3147_v11 = vsel %vm798_vm0, %v3131_v20, 0.0  ;;  %v7381_v20 = vld [vmem:[#allocation2 + $0x50] sm:$0xff] }
 0x3d7   : > { %3775 = vadd.xlane.f32.xlu0 %v3774_v36  ;;  %v3607_v36 = vmul.f32 %v7231_v19, %v7343_v7 }
 0x3d9   : > { %v3621_v43 = vsel %vm798_vm0, %v3607_v36, 0.0  ;;  %v3132_v36 = vmul.f32 %v7161_v5, %v7381_v20 }
 0x3da   : > { %3931 = vadd.xlane.f32.xlu1 %v3930_v59  ;;  %v3200_v59 = vsel %vm798_vm0, %v3184_v6, 0.0  ;;  %v3765_v6 = vmul.f32 %v7237_v58, %v7323_v62 }
 0x3db   : > { %3828 = vadd.xlane.f32.xlu0 %v3827_v18  ;;  %v3923_v18 = vmul.f32 %v7286_v3, %v7299_v14 }
 0x3dd   : > { %v3933_v60 = vsel %vm798_vm0, %v3923_v18, 0.0  ;;  %v3777_v18 = vsel %vm798_vm0, %v3765_v6, 0.0 }
 0x3de   : > { %3984 = vadd.xlane.f32.xlu1 %v3983_v53  ;;  %v3253_v53 = vsel %vm798_vm0, %v3237_v15, 0.0 }
 0x3df   : > { %3881 = vadd.xlane.f32.xlu0 %v3880_v22  ;;  %v3976_v22 = vmul.f32 %v7295_v40, %v7311_v46 }
 0x3e1   : > { %v3986_v12 = vsel %vm798_vm0, %v3976_v22, 0.0 }
 0x3e2   : > { %4037 = vadd.xlane.f32.xlu1 %v4036_v10  ;;  %v3306_v10 = vsel %vm798_vm0, %v3290_v26, 0.0 }
 0x3e3   : > { %3410 = vadd.xlane.f32.xlu0 %v3409_v47  ;;  %v4029_v47 = vmul.f32 %v7306_v13, %v7323_v62 }
 0x3e5   : > { %v4039_v48 = vsel %vm798_vm0, %v4029_v47, 0.0  ;;  %v7405_v47 = vld [vmem:[#allocation2 + $0x53] sm:$0xff] }
 0x3e6   : > { %4090 = vadd.xlane.f32.xlu1 %v4089_v8  ;;  %v3359_v8 = vsel %vm798_vm0, %v3343_v21, 0.0 }
 0x3e7   : > { %3463 = vadd.xlane.f32.xlu0 %v3462_v41  ;;  %v4082_v41 = vmul.f32 %v7318_v29, %v7335_v49 }
 0x3e9   : > { %v4092_v24 = vsel %vm798_vm0, %v4082_v41, 0.0  ;;  %v7414_v41 = vld [vmem:[%s8089_s5 + $0x14] ss:$0 sm:$0xff] }
 0x3ea   : > { %4143 = vadd.xlane.f32.xlu1 %v4142_v56  ;;  %v3671_v56 = vsel %vm798_vm0, %v3659_v42, 0.0  ;;  %v4187_v42 = vmul.f32 %v7414_v41, %v7299_v14  ;;  %v7434_v14 = vld [vmem:[%s8089_s5 + $0x16] ss:$0 sm:$0xff] }
 0x3eb   : > { %3516 = vadd.xlane.f32.xlu0 %v3515_v61  ;;  %v4135_v61 = vmul.f32 %v7330_v28, %v7343_v7 }
 0x3ee   : > { %3148 = vadd.xlane.f32.xlu1 %v3147_v11  ;;  %v3724_v11 = vsel %vm798_vm0, %v3712_v35, 0.0 }
 0x3ef   : > { %3569 = vadd.xlane.f32.xlu0 %v3568_v50  ;;  %v4145_v50 = vsel %vm798_vm0, %v4135_v61, 0.0  ;;  %v4195_v61 = vsel %vm798_vm0, %v4187_v42, 0.0 }
 0x3f2   : > { %3201 = vadd.xlane.f32.xlu1 %v3200_v59  ;;  %v3150_v59 = vsel %vm798_vm0, %v3132_v36, 0.0 }
 0x3f3   : > { %3622 = vadd.xlane.f32.xlu0 %v3621_v43  ;;  %v7389_v43 = vld [vmem:[#allocation2 + $0x51] sm:$0xff] }
 0x3f4   : > { %v3185_v15 = vmul.f32 %v7155_v31, %v7389_v43 }
 0x3f6   : > { %3254 = vadd.xlane.f32.xlu1 %v3253_v53  ;;  %v7397_v53 = vld [vmem:[#allocation2 + $0x52] sm:$0xff]  ;;  %v3203_v22 = vsel %vm798_vm0, %v3185_v15, 0.0 }
 0x3f7   : > { %3934 = vadd.xlane.f32.xlu0 %v3933_v60  ;;  %v3818_v60 = vmul.f32 %v7246_v32, %v7335_v49 }
 0x3f9   : > { %v3830_v26 = vsel %vm798_vm0, %v3818_v60, 0.0 }
 0x3fa   : > { %3307 = vadd.xlane.f32.xlu1 %v3306_v10  ;;  %v3871_v10 = vmul.f32 %v7255_v57, %v7343_v7 }
 0x3fb   : > { %3987 = vadd.xlane.f32.xlu0 %v3986_v12  ;;  %v3238_v12 = vmul.f32 %v7169_v0, %v7397_v53 }
 0x3fd   : > { %v3256_v21 = vsel %vm798_vm0, %v3238_v12, 0.0  ;;  %v3212_v12 = vadd.f32 %v6538_v25, %v6522_v44  ;;  %v3819_v44 = vmul.f32 %v7246_v32, %v7405_v47  ;;  %v3396_v25 = vmul.f32 %v7175_v9, %v7381_v20 }
 0x3fe   : > { %3360 = vadd.xlane.f32.xlu1 %v3359_v8  ;;  %v3291_v8 = vmul.f32 %v7183_v16, %v7405_v47 }
 0x3ff   : > { %4040 = vadd.xlane.f32.xlu0 %v4039_v48  ;;  %v3883_v48 = vsel %vm798_vm0, %v3871_v10, 0.0 }
 0x402   : > { %3672 = vadd.xlane.f32.xlu1 %v3671_v56  ;;  %v3309_v56 = vsel %vm798_vm0, %v3291_v8, 0.0  ;;  %v3265_v8 = vadd.f32 %v6543_v54, %v3212_v12  ;;  %v3412_v54 = vsel %vm798_vm0, %v3396_v25, 0.0 }
 0x403   : > { %4093 = vadd.xlane.f32.xlu0 %v4092_v24  ;;  %v7418_v24 = vld [vmem:[#allocation2 + $0x54] sm:$0xff] }
 0x404   : > { %v3344_v35 = vmul.f32 %v7197_v34, %v7418_v24 }
 0x406   : > { %3725 = vadd.xlane.f32.xlu1 %v3724_v11  ;;  %v3362_v36 = vsel %vm798_vm0, %v3344_v35, 0.0  ;;  %v3833_v35 = vsel %vm798_vm0, %v3819_v44, 0.0 }
 0x407   : > { %4146 = vadd.xlane.f32.xlu0 %v4145_v50  ;;  %v7427_v50 = vld [vmem:[%s8089_s5 + $0x15] ss:$0 sm:$0xff] }
 0x408   : > { %v4240_v11 = vmul.f32 %v7427_v50, %v7311_v46  ;;  %v7445_v46 = vld [vmem:[%s8089_s5 + $0x17] ss:$0 sm:$0xff] }
 0x40a   : > { %3778 = vadd.xlane.f32.xlu1 %v3777_v18  ;;  %v4248_v6 = vsel %vm798_vm0, %v4240_v11, 0.0  ;;  %v4293_v18 = vmul.f32 %v7434_v14, %v7323_v62  ;;  %v7456_v62 = vld [vmem:[%s8089_s5 + $0x18] ss:$0 sm:$0xff]  ;;  %v3872_v11 = vmul.f32 %v7255_v57, %v7418_v24 }
 0x40b   : > { %3151 = vadd.xlane.f32.xlu0 %v3150_v59  ;;  %v3660_v59 = vmul.f32 %v7209_v45, %v7381_v20 }
 0x40c   : > { %v4301_v60 = vsel %vm798_vm0, %v4293_v18, 0.0  ;;  %v3502_v18 = vmul.f32 %v7203_v37, %v7397_v53 }
 0x40d   : > { %v3674_v15 = vsel %vm798_vm0, %v3660_v59, 0.0 }
 0x40e   : > { %3831 = vadd.xlane.f32.xlu1 %v3830_v26  ;;  %v4346_v26 = vmul.f32 %v7445_v46, %v7335_v49  ;;  %v4399_v49 = vmul.f32 %v7456_v62, %v7343_v7  ;;  %v3318_v7 = vadd.f32 %v6547_v33, %v3265_v8  ;;  %v4030_v33 = vmul.f32 %v7306_v13, %v7397_v53  ;;  %v8109_v8 = vld [vmem:[#allocation6_spill] sm:$0xff] }
 0x40f   : > { %3204 = vadd.xlane.f32.xlu0 %v3203_v22  ;;  %v3713_v22 = vmul.f32 %v7223_v23, %v7389_v43  ;;  %v3518_v12 = vsel %vm798_vm0, %v3502_v18, 0.0  ;;  %v4294_v18 = vmul.f32 %v7434_v14, %v7397_v53 }
 0x410   : > { %v3371_v59 = vadd.f32 %v6551_v63, %v3318_v7  ;;  %v4042_v63 = vsel %vm798_vm0, %v4030_v33, 0.0  ;;  %v3608_v7 = vmul.f32 %v7231_v19, %v7418_v24 }
 0x411   : > { %v3727_v10 = vsel %vm798_vm0, %v3713_v22, 0.0 }
 0x412   : > { %3884 = vadd.xlane.f32.xlu1 %v3883_v48  ;;  %v3766_v48 = vmul.f32 %v7237_v58, %v7397_v53  ;;  %v3624_v33 = vsel %vm798_vm0, %v3608_v7, 0.0  ;;  %v3977_v53 = vmul.f32 %v7295_v40, %v7389_v43 }
 0x413   : > { %3257 = vadd.xlane.f32.xlu0 %v3256_v21  ;;  %v4354_v21 = vsel %vm798_vm0, %v4346_v26, 0.0 }
 0x414   : > { %v3780_v42 = vsel %vm798_vm0, %v3766_v48, 0.0 }
 0x416   : > { %4196 = vadd.xlane.f32.xlu1 %v4195_v61  ;;  %v3213_v61 = vadd.f32 %v6533_v38, %v6526_v2  ;;  %v3886_v2 = vsel %vm798_vm0, %v3872_v11, 0.0 }
 0x417   : > { %3310 = vadd.xlane.f32.xlu0 %v3309_v56  ;;  %v4407_v56 = vsel %vm798_vm0, %v4399_v49, 0.0 }
 0x41a   : > { %4249 = vadd.xlane.f32.xlu1 %v4248_v6  ;;  %v3266_v6 = vadd.f32 %v6541_v52, %v3213_v61  ;;  %v3424_v52 = vadd.f32 %v6558_v17, %v3371_v59  ;;  %v4241_v61 = vmul.f32 %v7427_v50, %v7389_v43 }
 0x41b   : > { %3363 = vadd.xlane.f32.xlu0 %v3362_v36  ;;  %v3449_v36 = vmul.f32 %v7189_v55, %v7389_v43  ;;  %v7529_v43 = vld [vmem:[#allocation2 + $0x80] sm:$0xff] }
 0x41c   : > { %v3319_v22 = vadd.f32 %v6545_v1, %v3266_v6  ;;  %v8110_v1 = vld [vmem:[#allocation9_spill] sm:$0xff] }
 0x41d   : > { %v3465_v38 = vsel %vm798_vm0, %v3449_v36, 0.0  ;;  %v8111_v36 = vld [vmem:[#allocation11_spill] sm:$0xff] }
 0x41e   : > { %4302 = vadd.xlane.f32.xlu1 %v4301_v60 }
 0x41f   : > { %3675 = vadd.xlane.f32.xlu0 %v3674_v15 }
 0x422   : > { %4355 = vadd.xlane.f32.xlu1 %v4354_v21  ;;  %v3555_v21 = vmul.f32 %v7217_v4, %v7405_v47 }
 0x423   : > { %3728 = vadd.xlane.f32.xlu0 %v3727_v10  ;;  %v4188_v10 = vmul.f32 %v7414_v41, %v7381_v20 }
 0x424   : > { %v3571_v25 = vsel %vm798_vm0, %v3555_v21, 0.0 }
 0x425   : > { %v4198_v44 = vsel %vm798_vm0, %v4188_v10, 0.0  ;;  %v4304_v10 = vsel %vm798_vm0, %v4294_v18, 0.0 }
 0x426   : > { %4408 = vadd.xlane.f32.xlu1 %v4407_v56  ;;  %v3477_v56 = vadd.f32 %v8110_v1, %v3424_v52  ;;  %v8112_v52 = vld [vmem:[#allocation13_spill] sm:$0xff] }
 0x427   : > { %3781 = vadd.xlane.f32.xlu0 %v3780_v42  ;;  %v3372_v42 = vadd.f32 %v8109_v8, %v3319_v22  ;;  %v8113_v8 = vld [vmem:[#allocation15_spill] sm:$0xff] }
 0x428   : > { %v3530_v6 = vadd.f32 %v8111_v36, %v3477_v56 }
 0x42a   : > { %3413 = vadd.xlane.f32.xlu1 %v3412_v54 }
 0x42b   : > { %3834 = vadd.xlane.f32.xlu0 %v3833_v35 }
 0x42e   : > { %3466 = vadd.xlane.f32.xlu1 %v3465_v38  ;;  %v4251_v38 = vsel %vm798_vm0, %v4241_v61, 0.0 }
 0x42f   : > { %3887 = vadd.xlane.f32.xlu0 %v3886_v2  ;;  %v3196_v15 = vpop.xlane.xlu1 %3195 }
 0x430   : > { %v3143_v60 = vpop.xlane.xlu0 %3142 }
 0x431   : > { %v3214_v26 = vadd.f32 %v3196_v15, %v3143_v60  ;;  %v3924_v15 = vmul.f32 %v7286_v3, %v7381_v20 }
 0x432   : > { %3519 = vadd.xlane.f32.xlu1 %v3518_v12 }
 0x433   : > { %4043 = vadd.xlane.f32.xlu0 %v4042_v63  ;;  %v3249_v48 = vpop.xlane.xlu1 %3248  ;;  %v3936_v21 = vsel %vm798_vm0, %v3924_v15, 0.0 }
 0x434   : > { %v3405_v49 = vpop.xlane.xlu0 %3404  ;;  %v3267_v17 = vadd.f32 %v3249_v48, %v3214_v26  ;;  %v3583_v26 = vadd.f32 %v8112_v52, %v3530_v6  ;;  %v4347_v48 = vmul.f32 %v7445_v46, %v7405_v47  ;;  %v3663_v52 = vmul.f32 %v7209_v45, %v7529_v43 }
 0x435   : > { %v3425_v35 = vadd.f32 %v3405_v49, %v3372_v42 }
 0x436   : > { %3572 = vadd.xlane.f32.xlu1 %v3571_v25  ;;  %v3636_v42 = vadd.f32 %v8113_v8, %v3583_v26  ;;  %v4357_v56 = vsel %vm798_vm0, %v4347_v48, 0.0  ;;  %v4083_v25 = vmul.f32 %v7318_v29, %v7405_v47  ;;  %v4136_v47 = vmul.f32 %v7330_v28, %v7418_v24  ;;  %v7555_v8 = vld [vmem:[#allocation2 + $0x83] sm:$0xff] }
 0x437   : > { %4199 = vadd.xlane.f32.xlu0 %v4198_v44  ;;  %v3302_v54 = vpop.xlane.xlu1 %3301  ;;  %v4400_v44 = vmul.f32 %v7456_v62, %v7418_v24  ;;  %v7547_v24 = vld [vmem:[#allocation2 + $0x82] sm:$0xff] }
 0x438   : > { %v3458_v11 = vpop.xlane.xlu0 %3457  ;;  %v3320_v59 = vadd.f32 %v3302_v54, %v3267_v17  ;;  %v3989_v17 = vsel %vm798_vm0, %v3977_v53, 0.0  ;;  %v4095_v6 = vsel %vm798_vm0, %v4083_v25, 0.0  ;;  %v3683_v53 = vsel %vm798_vm0, %v3663_v52, 0.0 }
 0x439   : > { %v3478_v2 = vadd.f32 %v3458_v11, %v3425_v35  ;;  %v4410_v36 = vsel %vm798_vm0, %v4400_v44, 0.0 }
 0x43a   : > { %3625 = vadd.xlane.f32.xlu1 %v3624_v33 }
 0x43b   : > { %4252 = vadd.xlane.f32.xlu0 %v4251_v38  ;;  %v3355_v60 = vpop.xlane.xlu1 %3354 }
 0x43c   : > { %v3511_v22 = vpop.xlane.xlu0 %3510  ;;  %v7514_v63 = vadd.f32 %v3355_v60, %v3320_v59  ;;  %v3399_v59 = vmul.f32 %v7175_v9, %v7529_v43  ;;  %v4148_v60 = vsel %vm798_vm0, %v4136_v47, 0.0 }
 0x43d   : > { %v3531_v12 = vadd.f32 %v3511_v22, %v3478_v2  ;;  %v7539_v2 = vld [vmem:[#allocation2 + $0x81] sm:$0xff] }
 0x43e   : > { %3937 = vadd.xlane.f32.xlu1 %v3936_v21  ;;  %v3421_v15 = vsel %vm798_vm0, %v3399_v59, 0.0  ;;  %v3452_v22 = vmul.f32 %v7189_v55, %v7539_v2 }
 0x43f   : > { %4305 = vadd.xlane.f32.xlu0 %v4304_v10  ;;  %v3667_v20 = vpop.xlane.xlu1 %3666 }
 0x440   : > { %v3564_v49 = vpop.xlane.xlu0 %3563  ;;  %v3689_v61 = vadd.f32 %v3667_v20, %v3636_v42  ;;  %v3474_v48 = vsel %vm798_vm0, %v3452_v22, 0.0  ;;  %v3505_v20 = vmul.f32 %v7203_v37, %v7547_v24 }
 0x441   : > { %v3584_v1 = vadd.f32 %v3564_v49, %v3531_v12  ;;  %v3716_v49 = vmul.f32 %v7223_v23, %v7539_v2 }
 0x442   : > { %3990 = vadd.xlane.f32.xlu1 %v3989_v17  ;;  %v3527_v44 = vsel %vm798_vm0, %v3505_v20, 0.0 }
 0x443   : > { %4358 = vadd.xlane.f32.xlu0 %v4357_v56  ;;  %v3720_v7 = vpop.xlane.xlu1 %3719  ;;  %v3736_v25 = vsel %vm798_vm0, %v3716_v49, 0.0 }
 0x444   : > { %v3617_v35 = vpop.xlane.xlu0 %3616  ;;  %v3742_v54 = vadd.f32 %v3720_v7, %v3689_v61  ;;  %v3558_v61 = vmul.f32 %v7217_v4, %v7555_v8  ;;  %v3769_v7 = vmul.f32 %v7237_v58, %v7547_v24 }
 0x445   : > { %v7531_v11 = vadd.f32 %v3617_v35, %v3584_v1  ;;  %v7563_v35 = vld [vmem:[#allocation2 + $0x84] sm:$0xff] }
 0x446   : > { %4096 = vadd.xlane.f32.xlu1 %v4095_v6  ;;  %v3580_v47 = vsel %vm798_vm0, %v3558_v61, 0.0 }
 0x447   : > { %4411 = vadd.xlane.f32.xlu0 %v4410_v36  ;;  %v3773_v38 = vpop.xlane.xlu1 %3772 }
 0x448   : > { %v3146_v33 = vpop.xlane.xlu0 %3145  ;;  %v3795_v18 = vadd.f32 %v3773_v38, %v3742_v54  ;;  %v3789_v38 = vsel %vm798_vm0, %v3769_v7, 0.0 }
 0x44a   : > { %4149 = vadd.xlane.f32.xlu1 %v4148_v60 }
 0x44b   : > { %3422 = vadd.xlane.f32.xlu0 %v3421_v15  ;;  %v3826_v26 = vpop.xlane.xlu1 %3825 }
 0x44c   : > { %v3199_v12 = vpop.xlane.xlu0 %3198  ;;  %v3848_v10 = vadd.f32 %v3826_v26, %v3795_v18  ;;  %v3822_v18 = vmul.f32 %v7246_v32, %v7555_v8 }
 0x44d   : > { %v3215_v21 = vadd.f32 %v3199_v12, %v3146_v33  ;;  %v3611_v33 = vmul.f32 %v7231_v19, %v7563_v35  ;;  %v3927_v12 = vmul.f32 %v7286_v3, %v7529_v43 }
 0x44e   : > { %3684 = vadd.xlane.f32.xlu1 %v3683_v53  ;;  %v3842_v26 = vsel %vm798_vm0, %v3822_v18, 0.0 }
 0x44f   : > { %3475 = vadd.xlane.f32.xlu0 %v3474_v48  ;;  %v3879_v42 = vpop.xlane.xlu1 %3878  ;;  %v3945_v49 = vsel %vm798_vm0, %v3927_v12, 0.0 }
 0x450   : > { %v3252_v1 = vpop.xlane.xlu0 %3251  ;;  %v3901_v56 = vadd.f32 %v3879_v42, %v3848_v10  ;;  %v3875_v10 = vmul.f32 %v7255_v57, %v7563_v35 }
 0x451   : > { %v3268_v17 = vadd.f32 %v3252_v1, %v3215_v21  ;;  %v4191_v1 = vmul.f32 %v7414_v41, %v7529_v43 }
 0x452   : > { %3737 = vadd.xlane.f32.xlu1 %v3736_v25  ;;  %v3895_v42 = vsel %vm798_vm0, %v3875_v10, 0.0 }
 0x453   : > { %3528 = vadd.xlane.f32.xlu0 %v3527_v44  ;;  %v3408_v54 = vpop.xlane.xlu1 %3407 }
 0x454   : > { %v3305_v36 = vpop.xlane.xlu0 %3304  ;;  %v3426_v6 = vadd.f32 %v3408_v54, %v7514_v63  ;;  %v3633_v63 = vsel %vm798_vm0, %v3611_v33, 0.0  ;;  %v4207_v54 = vsel %vm798_vm0, %v4191_v1, 0.0 }
 0x455   : > { %v3321_v59 = vadd.f32 %v3305_v36, %v3268_v17  ;;  %v3980_v17 = vmul.f32 %v7295_v40, %v7539_v2  ;;  %v4244_v36 = vmul.f32 %v7427_v50, %v7539_v2  ;;  %v4086_v2 = vmul.f32 %v7318_v29, %v7555_v8 }
 0x456   : > { %3790 = vadd.xlane.f32.xlu1 %v3789_v38 }
 0x457   : > { %3581 = vadd.xlane.f32.xlu0 %v3580_v47  ;;  %v3461_v15 = vpop.xlane.xlu1 %3460  ;;  %v4260_v33 = vsel %vm798_vm0, %v4244_v36, 0.0 }
 0x458   : > { %v3358_v60 = vpop.xlane.xlu0 %3357  ;;  %v3479_v22 = vadd.f32 %v3461_v15, %v3426_v6  ;;  %v4033_v6 = vmul.f32 %v7306_v13, %v7547_v24  ;;  %v4297_v15 = vmul.f32 %v7434_v14, %v7547_v24  ;;  %v4139_v24 = vmul.f32 %v7330_v28, %v7563_v35 }
 0x459   : > { %v7572_v52 = vadd.f32 %v3358_v60, %v3321_v59  ;;  %v7601_v60 = vld [vmem:[#allocation2 + $0x60] sm:$0xff] }
 0x45a   : > { %3843 = vadd.xlane.f32.xlu1 %v3842_v26  ;;  %v4051_v18 = vsel %vm798_vm0, %v4033_v6, 0.0  ;;  %v4313_v10 = vsel %vm798_vm0, %v4297_v15, 0.0 }
 0x45b   : > { %3634 = vadd.xlane.f32.xlu0 %v3633_v63  ;;  %v3514_v21 = vpop.xlane.xlu1 %3513 }
 0x45c   : > { %v3670_v48 = vpop.xlane.xlu0 %3669  ;;  %v3532_v53 = vadd.f32 %v3514_v21, %v3479_v22  ;;  %v4104_v21 = vsel %vm798_vm0, %v4086_v2, 0.0 }
 0x45d   : > { %v3690_v20 = vadd.f32 %v3670_v48, %v7531_v11  ;;  %v3998_v11 = vsel %vm798_vm0, %v3980_v17, 0.0  ;;  %v3397_v48 = vmul.f32 %v7175_v9, %v7601_v60  ;;  %v4157_v17 = vsel %vm798_vm0, %v4139_v24, 0.0 }
 0x45e   : > { %3896 = vadd.xlane.f32.xlu1 %v3895_v42  ;;  %v3133_v9 = vmul.f32 %v7161_v5, %v7601_v60  ;;  %v7626_v5 = vld [vmem:[#allocation2 + $0x63] sm:$0xff] }
 0x45f   : > { %3946 = vadd.xlane.f32.xlu0 %v3945_v49  ;;  %v3567_v44 = vpop.xlane.xlu1 %3566  ;;  %v3556_v2 = vmul.f32 %v7217_v4, %v7626_v5  ;;  %v3292_v4 = vmul.f32 %v7183_v16, %v7626_v5 }
 0x460   : > { %v3723_v25 = vpop.xlane.xlu0 %3722  ;;  %v3585_v61 = vadd.f32 %v3567_v44, %v3532_v53  ;;  %v7609_v53 = vld [vmem:[#allocation2 + $0x61] sm:$0xff]  ;;  %v3153_v6 = vsel %vm798_vm0, %v3133_v9, 0.0 }
 0x461   : > { %v3743_v7 = vadd.f32 %v3723_v25, %v3690_v20  ;;  %v3450_v44 = vmul.f32 %v7189_v55, %v7609_v53  ;;  %v7617_v25 = vld [vmem:[#allocation2 + $0x62] sm:$0xff]  ;;  %v3186_v55 = vmul.f32 %v7155_v31, %v7609_v53 }
 0x462   : > { %3999 = vadd.xlane.f32.xlu1 %v3998_v11  ;;  %v7634_v31 = vld [vmem:[#allocation2 + $0x64] sm:$0xff] }
 0x463   : > { %4208 = vadd.xlane.f32.xlu0 %v4207_v54  ;;  %v3620_v43 = vpop.xlane.xlu1 %3619  ;;  %v3468_v36 = vsel %vm798_vm0, %v3450_v44, 0.0  ;;  %v3206_v15 = vsel %vm798_vm0, %v3186_v55, 0.0 }
 0x464   : > { %v3776_v59 = vpop.xlane.xlu0 %3775  ;;  %v7593_v47 = vadd.f32 %v3620_v43, %v3585_v61  ;;  %v3503_v43 = vmul.f32 %v7203_v37, %v7617_v25  ;;  %v3239_v37 = vmul.f32 %v7169_v0, %v7617_v25 }
 0x465   : > { %v3796_v38 = vadd.f32 %v3776_v59, %v3743_v7 }
 0x466   : > { %4052 = vadd.xlane.f32.xlu1 %v4051_v18 }
 0x467   : > { %4261 = vadd.xlane.f32.xlu0 %v4260_v33  ;;  %v3932_v22 = vpop.xlane.xlu1 %3931 }
 0x468   : > { %v3829_v63 = vpop.xlane.xlu0 %3828  ;;  %v3954_v26 = vadd.f32 %v3932_v22, %v3901_v56  ;;  %v3415_v56 = vsel %vm798_vm0, %v3397_v48, 0.0  ;;  %v3609_v48 = vmul.f32 %v7231_v19, %v7634_v31 }
 0x469   : > { %v3849_v12 = vadd.f32 %v3829_v63, %v3796_v38 }
 0x46a   : > { %4105 = vadd.xlane.f32.xlu1 %v4104_v21  ;;  %v3259_v21 = vsel %vm798_vm0, %v3239_v37, 0.0 }
 0x46b   : > { %4314 = vadd.xlane.f32.xlu0 %v4313_v10  ;;  %v3985_v20 = vpop.xlane.xlu1 %3984  ;;  %v3574_v10 = vsel %vm798_vm0, %v3556_v2, 0.0 }
 0x46c   : > { %v3882_v49 = vpop.xlane.xlu0 %3881  ;;  %v4007_v42 = vadd.f32 %v3985_v20, %v3954_v26 }
 0x46d   : > { %v3902_v1 = vadd.f32 %v3882_v49, %v3849_v12  ;;  %v3627_v49 = vsel %vm798_vm0, %v3609_v48, 0.0 }
 0x46e   : > { %4158 = vadd.xlane.f32.xlu1 %v4157_v17  ;;  %v3345_v17 = vmul.f32 %v7197_v34, %v7634_v31 }
 0x46f   : > { %3416 = vadd.xlane.f32.xlu0 %v3415_v56  ;;  %v4038_v61 = vpop.xlane.xlu1 %4037  ;;  %v3925_v56 = vmul.f32 %v7286_v3, %v7601_v60 }
 0x470   : > { %v3411_v7 = vpop.xlane.xlu0 %3410  ;;  %v4060_v54 = vadd.f32 %v4038_v61, %v4007_v42  ;;  %v3312_v42 = vsel %vm798_vm0, %v3292_v4, 0.0 }
 0x471   : > { %v3427_v11 = vadd.f32 %v3411_v7, %v7572_v52  ;;  %v3521_v52 = vsel %vm798_vm0, %v3503_v43, 0.0  ;;  %v3939_v61 = vsel %vm798_vm0, %v3925_v56, 0.0  ;;  %v3365_v7 = vsel %vm798_vm0, %v3345_v17, 0.0 }
 0x472   : > { %3154 = vadd.xlane.f32.xlu1 %v3153_v6 }
 0x473   : > { %3469 = vadd.xlane.f32.xlu0 %v3468_v36  ;;  %v4091_v59 = vpop.xlane.xlu1 %4090 }
 0x474   : > { %v3464_v38 = vpop.xlane.xlu0 %3463  ;;  %v4113_v33 = vadd.f32 %v4091_v59, %v4060_v54  ;;  %v3978_v54 = vmul.f32 %v7295_v40, %v7609_v53 }
 0x475   : > { %v3480_v18 = vadd.f32 %v3464_v38, %v3427_v11  ;;  %v3661_v11 = vmul.f32 %v7209_v45, %v7601_v60  ;;  %v4031_v38 = vmul.f32 %v7306_v13, %v7617_v25 }
 0x476   : > { %3207 = vadd.xlane.f32.xlu1 %v3206_v15  ;;  %v3992_v55 = vsel %vm798_vm0, %v3978_v54, 0.0  ;;  %v7687_v54 = vld [vmem:[#allocation2 + $0x91] sm:$0xff] }
 0x477   : > { %3522 = vadd.xlane.f32.xlu0 %v3521_v52  ;;  %v4144_v22 = vpop.xlane.xlu1 %4143  ;;  %v3677_v59 = vsel %vm798_vm0, %v3661_v11, 0.0  ;;  %v4045_v37 = vsel %vm798_vm0, %v4031_v38, 0.0 }
 0x478   : > { %v3517_v63 = vpop.xlane.xlu0 %3516  ;;  %v7636_v26 = vadd.f32 %v4144_v22, %v4113_v33  ;;  %v3714_v33 = vmul.f32 %v7223_v23, %v7609_v53  ;;  %v4084_v22 = vmul.f32 %v7318_v29, %v7626_v5 }
 0x479   : > { %v3533_v12 = vadd.f32 %v3517_v63, %v3480_v18  ;;  %v3767_v63 = vmul.f32 %v7237_v58, %v7617_v25 }
 0x47a   : > { %3260 = vadd.xlane.f32.xlu1 %v3259_v21  ;;  %v4098_v4 = vsel %vm798_vm0, %v4084_v22, 0.0 }
 0x47b   : > { %3575 = vadd.xlane.f32.xlu0 %v3574_v10  ;;  %v3149_v24 = vpop.xlane.xlu1 %3148 }
 0x47c   : > { %v3570_v0 = vpop.xlane.xlu0 %3569 }
 0x47d   : > { %v3586_v20 = vadd.f32 %v3570_v0, %v3533_v12  ;;  %v3783_v0 = vsel %vm798_vm0, %v3767_v63, 0.0 }
 0x47e   : > { %3313 = vadd.xlane.f32.xlu1 %v3312_v42 }
 0x47f   : > { %3628 = vadd.xlane.f32.xlu0 %v3627_v49  ;;  %v3202_v44 = vpop.xlane.xlu1 %3201  ;;  %v7678_v49 = vld [vmem:[#allocation2 + $0x90] sm:$0xff] }
 0x480   : > { %v3623_v19 = vpop.xlane.xlu0 %3622  ;;  %v3216_v9 = vadd.f32 %v3202_v44, %v3149_v24  ;;  %v4137_v24 = vmul.f32 %v7330_v28, %v7634_v31 }
 0x481   : > { %v7650_v16 = vadd.f32 %v3623_v19, %v3586_v20  ;;  %v3820_v20 = vmul.f32 %v7246_v32, %v7626_v5 }
 0x482   : > { %3366 = vadd.xlane.f32.xlu1 %v3365_v7  ;;  %v4151_v44 = vsel %vm798_vm0, %v4137_v24, 0.0  ;;  %v3873_v7 = vmul.f32 %v7255_v57, %v7634_v31 }
 0x483   : > { %3940 = vadd.xlane.f32.xlu0 %v3939_v61  ;;  %v3255_v36 = vpop.xlane.xlu1 %3254  ;;  %v3664_v61 = vmul.f32 %v7209_v45, %v7678_v49  ;;  %v4189_v45 = vmul.f32 %v7414_v41, %v7601_v60  ;;  %v7705_v60 = vld [vmem:[#allocation2 + $0x93] sm:$0xff] }
 0x484   : > { %v3935_v34 = vpop.xlane.xlu0 %3934  ;;  %v3269_v43 = vadd.f32 %v3255_v36, %v3216_v9  ;;  %v3836_v9 = vsel %vm798_vm0, %v3820_v20, 0.0 }
 0x485   : > { %v3955_v6 = vadd.f32 %v3935_v34, %v3902_v1  ;;  %v3730_v1 = vsel %vm798_vm0, %v3714_v33, 0.0 }
 0x486   : > { %3678 = vadd.xlane.f32.xlu1 %v3677_v59  ;;  %v7697_v59 = vld [vmem:[#allocation2 + $0x92] sm:$0xff] }
 0x487   : > { %3993 = vadd.xlane.f32.xlu0 %v3992_v55  ;;  %v3308_v52 = vpop.xlane.xlu1 %3307  ;;  %v3717_v55 = vmul.f32 %v7223_v23, %v7687_v54  ;;  %v4242_v23 = vmul.f32 %v7427_v50, %v7609_v53  ;;  %v7713_v53 = vld [vmem:[#allocation2 + $0x94] sm:$0xff] }
 0x488   : > { %v3988_v18 = vpop.xlane.xlu0 %3987  ;;  %v3322_v2 = vadd.f32 %v3308_v52, %v3269_v43  ;;  %v3889_v43 = vsel %vm798_vm0, %v3873_v7, 0.0 }
 0x489   : > { %v4008_v15 = vadd.f32 %v3988_v18, %v3955_v6  ;;  %v3739_v52 = vsel %vm798_vm0, %v3717_v55, 0.0 }
 0x48a   : > { %3731 = vadd.xlane.f32.xlu1 %v3730_v1 }
 0x48b   : > { %4046 = vadd.xlane.f32.xlu0 %v4045_v37  ;;  %v3361_v10 = vpop.xlane.xlu1 %3360 }
 0x48c   : > { %v4041_v12 = vpop.xlane.xlu0 %4040  ;;  %v7670_v48 = vadd.f32 %v3361_v10, %v3322_v2  ;;  %v3770_v2 = vmul.f32 %v7237_v58, %v7697_v59  ;;  %v4254_v10 = vsel %vm798_vm0, %v4242_v23, 0.0  ;;  %v4295_v58 = vmul.f32 %v7434_v14, %v7617_v25  ;;  %v7723_v25 = vld [vmem:[#allocation2 + $0x70] sm:$0xff] }
 0x48d   : > { %v4061_v21 = vadd.f32 %v4041_v12, %v4008_v15  ;;  %v4201_v15 = vsel %vm798_vm0, %v4189_v45, 0.0 }
 0x48e   : > { %3784 = vadd.xlane.f32.xlu1 %v3783_v0  ;;  %v3792_v12 = vsel %vm798_vm0, %v3770_v2, 0.0 }
 0x48f   : > { %4099 = vadd.xlane.f32.xlu0 %v4098_v4  ;;  %v3673_v56 = vpop.xlane.xlu1 %3672 }
 0x490   : > { %v4094_v42 = vpop.xlane.xlu0 %4093  ;;  %v3691_v19 = vadd.f32 %v3673_v56, %v7593_v47  ;;  %v3686_v47 = vsel %vm798_vm0, %v3664_v61, 0.0  ;;  %v4307_v56 = vsel %vm798_vm0, %v4295_v58, 0.0 }
 0x491   : > { %v4114_v17 = vadd.f32 %v4094_v42, %v4061_v21  ;;  %v3823_v21 = vmul.f32 %v7246_v32, %v7705_v60  ;;  %v4348_v32 = vmul.f32 %v7445_v46, %v7626_v5  ;;  %v3928_v5 = vmul.f32 %v7286_v3, %v7678_v49 }
 0x492   : > { %3837 = vadd.xlane.f32.xlu1 %v3836_v9  ;;  %v3981_v3 = vmul.f32 %v7295_v40, %v7687_v54  ;;  %v4034_v40 = vmul.f32 %v7306_v13, %v7697_v59  ;;  %v4087_v13 = vmul.f32 %v7318_v29, %v7705_v60  ;;  %v4140_v29 = vmul.f32 %v7330_v28, %v7713_v53 }
 0x493   : > { %4152 = vadd.xlane.f32.xlu0 %v4151_v44  ;;  %v3726_v34 = vpop.xlane.xlu1 %3725  ;;  %v3845_v42 = vsel %vm798_vm0, %v3823_v21, 0.0 }
 0x494   : > { %v4147_v11 = vpop.xlane.xlu0 %4146  ;;  %v3744_v6 = vadd.f32 %v3726_v34, %v3691_v19 }
 0x495   : > { %v7689_v36 = vadd.f32 %v4147_v11, %v4114_v17  ;;  %v3876_v17 = vmul.f32 %v7255_v57, %v7713_v53  ;;  %v4360_v11 = vsel %vm798_vm0, %v4348_v32, 0.0  ;;  %v5727_v57 = vld [vmem:[%s8089_s5] ss:$0 sm:$0xff] }
 0x496   : > { %3890 = vadd.xlane.f32.xlu1 %v3889_v43  ;;  %v3134_v34 = vmul.f32 %v5727_v57, %v7723_v25 }
 0x497   : > { %3687 = vadd.xlane.f32.xlu0 %v3686_v47  ;;  %v3779_v33 = vpop.xlane.xlu1 %3778  ;;  %v3898_v7 = vsel %vm798_vm0, %v3876_v17, 0.0  ;;  %v7767_v17 = vld [vmem:[#allocation2 + $0x74] sm:$0xff] }
 0x498   : > { %v3152_v38 = vpop.xlane.xlu0 %3151  ;;  %v3797_v18 = vadd.f32 %v3779_v33, %v3744_v6  ;;  %v7734_v6 = vld [vmem:[#allocation2 + $0x71] sm:$0xff]  ;;  %v3156_v45 = vsel %vm798_vm0, %v3134_v34, 0.0  ;;  %v5728_v33 = vld [vmem:[%s8089_s5 + $0x1] ss:$0 sm:$0xff] }
 0x49a   : > { %4202 = vadd.xlane.f32.xlu1 %v4201_v15 }
 0x49b   : > { %3740 = vadd.xlane.f32.xlu0 %v3739_v52  ;;  %v3832_v1 = vpop.xlane.xlu1 %3831  ;;  %v7746_v52 = vld [vmem:[#allocation2 + $0x72] sm:$0xff] }
 0x49c   : > { %v3205_v37 = vpop.xlane.xlu0 %3204  ;;  %v3850_v63 = vadd.f32 %v3832_v1, %v3797_v18  ;;  %v3187_v18 = vmul.f32 %v5728_v33, %v7734_v6  ;;  %v4192_v33 = vmul.f32 %v7414_v41, %v7678_v49  ;;  %v4245_v41 = vmul.f32 %v7427_v50, %v7687_v54 }
 0x49d   : > { %v3217_v22 = vadd.f32 %v3205_v37, %v3152_v38  ;;  %v3948_v38 = vsel %vm798_vm0, %v3928_v5, 0.0 }
 0x49e   : > { %4255 = vadd.xlane.f32.xlu1 %v4254_v10  ;;  %v3209_v1 = vsel %vm798_vm0, %v3187_v18, 0.0  ;;  %v7757_v10 = vld [vmem:[#allocation2 + $0x73] sm:$0xff] }
 0x49f   : > { %3793 = vadd.xlane.f32.xlu0 %v3792_v12  ;;  %v3885_v0 = vpop.xlane.xlu1 %3884 }
 0x4a0   : > { %v3258_v4 = vpop.xlane.xlu0 %3257  ;;  %v7715_v20 = vadd.f32 %v3885_v0, %v3850_v63  ;;  %v5729_v63 = vld [vmem:[%s8089_s5 + $0x2] ss:$0 sm:$0xff] }
 0x4a1   : > { %v3270_v24 = vadd.f32 %v3258_v4, %v3217_v22  ;;  %v4001_v22 = vsel %vm798_vm0, %v3981_v3, 0.0  ;;  %v3240_v12 = vmul.f32 %v5729_v63, %v7746_v52  ;;  %v5733_v63 = vld [vmem:[%s8089_s5 + $0xb] ss:$0 sm:$0xff] }
 0x4a2   : > { %4308 = vadd.xlane.f32.xlu1 %v4307_v56 }
 0x4a3   : > { %3846 = vadd.xlane.f32.xlu0 %v3845_v42  ;;  %v4197_v44 = vpop.xlane.xlu1 %4196  ;;  %v3262_v0 = vsel %vm798_vm0, %v3240_v12, 0.0  ;;  %v5730_v42 = vld [vmem:[%s8089_s5 + $0x3] ss:$0 sm:$0xff]  ;;  %v3715_v12 = vmul.f32 %v5733_v63, %v7734_v6 }
 0x4a4   : > { %v3311_v19 = vpop.xlane.xlu0 %3310  ;;  %v4219_v61 = vadd.f32 %v4197_v44, %v7636_v26  ;;  %v3293_v56 = vmul.f32 %v5730_v42, %v7757_v10 }
 0x4a5   : > { %v3323_v9 = vadd.f32 %v3311_v19, %v3270_v24  ;;  %v4054_v24 = vsel %vm798_vm0, %v4034_v40, 0.0  ;;  %v4298_v40 = vmul.f32 %v7434_v14, %v7697_v59  ;;  %v5735_v59 = vld [vmem:[%s8089_s5 + $0x5] ss:$0 sm:$0xff] }
 0x4a6   : > { %4361 = vadd.xlane.f32.xlu1 %v4360_v11  ;;  %v5731_v11 = vld [vmem:[%s8089_s5 + $0x4] ss:$0 sm:$0xff]  ;;  %v3398_v42 = vmul.f32 %v5735_v59, %v7723_v25 }
 0x4a7   : > { %3899 = vadd.xlane.f32.xlu0 %v3898_v7  ;;  %v4250_v43 = vpop.xlane.xlu1 %4249  ;;  %v4107_v7 = vsel %vm798_vm0, %v4087_v13, 0.0  ;;  %v3346_v57 = vmul.f32 %v5731_v11, %v7767_v17 }
 0x4a8   : > { %v3364_v47 = vpop.xlane.xlu0 %3363  ;;  %v4272_v55 = vadd.f32 %v4250_v43, %v4219_v61  ;;  %v3315_v61 = vsel %vm798_vm0, %v3293_v56, 0.0 }
 0x4a9   : > { %v7736_v26 = vadd.f32 %v3364_v47, %v3323_v9 }
 0x4aa   : > { %3949 = vadd.xlane.f32.xlu1 %v3948_v38  ;;  %v4350_v38 = vmul.f32 %v7445_v46, %v7555_v8 }
 0x4ab   : > { %3157 = vadd.xlane.f32.xlu0 %v3156_v45  ;;  %v4303_v2 = vpop.xlane.xlu1 %4302  ;;  %v4160_v45 = vsel %vm798_vm0, %v4140_v29, 0.0 }
 0x4ac   : > { %v3676_v15 = vpop.xlane.xlu0 %3675  ;;  %v4325_v37 = vadd.f32 %v4303_v2, %v4272_v55  ;;  %v3368_v55 = vsel %vm798_vm0, %v3346_v57, 0.0  ;;  %v4366_v2 = vsel %vm798_vm0, %v4350_v38, 0.0  ;;  %v5739_v38 = vld [vmem:[%s8089_s5 + $0x7] ss:$0 sm:$0xff] }
 0x4ad   : > { %v3692_v23 = vadd.f32 %v3676_v15, %v7650_v16 }
 0x4ae   : > { %4002 = vadd.xlane.f32.xlu1 %v4001_v22  ;;  %v4263_v22 = vsel %vm798_vm0, %v4245_v41, 0.0 }
 0x4af   : > { %3210 = vadd.xlane.f32.xlu0 %v3209_v1  ;;  %v4356_v16 = vpop.xlane.xlu1 %4355 }
 0x4b0   : > { %v3729_v21 = vpop.xlane.xlu0 %3728  ;;  %v4378_v4 = vadd.f32 %v4356_v16, %v4325_v37 }
 0x4b1   : > { %v3745_v58 = vadd.f32 %v3729_v21, %v3692_v23  ;;  %v5732_v23 = vld [vmem:[%s8089_s5 + $0xa] ss:$0 sm:$0xff] }
 0x4b2   : > { %4055 = vadd.xlane.f32.xlu1 %v4054_v24  ;;  %v3662_v46 = vmul.f32 %v5732_v23, %v7723_v25 }
 0x4b3   : > { %3263 = vadd.xlane.f32.xlu0 %v3262_v0  ;;  %v4409_v19 = vpop.xlane.xlu1 %4408  ;;  %v5734_v0 = vld [vmem:[%s8089_s5 + $0xc] ss:$0 sm:$0xff] }
 0x4b4   : > { %v3782_v32 = vpop.xlane.xlu0 %3781  ;;  %v7769_v9 = vadd.f32 %v4409_v19, %v4378_v4  ;;  %v3680_v1 = vsel %vm798_vm0, %v3662_v46, 0.0  ;;  %v4316_v4 = vsel %vm798_vm0, %v4298_v40, 0.0  ;;  %v3768_v24 = vmul.f32 %v5734_v0, %v7746_v52 }
 0x4b5   : > { %v3798_v44 = vadd.f32 %v3782_v32, %v3745_v58  ;;  %v3733_v58 = vsel %vm798_vm0, %v3715_v12, 0.0  ;;  %v3418_v19 = vsel %vm798_vm0, %v3398_v42, 0.0  ;;  %v4403_v0 = vmul.f32 %v7456_v62, %v7563_v35 }
 0x4b6   : > { %4108 = vadd.xlane.f32.xlu1 %v4107_v7  ;;  %v3786_v32 = vsel %vm798_vm0, %v3768_v24, 0.0  ;;  %v5737_v7 = vld [vmem:[%s8089_s5 + $0x6] ss:$0 sm:$0xff]  ;;  %v5741_v24 = vld [vmem:[%s8089_s5 + $0x9] ss:$0 sm:$0xff] }
 0x4b7   : > { %3316 = vadd.xlane.f32.xlu0 %v3315_v61  ;;  %v3414_v5 = vpop.xlane.xlu1 %3413  ;;  %v3451_v11 = vmul.f32 %v5737_v7, %v7734_v6 }
 0x4b8   : > { %v3835_v34 = vpop.xlane.xlu0 %3834  ;;  %v3428_v43 = vadd.f32 %v3414_v5, %v7670_v48  ;;  %v4210_v48 = vsel %vm798_vm0, %v4192_v33, 0.0  ;;  %v4288_v5 = vld [vmem:[#allocation2 + $0xb2] sm:$0xff]  ;;  %v3504_v33 = vmul.f32 %v5739_v38, %v7746_v52 }
 0x4b9   : > { %v3851_v47 = vadd.f32 %v3835_v34, %v3798_v44  ;;  %v5736_v44 = vld [vmem:[%s8089_s5 + $0xd] ss:$0 sm:$0xff]  ;;  %v4300_v23 = vmul.f32 %v7434_v14, %v4288_v5 }
 0x4ba   : > { %4161 = vadd.xlane.f32.xlu1 %v4160_v45  ;;  %v3821_v61 = vmul.f32 %v5736_v44, %v7757_v10 }
 0x4bb   : > { %3369 = vadd.xlane.f32.xlu0 %v3368_v55  ;;  %v3467_v18 = vpop.xlane.xlu1 %3466  ;;  %v5738_v55 = vld [vmem:[%s8089_s5 + $0xe] ss:$0 sm:$0xff] }
 0x4bc   : > { %v3888_v28 = vpop.xlane.xlu0 %3887  ;;  %v3481_v15 = vadd.f32 %v3467_v18, %v3428_v43  ;;  %v3471_v43 = vsel %vm798_vm0, %v3451_v11, 0.0  ;;  %v3874_v45 = vmul.f32 %v5738_v55, %v7767_v17 }
 0x4bd   : > { %v7786_v3 = vadd.f32 %v3888_v28, %v3851_v47  ;;  %v3839_v47 = vsel %vm798_vm0, %v3821_v61, 0.0  ;;  %v8114_v28 = vlaneseq  ;;  %v4404_v61 = vmul.f32 %v7456_v62, %v7713_v53  ;;  %v5743_v53 = vld [vmem:[%s8089_s5 + $0xf] ss:$0 sm:$0xff] }
 0x4be   : > { %4211 = vadd.xlane.f32.xlu1 %v4210_v48  ;;  %v3892_v41 = vsel %vm798_vm0, %v3874_v45, 0.0  ;;  %v5744_v45 = vld [vmem:[%s8089_s5 + $0x12] ss:$0 sm:$0xff] }
 0x4bf   : > { %4367 = vadd.xlane.f32.xlu0 %v4366_v2  ;;  %v3520_v49 = vpop.xlane.xlu1 %3519  ;;  %v7840_v18 = vshrl.u32 %v8114_v28, 7  ;;  %v4085_v38 = vmul.f32 %v5744_v45, %v7757_v10 }
 0x4c0   : > { %v4044_v8 = vpop.xlane.xlu0 %4043  ;;  %v3534_v37 = vadd.f32 %v3520_v49, %v3481_v15  ;;  %v3524_v49 = vsel %vm798_vm0, %v3504_v33, 0.0  ;;  %v5745_v33 = vld [vmem:[%s8089_s5 + $0x10] ss:$0 sm:$0xff] }
 0x4c1   : > { %v3979_v28 = vmul.f32 %v5745_v33, %v7734_v6 }
 0x4c2   : > { %4264 = vadd.xlane.f32.xlu1 %v4263_v22  ;;  %v8115_v22 = vld [vmem:[#allocation5_spill] sm:$0xff] }
 0x4c3   : > { %3681 = vadd.xlane.f32.xlu0 %v3680_v1  ;;  %v3573_v54 = vpop.xlane.xlu1 %3572 }
 0x4c4   : > { %v4200_v50 = vpop.xlane.xlu0 %4199  ;;  %v7805_v16 = vadd.f32 %v3573_v54, %v3534_v37  ;;  %v5740_v37 = vld [vmem:[%s8089_s5 + $0x8] ss:$0 sm:$0xff]  ;;  %v4322_v54 = vsel %vm798_vm0, %v4300_v23, 0.0  ;;  %v3995_v23 = vsel %vm798_vm0, %v3979_v28, 0.0  ;;  %v4394_v28 = vld [vmem:[#allocation2 + $0xb4] sm:$0xff] }
 0x4c5   : > { %v4220_v21 = vadd.f32 %v4200_v50, %v7689_v36  ;;  %v3557_v1 = vmul.f32 %v5740_v37, %v7757_v10 }
 0x4c6   : > { %4317 = vadd.xlane.f32.xlu1 %v4316_v4 }
 0x4c7   : > { %3734 = vadd.xlane.f32.xlu0 %v3733_v58  ;;  %v7817_v56 = vpop.xlane.xlu1 %3625  ;;  %v4287_v58 = vld [vmem:[#allocation2 + $0xa2] sm:$0xff]  ;;  %v3577_v4 = vsel %vm798_vm0, %v3557_v1, 0.0 }
 0x4c8   : > { %v4253_v36 = vpop.xlane.xlu0 %4252 }
 0x4c9   : > { %v4273_v13 = vadd.f32 %v4253_v36, %v4220_v21 }
 0x4ca   : > { %3419 = vadd.xlane.f32.xlu1 %v3418_v19  ;;  %v4419_v19 = vsel %vm798_vm0, %v4403_v0, 0.0 }
 0x4cb   : > { %3787 = vadd.xlane.f32.xlu0 %v3786_v32  ;;  %v3938_v29 = vpop.xlane.xlu1 %3937  ;;  %v4299_v32 = vmul.f32 %v7434_v14, %v4287_v58  ;;  %v5742_v14 = vld [vmem:[%s8089_s5 + $0x11] ss:$0 sm:$0xff] }
 0x4cc   : > { %v4306_v57 = vpop.xlane.xlu0 %4305  ;;  %v3956_v15 = vadd.f32 %v3938_v29, %v7715_v20  ;;  %v7852_v20 = vsub.s32 %v8115_v22, %v7840_v18  ;;  %v4032_v29 = vmul.f32 %v5742_v14, %v7746_v52  ;;  %v4340_v22 = vld [vmem:[#allocation2 + $0xa3] sm:$0xff] }
 0x4cd   : > { %v4326_v34 = vadd.f32 %v4306_v57, %v4273_v13  ;;  %v4319_v11 = vsel %vm798_vm0, %v4299_v32, 0.0  ;;  %v4422_v57 = vsel %vm798_vm0, %v4404_v61, 0.0  ;;  %v4393_v61 = vld [vmem:[#allocation2 + $0xa4] sm:$0xff] }
 0x4ce   : > { %3472 = vadd.xlane.f32.xlu1 %v3471_v43  ;;  %v4450_v59 = vrot.slane %v7769_v9, %v7852_v20  ;;  %v4048_v43 = vsel %vm798_vm0, %v4032_v29, 0.0 }
 0x4cf   : > { %3840 = vadd.xlane.f32.xlu0 %v3839_v47  ;;  %v3991_v48 = vpop.xlane.xlu1 %3990 }
 0x4d0   : > { %v4359_v2 = vpop.xlane.xlu0 %4358  ;;  %v4009_v46 = vadd.f32 %v3991_v48, %v3956_v15  ;;  %v4101_v48 = vsel %vm798_vm0, %v4085_v38, 0.0 }
 0x4d1   : > { %v4379_v63 = vadd.f32 %v4359_v2, %v4326_v34  ;;  %v3926_v34 = vmul.f32 %v5743_v53, %v7723_v25 }
 0x4d2   : > { %3525 = vadd.xlane.f32.xlu1 %v3524_v49  ;;  %v7854_v12 = vadd.f32 %v4044_v8, %v4009_v46  ;;  %v3610_v8 = vmul.f32 %v5741_v24, %v7767_v17  ;;  %v5746_v46 = vld [vmem:[%s8089_s5 + $0x13] ss:$0 sm:$0xff]  ;;  %v4401_v49 = vmul.f32 %v7456_v62, %v7634_v31  ;;  %v5748_v62 = vld [vmem:[%s8089_s5 + $0x17] ss:$0 sm:$0xff] }
 0x4d3   : > { %3893 = vadd.xlane.f32.xlu0 %v3892_v41  ;;  %v7856_v50 = vpop.xlane.xlu1 %4096  ;;  %v3942_v55 = vsel %vm798_vm0, %v3926_v34, 0.0  ;;  %v4138_v41 = vmul.f32 %v5746_v46, %v7767_v17  ;;  %v4351_v31 = vmul.f32 %v5748_v62, %v7705_v60  ;;  %v4352_v0 = vmul.f32 %v5748_v62, %v4340_v22  ;;  %v4341_v24 = vld [vmem:[#allocation2 + $0xb3] sm:$0xff] }
 0x4d4   : > { %v4412_v40 = vpop.xlane.xlu0 %4411  ;;  %v3630_v44 = vsel %vm798_vm0, %v3610_v8, 0.0  ;;  %v5751_v34 = vld [vmem:[%s8089_s5 + $0x18] ss:$0 sm:$0xff]  ;;  %v4349_v45 = vmul.f32 %v5748_v62, %v7757_v10 }
 0x4d5   : > { %v4432_v21 = vadd.f32 %v4412_v40, %v4379_v63  ;;  %v4154_v63 = vsel %vm798_vm0, %v4138_v41, 0.0  ;;  %v4413_v40 = vsel %vm798_vm0, %v4401_v49, 0.0  ;;  %v4406_v49 = vmul.f32 %v5751_v34, %v4394_v28 }
 0x4d6   : > { %3578 = vadd.xlane.f32.xlu1 %v3577_v4 }
 0x4d7   : > { %v4454_v42 = vrot.slane %v4432_v21, %v7852_v20  ;;  %4323 = vadd.xlane.f32.xlu0 %v4322_v54  ;;  %v7871_v13 = vpop.xlane.xlu1 %4149  ;;  %v5747_v54 = vld [vmem:[%s8089_s5 + $0x14] ss:$0 sm:$0xff] }
 0x4d8   : > { %v7869_v36 = vpop.xlane.xlu0 %3422  ;;  %v4190_v21 = vmul.f32 %v5747_v54, %v7723_v25  ;;  %v5749_v25 = vld [vmem:[%s8089_s5 + $0x15] ss:$0 sm:$0xff]  ;;  %v4428_v54 = vsel %vm798_vm0, %v4406_v49, 0.0 }
 0x4d9   : > { %v7874_v35 = vsel %vm4479_vm4, %v4454_v42, %v4450_v59  ;;  %v4369_v59 = vsel %vm798_vm0, %v4351_v31, 0.0  ;;  %v4243_v42 = vmul.f32 %v5749_v25, %v7734_v6 }
 0x4da   : > { %3631 = vadd.xlane.f32.xlu1 %v3630_v44  ;;  %v4204_v8 = vsel %vm798_vm0, %v4190_v21, 0.0  ;;  %v4353_v44 = vmul.f32 %v5748_v62, %v4341_v24 }
 0x4db   : > { %4420 = vadd.xlane.f32.xlu0 %v4419_v19  ;;  %v7882_v7 = vpop.xlane.xlu1 %3684  ;;  %v4372_v19 = vsel %vm798_vm0, %v4352_v0, 0.0 }
 0x4dc   : > { %v7880_v9 = vpop.xlane.xlu0 %3475  ;;  %v4375_v53 = vsel %vm798_vm0, %v4353_v44, 0.0  ;;  %v5763_v44 = vmov 0  }
 0x4dd   : > { %5533 = vset.pattern.permute.xlu1 %v5763_v44  ;;  %5534 = vset.pattern.permute.xlu0 %v5763_v44 }
 0x4de   : > { %4320 = vadd.xlane.f32.xlu1 %v4319_v11  ;;  %v4257_v11 = vsel %vm798_vm0, %v4243_v42, 0.0  ;;  %v4585_v42 = vld [vmem:[#allocation4] sm:$0x1] }
 0x4df   : > { %4423 = vadd.xlane.f32.xlu0 %v4422_v57  ;;  %v7896_v47 = vpop.xlane.xlu1 %3737  ;;  %v5750_v57 = vld [vmem:[%s8089_s5 + $0x16] ss:$0 sm:$0xff] }
 0x4e0   : > { %v7894_v5 = vpop.xlane.xlu0 %3528  ;;  %v4296_v14 = vmul.f32 %v5750_v57, %v7746_v52 }
 0x4e2   : > { %3943 = vadd.xlane.f32.xlu1 %v3942_v55  ;;  %v4310_v55 = vsel %vm798_vm0, %v4296_v14, 0.0 }
 0x4e3   : > { %4049 = vadd.xlane.f32.xlu0 %v4048_v43  ;;  %v7910_v2 = vpop.xlane.xlu1 %3790  ;;  %v4405_v43 = vmul.f32 %v5751_v34, %v4393_v61 }
 0x4e4   : > { %v7908_v15 = vpop.xlane.xlu0 %3581 }
 0x4e5   : > { %v4425_v33 = vsel %vm798_vm0, %v4405_v43, 0.0  ;;  %v3640_v43 = vadd.f32 %v7817_v56, %v7805_v16  ;;  %v4115_v16 = vadd.f32 %v7856_v50, %v7854_v12 }
 0x4e6   : > { %3996 = vadd.xlane.f32.xlu1 %v3995_v23  ;;  %v4402_v23 = vmul.f32 %v5751_v34, %v7767_v17 }
 0x4e7   : > { %4102 = vadd.xlane.f32.xlu0 %v4101_v48  ;;  %v7922_v1 = vpop.xlane.xlu1 %3843  ;;  %v4363_v48 = vsel %vm798_vm0, %v4349_v45, 0.0 }
 0x4e8   : > { %v7920_v37 = vpop.xlane.xlu0 %3634  ;;  %v4416_v22 = vsel %vm798_vm0, %v4402_v23, 0.0  ;;  %vm4581_vm0 = vcmask 392192  }
 0x4ea   : > { %4414 = vadd.xlane.f32.xlu1 %v4413_v40 }
 0x4eb   : > { %4155 = vadd.xlane.f32.xlu0 %v4154_v63  ;;  %v7936_v4 = vpop.xlane.xlu1 %3896 }
 0x4ec   : > { %v7934_v58 = vpop.xlane.xlu0 %3946 }
 0x4ee   : > { %4370 = vadd.xlane.f32.xlu1 %v4369_v59 }
 0x4ef   : > { %4205 = vadd.xlane.f32.xlu0 %v4204_v8  ;;  %v7946_v32 = vpop.xlane.xlu1 %3999 }
 0x4f0   : > { %v7944_v60 = vpop.xlane.xlu0 %4208 }
 0x4f2   : > { %4373 = vadd.xlane.f32.xlu1 %v4372_v19 }
 0x4f3   : > { %4258 = vadd.xlane.f32.xlu0 %v4257_v11  ;;  %v7956_v29 = vpop.xlane.xlu1 %4052 }
 0x4f4   : > { %v7954_v6 = vpop.xlane.xlu0 %4261 }
 0x4f6   : > { %4376 = vadd.xlane.f32.xlu1 %v4375_v53 }
 0x4f7   : > { %4311 = vadd.xlane.f32.xlu0 %v4310_v55  ;;  %v7966_v38 = vpop.xlane.xlu1 %4105 }
 0x4f8   : > { %v7964_v52 = vpop.xlane.xlu0 %4314 }
 0x4fa   : > { %4426 = vadd.xlane.f32.xlu1 %v4425_v33 }
 0x4fb   : > { %4364 = vadd.xlane.f32.xlu0 %v4363_v48  ;;  %v7971_v41 = vpop.xlane.xlu1 %4158 }
 0x4fc   : > { %v3417_v46 = vpop.xlane.xlu0 %3416 }
 0x4fd   : > { %v3429_v10 = vadd.f32 %v3417_v46, %v7736_v26 }
 0x4ff   : > { %4417 = vadd.xlane.f32.xlu0 %v4416_v22  ;;  %v3155_v40 = vpop.xlane.xlu1 %3154 }
 0x500   : > { %v3470_v63 = vpop.xlane.xlu0 %3469 }
 0x501   : > { %v3482_v21 = vadd.f32 %v3470_v63, %v3429_v10 }
 0x503   : > { %4429 = vadd.xlane.f32.xlu0 %v4428_v54  ;;  %v3208_v31 = vpop.xlane.xlu1 %3207 }
 0x504   : > { %v3523_v62 = vpop.xlane.xlu0 %3522  ;;  %v3218_v0 = vadd.f32 %v3208_v31, %v3155_v40 }
 0x505   : > { %v3535_v17 = vadd.f32 %v3523_v62, %v3482_v21 }
 0x507   : > { %v3261_v8 = vpop.xlane.xlu1 %3260 }
 0x508   : > { %v3576_v24 = vpop.xlane.xlu0 %3575  ;;  %v3271_v25 = vadd.f32 %v3261_v8, %v3218_v0  ;;  %v4168_v0 = vadd.f32 %v7871_v13, %v4115_v16 }
 0x509   : > { %v3588_v59 = vadd.f32 %v3576_v24, %v3535_v17 }
 0x50b   : > { %v3314_v26 = vpop.xlane.xlu1 %3313  ;;  %4588 = vperm.xlu1 %5533, %v4585_v42  }
 0x50c   : > { %v3629_v19 = vpop.xlane.xlu0 %3628  ;;  %v3324_v11 = vadd.f32 %v3314_v26, %v3271_v25 }
 0x50d   : > { %v7976_v61 = vadd.f32 %v3629_v19, %v3588_v59 }
 0x50f   : > { %v3367_v14 = vpop.xlane.xlu1 %3366 }
 0x510   : > { %v3941_v57 = vpop.xlane.xlu0 %3940  ;;  %v7979_v34 = vadd.f32 %v3367_v14, %v3324_v11 }
 0x511   : > { %v3957_v53 = vadd.f32 %v3941_v57, %v7786_v3 }
 0x513   : > { %v3679_v45 = vpop.xlane.xlu1 %3678 }
 0x514   : > { %v3994_v55 = vpop.xlane.xlu0 %3993  ;;  %v3693_v28 = vadd.f32 %v3679_v45, %v3640_v43 }
 0x515   : > { %v4010_v33 = vadd.f32 %v3994_v55, %v3957_v53 }
 0x517   : > { %v3732_v23 = vpop.xlane.xlu1 %3731 }
 0x518   : > { %v4047_v48 = vpop.xlane.xlu0 %4046  ;;  %v3746_v49 = vadd.f32 %v3732_v23, %v3693_v28 }
 0x519   : > { %v4063_v46 = vadd.f32 %v4047_v48, %v4010_v33 }
 0x51b   : > { %v3785_v22 = vpop.xlane.xlu1 %3784 }
 0x51c   : > { %v4100_v10 = vpop.xlane.xlu0 %4099  ;;  %v3799_v40 = vadd.f32 %v3785_v22, %v3746_v49 }
 0x51d   : > { %v4116_v63 = vadd.f32 %v4100_v10, %v4063_v46 }
 0x51f   : > { %v3838_v21 = vpop.xlane.xlu1 %3837 }
 0x520   : > { %v4153_v54 = vpop.xlane.xlu0 %4152  ;;  %v3852_v62 = vadd.f32 %v3838_v21, %v3799_v40 }
 0x521   : > { %v7983_v3 = vadd.f32 %v4153_v54, %v4116_v63 }
 0x523   : > { %v3891_v17 = vpop.xlane.xlu1 %3890 }
 0x524   : > { %v3688_v31 = vpop.xlane.xlu0 %3687  ;;  %v7987_v56 = vadd.f32 %v3891_v17, %v3852_v62 }
 0x527   : > { %v4203_v8 = vpop.xlane.xlu1 %4202 }
 0x528   : > { %v3741_v24 = vpop.xlane.xlu0 %3740  ;;  %v4221_v59 = vadd.f32 %v4203_v8, %v4168_v0 }
 0x52b   : > { %v4256_v42 = vpop.xlane.xlu1 %4255 }
 0x52c   : > { %v3794_v25 = vpop.xlane.xlu0 %3793  ;;  %v4274_v19 = vadd.f32 %v4256_v42, %v4221_v59 }
 0x52f   : > { %v4309_v44 = vpop.xlane.xlu1 %4308 }
 0x530   : > { %v3847_v26 = vpop.xlane.xlu0 %3846  ;;  %v4327_v11 = vadd.f32 %v4309_v44, %v4274_v19 }
 0x533   : > { %v4362_v14 = vpop.xlane.xlu1 %4361 }
 0x534   : > { %v3900_v57 = vpop.xlane.xlu0 %3899  ;;  %v7990_v53 = vadd.f32 %v4362_v14, %v4327_v11 }
 0x537   : > { %v7992_v55 = vpop.xlane.xlu1 %3949 }
 0x538   : > { %v3158_v43 = vpop.xlane.xlu0 %3157 }
 0x53b   : > { %v7994_v50 = vpop.xlane.xlu1 %4002 }
 0x53c   : > { %v3211_v12 = vpop.xlane.xlu0 %3210 }
 0x53d   : > { %v3219_v33 = vadd.f32 %v3211_v12, %v3158_v43 }
 0x53f   : > { %v7996_v45 = vpop.xlane.xlu1 %4055 }
 0x540   : > { %v3264_v13 = vpop.xlane.xlu0 %3263 }
 0x541   : > { %v3272_v23 = vadd.f32 %v3264_v13, %v3219_v33 }
 0x543   : > { %v7998_v48 = vpop.xlane.xlu1 %4108 }
 0x544   : > { %v3317_v28 = vpop.xlane.xlu0 %3316 }
 0x545   : > { %v3325_v46 = vadd.f32 %v3317_v28, %v3272_v23 }
 0x547   : > { %v8000_v10 = vpop.xlane.xlu1 %4161 }
 0x548   : > { %v3370_v49 = vpop.xlane.xlu0 %3369 }
 0x549   : > { %v3378_v22 = vadd.f32 %v3370_v49, %v3325_v46 }
 0x54b   : > { %v3431_v63 = vadd.f32 %v7869_v36, %v3378_v22  ;;  %v8005_v54 = vpop.xlane.xlu1 %4211 }
 0x54c   : > { %v8003_v40 = vpop.xlane.xlu0 %4367 }
 0x54d   : > { %v3484_v21 = vadd.f32 %v7880_v9, %v3431_v63 }
 0x54f   : > { %v3537_v62 = vadd.f32 %v7894_v5, %v3484_v21  ;;  %v8009_v16 = vpop.xlane.xlu1 %4264 }
 0x550   : > { %v3682_v17 = vpop.xlane.xlu0 %3681 }
 0x551   : > { %v3590_v0 = vadd.f32 %v7908_v15, %v3537_v62  ;;  %v3694_v5 = vadd.f32 %v3682_v17, %v7976_v61 }
 0x553   : > { %v3643_v8 = vadd.f32 %v7920_v37, %v3590_v0  ;;  %v8013_v42 = vpop.xlane.xlu1 %4317 }
 0x554   : > { %v3735_v59 = vpop.xlane.xlu0 %3734 }
 0x555   : > { %v3696_v19 = vadd.f32 %v3688_v31, %v3643_v8  ;;  %v3747_v23 = vadd.f32 %v3735_v59, %v3694_v5  ;;  %v8117_v5 = vld [vmem:[#allocation8_spill] sm:$0xff] }
 0x557   : > { %v3749_v36 = vadd.f32 %v3741_v24, %v3696_v19  ;;  %v3420_v11 = vpop.xlane.xlu1 %3419 }
 0x558   : > { %v3788_v44 = vpop.xlane.xlu0 %3787  ;;  %v3430_v15 = vadd.f32 %v3420_v11, %v7979_v34 }
 0x559   : > { %v3802_v14 = vadd.f32 %v3794_v25, %v3749_v36  ;;  %v3800_v37 = vadd.f32 %v3788_v44, %v3747_v23  ;;  %v8116_v44 = vld [vmem:[#allocation7_spill] sm:$0xff] }
 0x55b   : > { %v3855_v43 = vadd.f32 %v3847_v26, %v3802_v14  ;;  %v3473_v9 = vpop.xlane.xlu1 %3472 }
 0x55c   : > { %v3841_v12 = vpop.xlane.xlu0 %3840  ;;  %v3483_v46 = vadd.f32 %v3473_v9, %v3430_v15  ;;  %v8118_v15 = vld [vmem:[#allocation10_spill] sm:$0xff] }
 0x55d   : > { %v3908_v13 = vadd.f32 %v3900_v57, %v3855_v43  ;;  %v3853_v24 = vadd.f32 %v3841_v12, %v3800_v37 }
 0x55f   : > { %v3526_v28 = vpop.xlane.xlu1 %3525  ;;  %v3961_v11 = vadd.f32 %v8116_v44, %v3908_v13 }
 0x560   : > { %v3894_v33 = vpop.xlane.xlu0 %3893  ;;  %v3536_v22 = vadd.f32 %v3526_v28, %v3483_v46 }
 0x561   : > { %v3906_v63 = vadd.f32 %v3894_v33, %v3853_v24 }
 0x563   : > { %v3579_v31 = vpop.xlane.xlu1 %3578  ;;  %v3959_v61 = vadd.f32 %v7934_v58, %v3906_v63 }
 0x564   : > { %v8017_v49 = vpop.xlane.xlu0 %4323  ;;  %v3589_v25 = vadd.f32 %v3579_v31, %v3536_v22  ;;  %v8119_v22 = vld [vmem:[#allocation12_spill] sm:$0xff] }
 0x565   : > { %v4012_v8 = vadd.f32 %v7946_v32, %v3959_v61 }
 0x567   : > { %v3632_v21 = vpop.xlane.xlu1 %3631  ;;  %v4065_v43 = vadd.f32 %v7956_v29, %v4012_v8 }
 0x568   : > { %v8019_v26 = vpop.xlane.xlu0 %4420  ;;  %v3642_v57 = vadd.f32 %v3632_v21, %v3589_v25 }
 0x56a   : > { %v3695_v62 = vadd.f32 %v7882_v7, %v3642_v57 }
 0x56b   : > { %v4321_v34 = vpop.xlane.xlu1 %4320 }
 0x56c   : > { %v8023_v17 = vpop.xlane.xlu0 %4423  ;;  %v3748_v0 = vadd.f32 %v7896_v47, %v3695_v62  ;;  %v4014_v47 = vadd.f32 %v8117_v5, %v3961_v11 }
 0x56e   : > { %v3801_v59 = vadd.f32 %v7910_v2, %v3748_v0  ;;  %v4118_v2 = vadd.f32 %v7966_v38, %v4065_v43  ;;  %v4067_v29 = vadd.f32 %v8118_v15, %v4014_v47  ;;  %v8120_v0 = vld [vmem:[#allocation14_spill] sm:$0xff] }
 0x56f   : > { %v3944_v36 = vpop.xlane.xlu1 %3943 }
 0x570   : > { %v4050_v19 = vpop.xlane.xlu0 %4049  ;;  %v3854_v14 = vadd.f32 %v7922_v1, %v3801_v59  ;;  %v3958_v7 = vadd.f32 %v3944_v36, %v7987_v56  ;;  %v4171_v38 = vadd.f32 %v7971_v41, %v4118_v2  ;;  %v4120_v63 = vadd.f32 %v8119_v22, %v4067_v29 }
 0x572   : > { %v3907_v58 = vadd.f32 %v7936_v4, %v3854_v14  ;;  %v4173_v41 = vadd.f32 %v8120_v0, %v4120_v63 }
 0x573   : > { %v3997_v9 = vpop.xlane.xlu1 %3996 }
 0x574   : > { %v4103_v12 = vpop.xlane.xlu0 %4102  ;;  %v3960_v32 = vadd.f32 %v7992_v55, %v3907_v58  ;;  %v4011_v33 = vadd.f32 %v3997_v9, %v3958_v7  ;;  %v5765_v9 = vmov 1934713408  }
 0x575   : > { %v4511_v5 = vunpack.c.l.s4 %v5765_v9 }
 0x576   : > { %v4013_v28 = vadd.f32 %v7994_v50, %v3960_v32  ;;  %v4064_v13 = vadd.f32 %v4050_v19, %v4011_v33 }
 0x577   : > { %v4415_v1 = vpop.xlane.xlu1 %4414 }
 0x578   : > { %v4156_v23 = vpop.xlane.xlu0 %4155  ;;  %v4066_v4 = vadd.f32 %v7996_v45, %v4013_v28  ;;  %v4117_v37 = vadd.f32 %v4103_v12, %v4064_v13  ;;  %v4433_v56 = vadd.f32 %v4415_v1, %v7990_v53  ;;  %v4224_v53 = vadd.f32 %v8005_v54, %v4171_v38 }
 0x579   : > { %v4512_v28 = vunpack.c.0.s8 %v4511_v5 }
 0x57a   : > { %v4119_v46 = vadd.f32 %v7998_v48, %v4066_v4  ;;  %v4170_v31 = vadd.f32 %v4156_v23, %v4117_v37  ;;  %v4458_v55 = vrot.slane %v4433_v56, %v7852_v20  ;;  %v4277_v8 = vadd.f32 %v8009_v16, %v4224_v53 }
 0x57b   : > { %v4371_v50 = vpop.xlane.xlu1 %4370  ;;  %v4515_v56 = vsub.s32 %v4512_v28, %v7840_v18 }
 0x57c   : > { %v4206_v24 = vpop.xlane.xlu0 %4205  ;;  %v4172_v25 = vadd.f32 %v8000_v10, %v4119_v46  ;;  %v4223_v21 = vadd.f32 %v7944_v60, %v4170_v31  ;;  %v4482_v45 = vsel %vm4481_vm5, %v4458_v55, %v7874_v35  ;;  %v4226_v60 = vadd.f32 %v6929_v51, %v4173_v41 }
 0x57d   : > { %v4222_v35 = vadd.f32 %v4206_v24, %v7983_v3  ;;  %v8121_v31 = vmov 0.0  }
 0x57e   : > { %v4225_v57 = vadd.f32 %v6945_v30, %v4172_v25  ;;  %v4276_v48 = vadd.f32 %v7954_v6, %v4223_v21  ;;  %v4330_v30 = vadd.f32 %v8013_v42, %v4277_v8  ;;  %v4279_v14 = vadd.f32 %v7071_v39, %v4226_v60 }
 0x57f   : > { %v4374_v62 = vpop.xlane.xlu1 %4373  ;;  %v4593_v60 = vsub.s32 0, %v7840_v18 }
 0x580   : > { %v4259_v61 = vpop.xlane.xlu0 %4258  ;;  %v4278_v59 = vadd.f32 %v7076_v27, %v4225_v57  ;;  %v4329_v10 = vadd.f32 %v7964_v52, %v4276_v48  ;;  %v4383_v16 = vadd.f32 %v4371_v50, %v4330_v30  ;;  %v5764_v27 = vmov 1983009808  }
 0x581   : > { %v4275_v36 = vadd.f32 %v4259_v61, %v4222_v35  ;;  %v4496_v58 = vunpack.c.l.s4 %v5764_v27  ;;  %v4332_v42 = vadd.f32 %v8017_v49, %v4279_v14 }
 0x582   : > { %v4331_v6 = vadd.f32 %v4321_v34, %v4278_v59  ;;  %v4382_v44 = vadd.f32 %v8003_v40, %v4329_v10  ;;  %v4436_v34 = vadd.f32 %v8023_v17, %v4383_v16 }
 0x583   : > { %v4377_v54 = vpop.xlane.xlu1 %4376  ;;  %v4497_v39 = vunpack.c.0.s8 %v4496_v58 }
 0x584   : > { %v4312_v19 = vpop.xlane.xlu0 %4311  ;;  %v4435_v51 = vadd.f32 %v8019_v26, %v4382_v44  ;;  %v4384_v12 = vadd.f32 %v4374_v62, %v4331_v6  ;;  %v4385_v32 = vadd.f32 %v4377_v54, %v4332_v42  ;;  %v4470_v13 = vrot.slane %v4436_v34, %v7852_v20 }
 0x585   : > { %v4328_v43 = vadd.f32 %v4312_v19, %v4275_v36  ;;  %v4500_v15 = vsub.s32 %v4497_v39, %v7840_v18 }
 0x586   : > { %v4466_v2 = vrot.slane %v4435_v51, %v7852_v20 }
 0x587   : > { %v4427_v7 = vpop.xlane.xlu1 %4426 }
 0x588   : > { %v4365_v11 = vpop.xlane.xlu0 %4364  ;;  %v4437_v47 = vadd.f32 %v4427_v7, %v4384_v12 }
 0x589   : > { %v4381_v52 = vadd.f32 %v4365_v11, %v4328_v43 }
 0x58a   : > { %v4474_v17 = vrot.slane %v4437_v47, %v7852_v20 }
 0x58b   : > { %v4589_v61 = vpop.permute.xlu1 %4588 }
 0x58c   : > { %v4418_v3 = vpop.xlane.xlu0 %4417  ;;  %v4594_v6 = vrot.slane %v4589_v61, %v4593_v60 }
 0x58d   : > { %v4434_v40 = vadd.f32 %v4418_v3, %v4381_v52 }
 0x58f   : > { %v4462_v33 = vrot.slane %v4434_v40, %v7852_v20 }
 0x590   : > { %v4430_v26 = vpop.xlane.xlu0 %4429 }
 0x591   : > { %v4484_v23 = vsel %vm4483_vm6, %v4462_v33, %v4482_v45  ;;  %v4438_v49 = vadd.f32 %v4430_v26, %v4385_v32 }
 0x592   : > { %v4486_v1 = vsel %vm4485_vm7, %v4466_v2, %v4484_v23 }
 0x593   : > { %v4478_v29 = vrot.slane %v4438_v49, %v7852_v20  ;;  %v4488_v4 = vsel %vm4487_vm8, %v4470_v13, %v4486_v1 }
 0x594   : > { %v4490_v37 = vsel %vm4489_vm9, %v4474_v17, %v4488_v4 }
 0x595   : > { %v4492_v46 = vsel %vm4491_vm10, %v4478_v29, %v4490_v37 }
 0x596   : > { %v4494_v55 = vcombine.high %v4492_v46, %v8121_v31  ;;  %v4501_v38 = vrot.slane %v4492_v46, %v4500_v15 }
 0x598   : > { %v4516_v24 = vrot.slane %v4501_v38, %v4515_v56  ;;  %v4509_v50 = vcombine.high %v4501_v38, %v8121_v31  ;;  %v4508_v25 = vrot.slane %v4494_v55, %v4500_v15 }
 0x59a   : > { %v4539_v22 = vcombine.high %v4516_v24, %v8121_v31  ;;  %v4523_v63 = vrot.slane %v4509_v50, %v4515_v56  ;;  %v4531_v21 = vrot.slane %v4508_v25, %v4515_v56  ;;  %v4524_v45 = vcombine.high %v4508_v25, %v8121_v31 }
 0x59c   : > { %4544 = vrot.lane.b32.xlu0 %v4539_v22, %s5766_s20  ;;  %4548 = vrot.lane.b32.xlu1 %v4523_v63, %s5767_s21  ;;  %v4540_v20 = vcombine.high %v4523_v63, %v8121_v31  ;;  %v4541_v53 = vcombine.high %v4531_v21, %v8121_v31  ;;  %v4538_v57 = vrot.slane %v4524_v45, %v4515_v56 }
 0x59e   : > { %v4542_v48 = vcombine.high %v4538_v57, %v8121_v31 }
 0x5a0   : > { %4552 = vrot.lane.b32.xlu1 %v4540_v20, %s5768_s22  ;;  %4556 = vrot.lane.b32.xlu0 %v4531_v21, %s5769_s23 }
 0x5a4   : > { %4560 = vrot.lane.b32.xlu1 %v4541_v53, %s5770_s24  ;;  %4564 = vrot.lane.b32.xlu0 %v4538_v57, %s5771_s18 }
 0x5a8   : > { %4568 = vrot.lane.b32.xlu1 %v4542_v48, %s5772_s25 }
 0x60e   : > { %v4545_v62 = vpop.permute.xlu0 %4544  ;;  %v4549_v0 = vpop.permute.xlu1 %4548 }
 0x60f   : > { %v4572_v41 = vsel %vm4571_vm11, %v4516_v24, %v4545_v62 }
 0x610   : > { %v4574_v8 = vsel %vm4573_vm12, %v4572_v41, %v4549_v0 }
 0x612   : > { %v4557_v59 = vpop.permute.xlu0 %4556  ;;  %v4553_v10 = vpop.permute.xlu1 %4552 }
 0x613   : > { %v4576_v19 = vsel %vm4575_vm13, %v4574_v8, %v4553_v10 }
 0x614   : > { %v4578_v35 = vsel %vm4577_vm14, %v4576_v19, %v4557_v59 }
 0x616   : > { %v4561_v54 = vpop.permute.xlu1 %4560  ;;  %v4565_v30 = vpop.permute.xlu0 %4564 }
 0x617   : > { %v4580_v36 = vsel %vm4579_vm15, %v4578_v35, %v4561_v54 }
 0x618   : > { %v4582_v44 = vsel %vm4581_vm0, %v4580_v36, %v4565_v30 }
 0x61a   : > { %v4569_v11 = vpop.permute.xlu1 %4568 }
 0x61b   : > { %v4584_v14 = vsel %vm4583_vm1, %v4582_v44, %v4569_v11 }
 0x61c   : > { %v4595_v16 = vadd.f32 %v4594_v6, %v4584_v14 }
 0x61e   : > { %4597 = vst.msk [vmem:[%s276_s6] sm:$0x1] %vm4596_vm2, %v4595_v16 }
 0x61f PF: > { %s19_s26 = sadd.s32 1, %s5758_s26  }
 0x620   : > { %p16_p4 = scmp.ge.s32.totalorder %s19_s26, 4  }
 0x622   :  { %18 = sbr.rel (!%p16_p4) target bundleno = 3 (0x3), region = 83 }

</bundles_post_ra>
